<compile_context>
chip_gen: v6e
topology: v6e:2x2x1
jax: 0.10.0
libtpu: 0.0.40
codegen_flags: <defaults>
</compile_context>

<pallas_src>
import functools

import jax
import jax.numpy as jnp
from jax.experimental import pallas as pl
from jax.experimental.pallas import tpu as pltpu


_VMEM = pl.BlockSpec(memory_space=pltpu.MemorySpace.VMEM)


# ----------------------------- Pallas kernels -----------------------------

def conv3x3_kernel(x_ref, wt_ref, b_ref, aux_ref, o_ref, *, h, w, pool):
    """3x3 'same' conv + bias + ReLU (+ optional fused 2x2 avg-pool).

    Padded-flat layout: (H, W, C) is stored as ((H+2)*(W+2)+2, C) with zero
    spatial border and one zero guard row at each end, so im2col tap (ky, kx)
    for flat output row m is just x[m + ky*(W+2) + kx, :].

    x_ref  : (1, Lf_in, Cin)   bf16, pads/guards exactly zero
    wt_ref : (9, Cin, Cout)    bf16, tap-major (ky*3 + kx)
    b_ref  : (1, Cout)         f32
    aux_ref: pool=False -> (H*(W+2), 1) f32 {0,1} interior-column mask
             pool=True  -> (W/2, W)     f32 horizontal 2x2-pool matrix (0.25s)
    o_ref  : (1, Lf_out, Cout) bf16 padded-flat output
    """
    wp2 = w + 2
    m_out = h * wp2
    cout = o_ref.shape[-1]

    # 9 taps x one MXU dot each, real (unpadded) Cin/Cout, f32 accumulation.
    acc = None
    for ky in range(3):
        for kx in range(3):
            off = ky * wp2 + kx                      # constant flat-row shift
            tap = x_ref[0, off:off + m_out, :]       # (m_out, Cin) bf16
            part = jnp.dot(tap, wt_ref[ky * 3 + kx],
                           preferred_element_type=jnp.float32)
            acc = part if acc is None else acc + part
    acc = jnp.maximum(acc + b_ref[...], 0.0)         # (m_out, Cout) f32

    if not pool:
        # Zero the pad columns (their taps wrap across rows), then store back
        # in padded-flat layout: interior shifted by wp2+1 flat rows, zero
        # head/tail (top pad row + guard / bottom pad row + guard).
        out = (acc * aux_ref[...]).astype(o_ref.dtype)
        zpad = jnp.zeros((wp2 + 1, cout), o_ref.dtype)
        o_ref[0, 0:wp2 + 1, :] = zpad
        o_ref[0, wp2 + 1 + m_out:, :] = zpad
        o_ref[0, wp2 + 1:wp2 + 1 + m_out, :] = out
    else:
        # Fused AvgPool2d(2, 2): only interior columns are read, so no column
        # mask is needed.  Horizontal pair-average via a tiny constant matmul,
        # vertical pair-sum via leading-dim slice adds; all in f32.
        ho, wo = h // 2, w // 2
        wp2o = wo + 2
        hp = aux_ref[...]                            # (wo, w) f32, hoisted
        o_ref[0] = jnp.zeros((o_ref.shape[1], cout), o_ref.dtype)
        for yo in range(ho):
            ra = acc[(2 * yo) * wp2 + 1:(2 * yo) * wp2 + 1 + w, :]
            rb = acc[(2 * yo + 1) * wp2 + 1:(2 * yo + 1) * wp2 + 1 + w, :]
            pooled = jnp.dot(hp, ra + rb,
                             preferred_element_type=jnp.float32)  # (wo, Cout)
            base = (yo + 1) * wp2o + 2               # row yo, col 1 of output
            o_ref[0, base:base + wo, :] = pooled.astype(o_ref.dtype)


def gap_fc_kernel(x_ref, w_ref, b_ref, o_ref, *, inv_count):
    # x_ref: (N, Lf, C) bf16 padded-flat; pads are exact zeros, so summing the
    # whole flat axis equals summing the real H*W positions.
    s = jnp.sum(x_ref[...].astype(jnp.float32), axis=1) * inv_count   # (N, C)
    out = jnp.dot(s.astype(jnp.bfloat16), w_ref[...],
                  preferred_element_type=jnp.float32) + b_ref[...]
    o_ref[...] = out


# ----------------------------- wrappers -----------------------------

def to_padded_flat(x_nhwc):
    """(N, H, W, C) -> (N, (H+2)*(W+2)+2, C) padded-flat layout (zeros at pads)."""
    n, h, w, c = x_nhwc.shape
    xp = jnp.pad(x_nhwc, ((0, 0), (1, 1), (1, 1), (0, 0)))
    flat = xp.reshape(n, (h + 2) * (w + 2), c)
    return jnp.pad(flat, ((0, 0), (1, 1), (0, 0)))          # guard rows


def conv3x3_block(x_flat, w_hwio, b, h, w, pool):
    """One conv+ReLU (+fused 2x2 avg-pool) layer on a padded-flat activation."""
    n, lf, cin = x_flat.shape
    wp2 = w + 2
    m_out = h * wp2
    assert lf == (h + 2) * wp2 + 2, (lf, h, w)
    cout = w_hwio.shape[-1]

    wt = w_hwio.reshape(9, cin, cout).astype(jnp.bfloat16)  # tap-major weights
    b2 = b.reshape(1, cout).astype(jnp.float32)

    if pool:
        assert h % 2 == 0 and w % 2 == 0, "AvgPool2d(2,2) requires even H, W"
        h_out, w_out = h // 2, w // 2
        lf_out = (h_out + 2) * (w_out + 2) + 2
        r = jnp.arange(w_out)[:, None]
        c = jnp.arange(w)[None, :]
        aux = ((c == 2 * r) | (c == 2 * r + 1)).astype(jnp.float32) * 0.25
        aux_spec = pl.BlockSpec((w_out, w), lambda i: (0, 0))
    else:
        h_out, w_out = h, w
        lf_out = lf
        col = jnp.arange(m_out) % wp2
        aux = ((col >= 1) & (col <= w)).astype(jnp.float32).reshape(m_out, 1)
        aux_spec = pl.BlockSpec((m_out, 1), lambda i: (0, 0))

    cost = pl.CostEstimate(
        flops=2 * n * m_out * 9 * cin * cout,
        transcendentals=0,
        bytes_accessed=int(x_flat.size * 2 + wt.size * 2 + b2.size * 4
                           + aux.size * 4 + n * lf_out * cout * 2))

    y = pl.pallas_call(
        functools.partial(conv3x3_kernel, h=h, w=w, pool=pool),
        out_shape=jax.ShapeDtypeStruct((n, lf_out, cout), jnp.bfloat16),
        grid=(n,),
        in_specs=[
            pl.BlockSpec((1, lf, cin), lambda i: (i, 0, 0)),
            pl.BlockSpec((9, cin, cout), lambda i: (0, 0, 0)),   # resident
            pl.BlockSpec((1, cout), lambda i: (0, 0)),
            aux_spec,
        ],
        out_specs=pl.BlockSpec((1, lf_out, cout), lambda i: (i, 0, 0)),
        compiler_params=pltpu.CompilerParams(
            dimension_semantics=("parallel",),
            vmem_limit_bytes=32 * 1024 * 1024),
        cost_estimate=cost,
    )(x_flat, wt, b2, aux)
    return y, h_out, w_out


def gap_fc(x_flat, fc_w, fc_b, hw_count):
    # AdaptiveAvgPool2d((1,1)) + flatten + Linear, one small kernel.
    n, lf, c = x_flat.shape
    k = fc_w.shape[-1]
    cost = pl.CostEstimate(
        flops=2 * n * c * k + n * lf * c, transcendentals=0,
        bytes_accessed=int(x_flat.size * 2 + fc_w.size * 2 + fc_b.size * 4
                           + n * k * 4))
    return pl.pallas_call(
        functools.partial(gap_fc_kernel, inv_count=1.0 / float(hw_count)),
        out_shape=jax.ShapeDtypeStruct((n, k), jnp.float32),
        in_specs=[_VMEM, _VMEM, _VMEM],
        out_specs=_VMEM,
        cost_estimate=cost,
    )(x_flat, fc_w.astype(jnp.bfloat16), fc_b.reshape(1, k).astype(jnp.float32))


# ----------------------------- model -----------------------------

def init_params(key, widths, num_classes, in_channels=3):
    layers = []
    cin = in_channels
    for v in widths:
        if v == 'M':
            layers.append({'type': 'pool'})
        else:
            key, k1, k2 = jax.random.split(key, 3)
            fan_in = cin * 9
            std = (2.0 / fan_in) ** 0.5
            wgt = jax.random.normal(k1, (3, 3, cin, v), jnp.float32) * std
            bias = jax.random.normal(k2, (v,), jnp.float32) * 0.01
            layers.append({'type': 'conv', 'w': wgt, 'b': bias})
            cin = v
    key, k1, k2 = jax.random.split(key, 3)
    bound = 1.0 / (cin ** 0.5)
    fc_w = jax.random.uniform(k1, (cin, num_classes), jnp.float32, -bound, bound)
    fc_b = jax.random.uniform(k2, (num_classes,), jnp.float32, -bound, bound)
    return layers, fc_w, fc_b


def vgg_forward(x_nchw, layers, fc_w, fc_b):
    # Matches VGG.forward: features -> flatten -> fc -> squeeze.
    x = jnp.transpose(x_nchw, (0, 2, 3, 1)).astype(jnp.bfloat16)   # NCHW->NHWC
    n, h, w, _ = x.shape
    xf = to_padded_flat(x)     # the only wrapper-side layout pass in the net
    i = 0
    while i < len(layers):
        layer = layers[i]
        assert layer['type'] == 'conv', "standalone 'M' not supported"
        pool = (i + 1 < len(layers)) and layers[i + 1]['type'] == 'pool'
        xf, h, w = conv3x3_block(xf, layer['w'], layer['b'], h, w, pool)
        i += 2 if pool else 1
    out = gap_fc(xf, fc_w, fc_b, h * w)
    # PyTorch module ends with `.squeeze()` (drops ALL size-1 dims).
    return jnp.squeeze(out)


def vgg_reference(x_nchw, layers, fc_w, fc_b):
    # Pure-JAX reference with the SAME bf16-storage / f32-accumulate dtype flow
    # as the Pallas path (a deliberate, documented deviation from the f32
    # PyTorch module), so the comparison isolates kernel correctness.
    x = jnp.transpose(x_nchw, (0, 2, 3, 1)).astype(jnp.bfloat16)
    i = 0
    while i < len(layers):
        layer = layers[i]
        pool = (i + 1 < len(layers)) and layers[i + 1]['type'] == 'pool'
        y = jax.lax.conv_general_dilated(
            x, layer['w'].astype(jnp.bfloat16), (1, 1), 'SAME',
            dimension_numbers=('NHWC', 'HWIO', 'NHWC'),
            preferred_element_type=jnp.float32)
        y = jnp.maximum(y + layer['b'].reshape(1, 1, 1, -1), 0.0)   # f32
        if pool:
            nb, hh, ww, cc = y.shape
            y = y.reshape(nb, hh // 2, 2, ww // 2, 2, cc).sum(axis=(2, 4)) * 0.25
        x = y.astype(jnp.bfloat16)
        i += 2 if pool else 1
    pooled = x.astype(jnp.float32).mean(axis=(1, 2)).astype(jnp.bfloat16)
    out = jnp.dot(pooled, fc_w.astype(jnp.bfloat16),
                  preferred_element_type=jnp.float32) + fc_b
    return jnp.squeeze(out)


if __name__ == "__main__":
    key = jax.random.PRNGKey(0)
    # Small VGG via the module's `widths` argument (in_channels fixed at 3).
    widths = [8, 'M', 16, 'M', 32, 32, 'M']
    num_classes = 10

    key, kparams, kx = jax.random.split(key, 3)
    layers, fc_w, fc_b = init_params(kparams, widths, num_classes)
    x = jax.random.normal(kx, (2, 3, 16, 16), jnp.float32)     # NCHW input

    fwd = jax.jit(functools.partial(vgg_forward, layers=layers,
                                    fc_w=fc_w, fc_b=fc_b))
    out = jax.block_until_ready(fwd(x))

    ref = vgg_reference(x, layers, fc_w, fc_b)
    assert out.shape == (2, num_classes), out.shape
    err = float(jnp.max(jnp.abs(out - jnp.asarray(ref, out.dtype))))
    assert jnp.allclose(out, ref, atol=5e-2, rtol=5e-2), \
        f"mismatch: max abs err {err}"

    print("KERNEL_OK")
</pallas_src>

<mosaic_0001>
module attributes {stable_mosaic.version = 11 : i64} {
  func.func @conv3x3_kernel(%arg0: i32, %arg1: memref<1x102x8xbf16, #tpu.memory_space<vmem>>, %arg2: memref<9x8x16xbf16, #tpu.memory_space<vmem>>, %arg3: memref<1x16xf32, #tpu.memory_space<vmem>>, %arg4: memref<4x8xf32, #tpu.memory_space<vmem>>, %arg5: memref<1x38x16xbf16, #tpu.memory_space<vmem>>) attributes {dimension_semantics = [#tpu.dimension_semantics<parallel>], iteration_bounds = array<i64: 2>, scalar_prefetch = 0 : i64, scratch_operands = 0 : i64, tpu.core_type = #tpu.core_type<tc>, window_params = [{transform_indices = @transform_0, window_bounds = array<i64: 1, 102, 8>}, {pipeline_mode = #tpu.pipeline_mode<synchronous>, transform_indices = @transform_1, window_bounds = array<i64: 9, 8, 16>}, {pipeline_mode = #tpu.pipeline_mode<synchronous>, transform_indices = @transform_2, window_bounds = array<i64: 1, 16>}, {pipeline_mode = #tpu.pipeline_mode<synchronous>, transform_indices = @transform_3, window_bounds = array<i64: 4, 8>}, {transform_indices = @transform_4, window_bounds = array<i64: 1, 38, 16>}]} {
    %c0 = arith.constant 0 : index
    %c0_0 = arith.constant 0 : index
    %c0_1 = arith.constant 0 : index
    %0 = vector.load %arg1[%c0, %c0_0, %c0_1] : memref<1x102x8xbf16, #tpu.memory_space<vmem>>, vector<1x80x8xbf16>
    %1 = vector.shape_cast %0 : vector<1x80x8xbf16> to vector<80x8xbf16>
    %c0_2 = arith.constant 0 : index
    %c0_3 = arith.constant 0 : index
    %c0_4 = arith.constant 0 : index
    %2 = vector.load %arg2[%c0_2, %c0_3, %c0_4] : memref<9x8x16xbf16, #tpu.memory_space<vmem>>, vector<1x8x16xbf16>
    %3 = vector.shape_cast %2 : vector<1x8x16xbf16> to vector<8x16xbf16>
    %cst = arith.constant dense<0.000000e+00> : vector<80x16xf32>
    %4 = tpu.matmul %1, %3, %cst {dimension_numbers = #tpu.dot_dimension_numbers<[1], [0], [0], [1], [0, 0, 1, 1], [], []>} : vector<80x8xbf16>, vector<8x16xbf16>, vector<80x16xf32> -> vector<80x16xf32>
    %c0_5 = arith.constant 0 : index
    %c1 = arith.constant 1 : index
    %c0_6 = arith.constant 0 : index
    %5 = vector.load %arg1[%c0_5, %c1, %c0_6] : memref<1x102x8xbf16, #tpu.memory_space<vmem>>, vector<1x80x8xbf16>
    %6 = vector.shape_cast %5 : vector<1x80x8xbf16> to vector<80x8xbf16>
    %c1_7 = arith.constant 1 : index
    %c0_8 = arith.constant 0 : index
    %c0_9 = arith.constant 0 : index
    %7 = vector.load %arg2[%c1_7, %c0_8, %c0_9] : memref<9x8x16xbf16, #tpu.memory_space<vmem>>, vector<1x8x16xbf16>
    %8 = vector.shape_cast %7 : vector<1x8x16xbf16> to vector<8x16xbf16>
    %cst_10 = arith.constant dense<0.000000e+00> : vector<80x16xf32>
    %9 = tpu.matmul %6, %8, %cst_10 {dimension_numbers = #tpu.dot_dimension_numbers<[1], [0], [0], [1], [0, 0, 1, 1], [], []>} : vector<80x8xbf16>, vector<8x16xbf16>, vector<80x16xf32> -> vector<80x16xf32>
    %10 = arith.addf %4, %9 : vector<80x16xf32>
    %c0_11 = arith.constant 0 : index
    %c2 = arith.constant 2 : index
    %c0_12 = arith.constant 0 : index
    %11 = vector.load %arg1[%c0_11, %c2, %c0_12] : memref<1x102x8xbf16, #tpu.memory_space<vmem>>, vector<1x80x8xbf16>
    %12 = vector.shape_cast %11 : vector<1x80x8xbf16> to vector<80x8xbf16>
    %c2_13 = arith.constant 2 : index
    %c0_14 = arith.constant 0 : index
    %c0_15 = arith.constant 0 : index
    %13 = vector.load %arg2[%c2_13, %c0_14, %c0_15] : memref<9x8x16xbf16, #tpu.memory_space<vmem>>, vector<1x8x16xbf16>
    %14 = vector.shape_cast %13 : vector<1x8x16xbf16> to vector<8x16xbf16>
    %cst_16 = arith.constant dense<0.000000e+00> : vector<80x16xf32>
    %15 = tpu.matmul %12, %14, %cst_16 {dimension_numbers = #tpu.dot_dimension_numbers<[1], [0], [0], [1], [0, 0, 1, 1], [], []>} : vector<80x8xbf16>, vector<8x16xbf16>, vector<80x16xf32> -> vector<80x16xf32>
    %16 = arith.addf %10, %15 : vector<80x16xf32>
    %c0_17 = arith.constant 0 : index
    %c10 = arith.constant 10 : index
    %c0_18 = arith.constant 0 : index
    %17 = vector.load %arg1[%c0_17, %c10, %c0_18] : memref<1x102x8xbf16, #tpu.memory_space<vmem>>, vector<1x80x8xbf16>
    %18 = vector.shape_cast %17 : vector<1x80x8xbf16> to vector<80x8xbf16>
    %c3 = arith.constant 3 : index
    %c0_19 = arith.constant 0 : index
    %c0_20 = arith.constant 0 : index
    %19 = vector.load %arg2[%c3, %c0_19, %c0_20] : memref<9x8x16xbf16, #tpu.memory_space<vmem>>, vector<1x8x16xbf16>
    %20 = vector.shape_cast %19 : vector<1x8x16xbf16> to vector<8x16xbf16>
    %cst_21 = arith.constant dense<0.000000e+00> : vector<80x16xf32>
    %21 = tpu.matmul %18, %20, %cst_21 {dimension_numbers = #tpu.dot_dimension_numbers<[1], [0], [0], [1], [0, 0, 1, 1], [], []>} : vector<80x8xbf16>, vector<8x16xbf16>, vector<80x16xf32> -> vector<80x16xf32>
    %22 = arith.addf %16, %21 : vector<80x16xf32>
    %c0_22 = arith.constant 0 : index
    %c11 = arith.constant 11 : index
    %c0_23 = arith.constant 0 : index
    %23 = vector.load %arg1[%c0_22, %c11, %c0_23] : memref<1x102x8xbf16, #tpu.memory_space<vmem>>, vector<1x80x8xbf16>
    %24 = vector.shape_cast %23 : vector<1x80x8xbf16> to vector<80x8xbf16>
    %c4 = arith.constant 4 : index
    %c0_24 = arith.constant 0 : index
    %c0_25 = arith.constant 0 : index
    %25 = vector.load %arg2[%c4, %c0_24, %c0_25] : memref<9x8x16xbf16, #tpu.memory_space<vmem>>, vector<1x8x16xbf16>
    %26 = vector.shape_cast %25 : vector<1x8x16xbf16> to vector<8x16xbf16>
    %cst_26 = arith.constant dense<0.000000e+00> : vector<80x16xf32>
    %27 = tpu.matmul %24, %26, %cst_26 {dimension_numbers = #tpu.dot_dimension_numbers<[1], [0], [0], [1], [0, 0, 1, 1], [], []>} : vector<80x8xbf16>, vector<8x16xbf16>, vector<80x16xf32> -> vector<80x16xf32>
    %28 = arith.addf %22, %27 : vector<80x16xf32>
    %c0_27 = arith.constant 0 : index
    %c12 = arith.constant 12 : index
    %c0_28 = arith.constant 0 : index
    %29 = vector.load %arg1[%c0_27, %c12, %c0_28] : memref<1x102x8xbf16, #tpu.memory_space<vmem>>, vector<1x80x8xbf16>
    %30 = vector.shape_cast %29 : vector<1x80x8xbf16> to vector<80x8xbf16>
    %c5 = arith.constant 5 : index
    %c0_29 = arith.constant 0 : index
    %c0_30 = arith.constant 0 : index
    %31 = vector.load %arg2[%c5, %c0_29, %c0_30] : memref<9x8x16xbf16, #tpu.memory_space<vmem>>, vector<1x8x16xbf16>
    %32 = vector.shape_cast %31 : vector<1x8x16xbf16> to vector<8x16xbf16>
    %cst_31 = arith.constant dense<0.000000e+00> : vector<80x16xf32>
    %33 = tpu.matmul %30, %32, %cst_31 {dimension_numbers = #tpu.dot_dimension_numbers<[1], [0], [0], [1], [0, 0, 1, 1], [], []>} : vector<80x8xbf16>, vector<8x16xbf16>, vector<80x16xf32> -> vector<80x16xf32>
    %34 = arith.addf %28, %33 : vector<80x16xf32>
    %c0_32 = arith.constant 0 : index
    %c20 = arith.constant 20 : index
    %c0_33 = arith.constant 0 : index
    %35 = vector.load %arg1[%c0_32, %c20, %c0_33] : memref<1x102x8xbf16, #tpu.memory_space<vmem>>, vector<1x80x8xbf16>
    %36 = vector.shape_cast %35 : vector<1x80x8xbf16> to vector<80x8xbf16>
    %c6 = arith.constant 6 : index
    %c0_34 = arith.constant 0 : index
    %c0_35 = arith.constant 0 : index
    %37 = vector.load %arg2[%c6, %c0_34, %c0_35] : memref<9x8x16xbf16, #tpu.memory_space<vmem>>, vector<1x8x16xbf16>
    %38 = vector.shape_cast %37 : vector<1x8x16xbf16> to vector<8x16xbf16>
    %cst_36 = arith.constant dense<0.000000e+00> : vector<80x16xf32>
    %39 = tpu.matmul %36, %38, %cst_36 {dimension_numbers = #tpu.dot_dimension_numbers<[1], [0], [0], [1], [0, 0, 1, 1], [], []>} : vector<80x8xbf16>, vector<8x16xbf16>, vector<80x16xf32> -> vector<80x16xf32>
    %40 = arith.addf %34, %39 : vector<80x16xf32>
    %c0_37 = arith.constant 0 : index
    %c21 = arith.constant 21 : index
    %c0_38 = arith.constant 0 : index
    %41 = vector.load %arg1[%c0_37, %c21, %c0_38] : memref<1x102x8xbf16, #tpu.memory_space<vmem>>, vector<1x80x8xbf16>
    %42 = vector.shape_cast %41 : vector<1x80x8xbf16> to vector<80x8xbf16>
    %c7 = arith.constant 7 : index
    %c0_39 = arith.constant 0 : index
    %c0_40 = arith.constant 0 : index
    %43 = vector.load %arg2[%c7, %c0_39, %c0_40] : memref<9x8x16xbf16, #tpu.memory_space<vmem>>, vector<1x8x16xbf16>
    %44 = vector.shape_cast %43 : vector<1x8x16xbf16> to vector<8x16xbf16>
    %cst_41 = arith.constant dense<0.000000e+00> : vector<80x16xf32>
    %45 = tpu.matmul %42, %44, %cst_41 {dimension_numbers = #tpu.dot_dimension_numbers<[1], [0], [0], [1], [0, 0, 1, 1], [], []>} : vector<80x8xbf16>, vector<8x16xbf16>, vector<80x16xf32> -> vector<80x16xf32>
    %46 = arith.addf %40, %45 : vector<80x16xf32>
    %c0_42 = arith.constant 0 : index
    %c22 = arith.constant 22 : index
    %c0_43 = arith.constant 0 : index
    %47 = vector.load %arg1[%c0_42, %c22, %c0_43] : memref<1x102x8xbf16, #tpu.memory_space<vmem>>, vector<1x80x8xbf16>
    %48 = vector.shape_cast %47 : vector<1x80x8xbf16> to vector<80x8xbf16>
    %c8 = arith.constant 8 : index
    %c0_44 = arith.constant 0 : index
    %c0_45 = arith.constant 0 : index
    %49 = vector.load %arg2[%c8, %c0_44, %c0_45] : memref<9x8x16xbf16, #tpu.memory_space<vmem>>, vector<1x8x16xbf16>
    %50 = vector.shape_cast %49 : vector<1x8x16xbf16> to vector<8x16xbf16>
    %cst_46 = arith.constant dense<0.000000e+00> : vector<80x16xf32>
    %51 = tpu.matmul %48, %50, %cst_46 {dimension_numbers = #tpu.dot_dimension_numbers<[1], [0], [0], [1], [0, 0, 1, 1], [], []>} : vector<80x8xbf16>, vector<8x16xbf16>, vector<80x16xf32> -> vector<80x16xf32>
    %52 = arith.addf %46, %51 : vector<80x16xf32>
    %c0_47 = arith.constant 0 : index
    %c0_48 = arith.constant 0 : index
    %53 = vector.load %arg3[%c0_47, %c0_48] : memref<1x16xf32, #tpu.memory_space<vmem>>, vector<1x16xf32>
    %54 = vector.broadcast %53 : vector<1x16xf32> to vector<80x16xf32>
    %55 = arith.addf %52, %54 : vector<80x16xf32>
    %cst_49 = arith.constant 0.000000e+00 : f32
    %56 = vector.broadcast %cst_49 : f32 to vector<80x16xf32>
    %57 = arith.maximumf %55, %56 : vector<80x16xf32>
    %c0_50 = arith.constant 0 : index
    %c0_51 = arith.constant 0 : index
    %58 = vector.load %arg4[%c0_50, %c0_51] : memref<4x8xf32, #tpu.memory_space<vmem>>, vector<4x8xf32>
    %cst_52 = arith.constant 0.000000e+00 : bf16
    %59 = vector.broadcast %cst_52 : bf16 to vector<38x16xbf16>
    %c0_53 = arith.constant 0 : index
    %c0_54 = arith.constant 0 : index
    %c0_55 = arith.constant 0 : index
    %60 = vector.load %arg5[%c0_53, %c0_54, %c0_55] : memref<1x38x16xbf16, #tpu.memory_space<vmem>>, vector<1x38x16xbf16>
    %61 = vector.shape_cast %60 : vector<1x38x16xbf16> to vector<38x16xbf16>
    %62 = vector.shape_cast %59 : vector<38x16xbf16> to vector<1x38x16xbf16>
    tpu.vector_store %arg5[%c0_53, %c0_54, %c0_55], %62 {strides = array<i32>} : memref<1x38x16xbf16, #tpu.memory_space<vmem>>, vector<1x38x16xbf16>,
    %63 = vector.extract_strided_slice %57 {offsets = [1, 0], sizes = [8, 16], strides = [1, 1]} : vector<80x16xf32> to vector<8x16xf32>
    %64 = vector.extract_strided_slice %57 {offsets = [11, 0], sizes = [8, 16], strides = [1, 1]} : vector<80x16xf32> to vector<8x16xf32>
    %65 = arith.addf %63, %64 : vector<8x16xf32>
    %cst_56 = arith.constant dense<0.000000e+00> : vector<4x16xf32>
    %66 = tpu.matmul %58, %65, %cst_56 {dimension_numbers = #tpu.dot_dimension_numbers<[1], [0], [0], [1], [0, 0, 1, 1], [], []>} : vector<4x8xf32>, vector<8x16xf32>, vector<4x16xf32> -> vector<4x16xf32>
    %67 = arith.truncf %66 : vector<4x16xf32> to vector<4x16xbf16>
    %c0_57 = arith.constant 0 : index
    %c8_58 = arith.constant 8 : index
    %c0_59 = arith.constant 0 : index
    %68 = vector.load %arg5[%c0_57, %c8_58, %c0_59] : memref<1x38x16xbf16, #tpu.memory_space<vmem>>, vector<1x4x16xbf16>
    %69 = vector.shape_cast %68 : vector<1x4x16xbf16> to vector<4x16xbf16>
    %70 = vector.shape_cast %67 : vector<4x16xbf16> to vector<1x4x16xbf16>
    tpu.vector_store %arg5[%c0_57, %c8_58, %c0_59], %70 {strides = array<i32>} : memref<1x38x16xbf16, #tpu.memory_space<vmem>>, vector<1x4x16xbf16>,
    %71 = vector.extract_strided_slice %57 {offsets = [21, 0], sizes = [8, 16], strides = [1, 1]} : vector<80x16xf32> to vector<8x16xf32>
    %72 = vector.extract_strided_slice %57 {offsets = [31, 0], sizes = [8, 16], strides = [1, 1]} : vector<80x16xf32> to vector<8x16xf32>
    %73 = arith.addf %71, %72 : vector<8x16xf32>
    %cst_60 = arith.constant dense<0.000000e+00> : vector<4x16xf32>
    %74 = tpu.matmul %58, %73, %cst_60 {dimension_numbers = #tpu.dot_dimension_numbers<[1], [0], [0], [1], [0, 0, 1, 1], [], []>} : vector<4x8xf32>, vector<8x16xf32>, vector<4x16xf32> -> vector<4x16xf32>
    %75 = arith.truncf %74 : vector<4x16xf32> to vector<4x16xbf16>
    %c0_61 = arith.constant 0 : index
    %c14 = arith.constant 14 : index
    %c0_62 = arith.constant 0 : index
    %76 = vector.load %arg5[%c0_61, %c14, %c0_62] : memref<1x38x16xbf16, #tpu.memory_space<vmem>>, vector<1x4x16xbf16>
    %77 = vector.shape_cast %76 : vector<1x4x16xbf16> to vector<4x16xbf16>
    %78 = vector.shape_cast %75 : vector<4x16xbf16> to vector<1x4x16xbf16>
    tpu.vector_store %arg5[%c0_61, %c14, %c0_62], %78 {strides = array<i32>} : memref<1x38x16xbf16, #tpu.memory_space<vmem>>, vector<1x4x16xbf16>,
    %79 = vector.extract_strided_slice %57 {offsets = [41, 0], sizes = [8, 16], strides = [1, 1]} : vector<80x16xf32> to vector<8x16xf32>
    %80 = vector.extract_strided_slice %57 {offsets = [51, 0], sizes = [8, 16], strides = [1, 1]} : vector<80x16xf32> to vector<8x16xf32>
    %81 = arith.addf %79, %80 : vector<8x16xf32>
    %cst_63 = arith.constant dense<0.000000e+00> : vector<4x16xf32>
    %82 = tpu.matmul %58, %81, %cst_63 {dimension_numbers = #tpu.dot_dimension_numbers<[1], [0], [0], [1], [0, 0, 1, 1], [], []>} : vector<4x8xf32>, vector<8x16xf32>, vector<4x16xf32> -> vector<4x16xf32>
    %83 = arith.truncf %82 : vector<4x16xf32> to vector<4x16xbf16>
    %c0_64 = arith.constant 0 : index
    %c20_65 = arith.constant 20 : index
    %c0_66 = arith.constant 0 : index
    %84 = vector.load %arg5[%c0_64, %c20_65, %c0_66] : memref<1x38x16xbf16, #tpu.memory_space<vmem>>, vector<1x4x16xbf16>
    %85 = vector.shape_cast %84 : vector<1x4x16xbf16> to vector<4x16xbf16>
    %86 = vector.shape_cast %83 : vector<4x16xbf16> to vector<1x4x16xbf16>
    tpu.vector_store %arg5[%c0_64, %c20_65, %c0_66], %86 {strides = array<i32>} : memref<1x38x16xbf16, #tpu.memory_space<vmem>>, vector<1x4x16xbf16>,
    %87 = vector.extract_strided_slice %57 {offsets = [61, 0], sizes = [8, 16], strides = [1, 1]} : vector<80x16xf32> to vector<8x16xf32>
    %88 = vector.extract_strided_slice %57 {offsets = [71, 0], sizes = [8, 16], strides = [1, 1]} : vector<80x16xf32> to vector<8x16xf32>
    %89 = arith.addf %87, %88 : vector<8x16xf32>
    %cst_67 = arith.constant dense<0.000000e+00> : vector<4x16xf32>
    %90 = tpu.matmul %58, %89, %cst_67 {dimension_numbers = #tpu.dot_dimension_numbers<[1], [0], [0], [1], [0, 0, 1, 1], [], []>} : vector<4x8xf32>, vector<8x16xf32>, vector<4x16xf32> -> vector<4x16xf32>
    %91 = arith.truncf %90 : vector<4x16xf32> to vector<4x16xbf16>
    %c0_68 = arith.constant 0 : index
    %c26 = arith.constant 26 : index
    %c0_69 = arith.constant 0 : index
    %92 = vector.load %arg5[%c0_68, %c26, %c0_69] : memref<1x38x16xbf16, #tpu.memory_space<vmem>>, vector<1x4x16xbf16>
    %93 = vector.shape_cast %92 : vector<1x4x16xbf16> to vector<4x16xbf16>
    %94 = vector.shape_cast %91 : vector<4x16xbf16> to vector<1x4x16xbf16>
    tpu.vector_store %arg5[%c0_68, %c26, %c0_69], %94 {strides = array<i32>} : memref<1x38x16xbf16, #tpu.memory_space<vmem>>, vector<1x4x16xbf16>,
    return
  }
  func.func @transform_0(%arg0: i32) -> (i32, i32, i32) {
    %c0_i32 = arith.constant 0 : i32
    %c0_i32_0 = arith.constant 0 : i32
    %c0_i32_1 = arith.constant 0 : i32
    return %arg0, %c0_i32, %c0_i32_0 : i32, i32, i32
  }
  func.func @transform_1(%arg0: i32) -> (i32, i32, i32) {
    %c0_i32 = arith.constant 0 : i32
    %c0_i32_0 = arith.constant 0 : i32
    %c0_i32_1 = arith.constant 0 : i32
    %c0_i32_2 = arith.constant 0 : i32
    return %c0_i32, %c0_i32_0, %c0_i32_1 : i32, i32, i32
  }
  func.func @transform_2(%arg0: i32) -> (i32, i32) {
    %c0_i32 = arith.constant 0 : i32
    %c0_i32_0 = arith.constant 0 : i32
    %c0_i32_1 = arith.constant 0 : i32
    return %c0_i32, %c0_i32_0 : i32, i32
  }
  func.func @transform_3(%arg0: i32) -> (i32, i32) {
    %c0_i32 = arith.constant 0 : i32
    %c0_i32_0 = arith.constant 0 : i32
    %c0_i32_1 = arith.constant 0 : i32
    return %c0_i32, %c0_i32_0 : i32, i32
  }
  func.func @transform_4(%arg0: i32) -> (i32, i32, i32) {
    %c0_i32 = arith.constant 0 : i32
    %c0_i32_0 = arith.constant 0 : i32
    %c0_i32_1 = arith.constant 0 : i32
    return %arg0, %c0_i32, %c0_i32_0 : i32, i32, i32
  }
}

module attributes {stable_mosaic.version = 11 : i64} {
  func.func @conv3x3_kernel(%arg0: i32, %arg1: memref<1x326x3xbf16, #tpu.memory_space<vmem>>, %arg2: memref<9x3x8xbf16, #tpu.memory_space<vmem>>, %arg3: memref<1x8xf32, #tpu.memory_space<vmem>>, %arg4: memref<8x16xf32, #tpu.memory_space<vmem>>, %arg5: memref<1x102x8xbf16, #tpu.memory_space<vmem>>) attributes {dimension_semantics = [#tpu.dimension_semantics<parallel>], iteration_bounds = array<i64: 2>, scalar_prefetch = 0 : i64, scratch_operands = 0 : i64, tpu.core_type = #tpu.core_type<tc>, window_params = [{transform_indices = @transform_0, window_bounds = array<i64: 1, 326, 3>}, {pipeline_mode = #tpu.pipeline_mode<synchronous>, transform_indices = @transform_1, window_bounds = array<i64: 9, 3, 8>}, {pipeline_mode = #tpu.pipeline_mode<synchronous>, transform_indices = @transform_2, window_bounds = array<i64: 1, 8>}, {pipeline_mode = #tpu.pipeline_mode<synchronous>, transform_indices = @transform_3, window_bounds = array<i64: 8, 16>}, {transform_indices = @transform_4, window_bounds = array<i64: 1, 102, 8>}]} {
    %c0 = arith.constant 0 : index
    %c0_0 = arith.constant 0 : index
    %c0_1 = arith.constant 0 : index
    %0 = vector.load %arg1[%c0, %c0_0, %c0_1] : memref<1x326x3xbf16, #tpu.memory_space<vmem>>, vector<1x288x3xbf16>
    %1 = vector.shape_cast %0 : vector<1x288x3xbf16> to vector<288x3xbf16>
    %c0_2 = arith.constant 0 : index
    %c0_3 = arith.constant 0 : index
    %c0_4 = arith.constant 0 : index
    %2 = vector.load %arg2[%c0_2, %c0_3, %c0_4] : memref<9x3x8xbf16, #tpu.memory_space<vmem>>, vector<1x3x8xbf16>
    %3 = vector.shape_cast %2 : vector<1x3x8xbf16> to vector<3x8xbf16>
    %cst = arith.constant dense<0.000000e+00> : vector<288x8xf32>
    %4 = tpu.matmul %1, %3, %cst {dimension_numbers = #tpu.dot_dimension_numbers<[1], [0], [0], [1], [0, 0, 1, 1], [], []>} : vector<288x3xbf16>, vector<3x8xbf16>, vector<288x8xf32> -> vector<288x8xf32>
    %c0_5 = arith.constant 0 : index
    %c1 = arith.constant 1 : index
    %c0_6 = arith.constant 0 : index
    %5 = vector.load %arg1[%c0_5, %c1, %c0_6] : memref<1x326x3xbf16, #tpu.memory_space<vmem>>, vector<1x288x3xbf16>
    %6 = vector.shape_cast %5 : vector<1x288x3xbf16> to vector<288x3xbf16>
    %c1_7 = arith.constant 1 : index
    %c0_8 = arith.constant 0 : index
    %c0_9 = arith.constant 0 : index
    %7 = vector.load %arg2[%c1_7, %c0_8, %c0_9] : memref<9x3x8xbf16, #tpu.memory_space<vmem>>, vector<1x3x8xbf16>
    %8 = vector.shape_cast %7 : vector<1x3x8xbf16> to vector<3x8xbf16>
    %cst_10 = arith.constant dense<0.000000e+00> : vector<288x8xf32>
    %9 = tpu.matmul %6, %8, %cst_10 {dimension_numbers = #tpu.dot_dimension_numbers<[1], [0], [0], [1], [0, 0, 1, 1], [], []>} : vector<288x3xbf16>, vector<3x8xbf16>, vector<288x8xf32> -> vector<288x8xf32>
    %10 = arith.addf %4, %9 : vector<288x8xf32>
    %c0_11 = arith.constant 0 : index
    %c2 = arith.constant 2 : index
    %c0_12 = arith.constant 0 : index
    %11 = vector.load %arg1[%c0_11, %c2, %c0_12] : memref<1x326x3xbf16, #tpu.memory_space<vmem>>, vector<1x288x3xbf16>
    %12 = vector.shape_cast %11 : vector<1x288x3xbf16> to vector<288x3xbf16>
    %c2_13 = arith.constant 2 : index
    %c0_14 = arith.constant 0 : index
    %c0_15 = arith.constant 0 : index
    %13 = vector.load %arg2[%c2_13, %c0_14, %c0_15] : memref<9x3x8xbf16, #tpu.memory_space<vmem>>, vector<1x3x8xbf16>
    %14 = vector.shape_cast %13 : vector<1x3x8xbf16> to vector<3x8xbf16>
    %cst_16 = arith.constant dense<0.000000e+00> : vector<288x8xf32>
    %15 = tpu.matmul %12, %14, %cst_16 {dimension_numbers = #tpu.dot_dimension_numbers<[1], [0], [0], [1], [0, 0, 1, 1], [], []>} : vector<288x3xbf16>, vector<3x8xbf16>, vector<288x8xf32> -> vector<288x8xf32>
    %16 = arith.addf %10, %15 : vector<288x8xf32>
    %c0_17 = arith.constant 0 : index
    %c18 = arith.constant 18 : index
    %c0_18 = arith.constant 0 : index
    %17 = vector.load %arg1[%c0_17, %c18, %c0_18] : memref<1x326x3xbf16, #tpu.memory_space<vmem>>, vector<1x288x3xbf16>
    %18 = vector.shape_cast %17 : vector<1x288x3xbf16> to vector<288x3xbf16>
    %c3 = arith.constant 3 : index
    %c0_19 = arith.constant 0 : index
    %c0_20 = arith.constant 0 : index
    %19 = vector.load %arg2[%c3, %c0_19, %c0_20] : memref<9x3x8xbf16, #tpu.memory_space<vmem>>, vector<1x3x8xbf16>
    %20 = vector.shape_cast %19 : vector<1x3x8xbf16> to vector<3x8xbf16>
    %cst_21 = arith.constant dense<0.000000e+00> : vector<288x8xf32>
    %21 = tpu.matmul %18, %20, %cst_21 {dimension_numbers = #tpu.dot_dimension_numbers<[1], [0], [0], [1], [0, 0, 1, 1], [], []>} : vector<288x3xbf16>, vector<3x8xbf16>, vector<288x8xf32> -> vector<288x8xf32>
    %22 = arith.addf %16, %21 : vector<288x8xf32>
    %c0_22 = arith.constant 0 : index
    %c19 = arith.constant 19 : index
    %c0_23 = arith.constant 0 : index
    %23 = vector.load %arg1[%c0_22, %c19, %c0_23] : memref<1x326x3xbf16, #tpu.memory_space<vmem>>, vector<1x288x3xbf16>
    %24 = vector.shape_cast %23 : vector<1x288x3xbf16> to vector<288x3xbf16>
    %c4 = arith.constant 4 : index
    %c0_24 = arith.constant 0 : index
    %c0_25 = arith.constant 0 : index
    %25 = vector.load %arg2[%c4, %c0_24, %c0_25] : memref<9x3x8xbf16, #tpu.memory_space<vmem>>, vector<1x3x8xbf16>
    %26 = vector.shape_cast %25 : vector<1x3x8xbf16> to vector<3x8xbf16>
    %cst_26 = arith.constant dense<0.000000e+00> : vector<288x8xf32>
    %27 = tpu.matmul %24, %26, %cst_26 {dimension_numbers = #tpu.dot_dimension_numbers<[1], [0], [0], [1], [0, 0, 1, 1], [], []>} : vector<288x3xbf16>, vector<3x8xbf16>, vector<288x8xf32> -> vector<288x8xf32>
    %28 = arith.addf %22, %27 : vector<288x8xf32>
    %c0_27 = arith.constant 0 : index
    %c20 = arith.constant 20 : index
    %c0_28 = arith.constant 0 : index
    %29 = vector.load %arg1[%c0_27, %c20, %c0_28] : memref<1x326x3xbf16, #tpu.memory_space<vmem>>, vector<1x288x3xbf16>
    %30 = vector.shape_cast %29 : vector<1x288x3xbf16> to vector<288x3xbf16>
    %c5 = arith.constant 5 : index
    %c0_29 = arith.constant 0 : index
    %c0_30 = arith.constant 0 : index
    %31 = vector.load %arg2[%c5, %c0_29, %c0_30] : memref<9x3x8xbf16, #tpu.memory_space<vmem>>, vector<1x3x8xbf16>
    %32 = vector.shape_cast %31 : vector<1x3x8xbf16> to vector<3x8xbf16>
    %cst_31 = arith.constant dense<0.000000e+00> : vector<288x8xf32>
    %33 = tpu.matmul %30, %32, %cst_31 {dimension_numbers = #tpu.dot_dimension_numbers<[1], [0], [0], [1], [0, 0, 1, 1], [], []>} : vector<288x3xbf16>, vector<3x8xbf16>, vector<288x8xf32> -> vector<288x8xf32>
    %34 = arith.addf %28, %33 : vector<288x8xf32>
    %c0_32 = arith.constant 0 : index
    %c36 = arith.constant 36 : index
    %c0_33 = arith.constant 0 : index
    %35 = vector.load %arg1[%c0_32, %c36, %c0_33] : memref<1x326x3xbf16, #tpu.memory_space<vmem>>, vector<1x288x3xbf16>
    %36 = vector.shape_cast %35 : vector<1x288x3xbf16> to vector<288x3xbf16>
    %c6 = arith.constant 6 : index
    %c0_34 = arith.constant 0 : index
    %c0_35 = arith.constant 0 : index
    %37 = vector.load %arg2[%c6, %c0_34, %c0_35] : memref<9x3x8xbf16, #tpu.memory_space<vmem>>, vector<1x3x8xbf16>
    %38 = vector.shape_cast %37 : vector<1x3x8xbf16> to vector<3x8xbf16>
    %cst_36 = arith.constant dense<0.000000e+00> : vector<288x8xf32>
    %39 = tpu.matmul %36, %38, %cst_36 {dimension_numbers = #tpu.dot_dimension_numbers<[1], [0], [0], [1], [0, 0, 1, 1], [], []>} : vector<288x3xbf16>, vector<3x8xbf16>, vector<288x8xf32> -> vector<288x8xf32>
    %40 = arith.addf %34, %39 : vector<288x8xf32>
    %c0_37 = arith.constant 0 : index
    %c37 = arith.constant 37 : index
    %c0_38 = arith.constant 0 : index
    %41 = vector.load %arg1[%c0_37, %c37, %c0_38] : memref<1x326x3xbf16, #tpu.memory_space<vmem>>, vector<1x288x3xbf16>
    %42 = vector.shape_cast %41 : vector<1x288x3xbf16> to vector<288x3xbf16>
    %c7 = arith.constant 7 : index
    %c0_39 = arith.constant 0 : index
    %c0_40 = arith.constant 0 : index
    %43 = vector.load %arg2[%c7, %c0_39, %c0_40] : memref<9x3x8xbf16, #tpu.memory_space<vmem>>, vector<1x3x8xbf16>
    %44 = vector.shape_cast %43 : vector<1x3x8xbf16> to vector<3x8xbf16>
    %cst_41 = arith.constant dense<0.000000e+00> : vector<288x8xf32>
    %45 = tpu.matmul %42, %44, %cst_41 {dimension_numbers = #tpu.dot_dimension_numbers<[1], [0], [0], [1], [0, 0, 1, 1], [], []>} : vector<288x3xbf16>, vector<3x8xbf16>, vector<288x8xf32> -> vector<288x8xf32>
    %46 = arith.addf %40, %45 : vector<288x8xf32>
    %c0_42 = arith.constant 0 : index
    %c38 = arith.constant 38 : index
    %c0_43 = arith.constant 0 : index
    %47 = vector.load %arg1[%c0_42, %c38, %c0_43] : memref<1x326x3xbf16, #tpu.memory_space<vmem>>, vector<1x288x3xbf16>
    %48 = vector.shape_cast %47 : vector<1x288x3xbf16> to vector<288x3xbf16>
    %c8 = arith.constant 8 : index
    %c0_44 = arith.constant 0 : index
    %c0_45 = arith.constant 0 : index
    %49 = vector.load %arg2[%c8, %c0_44, %c0_45] : memref<9x3x8xbf16, #tpu.memory_space<vmem>>, vector<1x3x8xbf16>
    %50 = vector.shape_cast %49 : vector<1x3x8xbf16> to vector<3x8xbf16>
    %cst_46 = arith.constant dense<0.000000e+00> : vector<288x8xf32>
    %51 = tpu.matmul %48, %50, %cst_46 {dimension_numbers = #tpu.dot_dimension_numbers<[1], [0], [0], [1], [0, 0, 1, 1], [], []>} : vector<288x3xbf16>, vector<3x8xbf16>, vector<288x8xf32> -> vector<288x8xf32>
    %52 = arith.addf %46, %51 : vector<288x8xf32>
    %c0_47 = arith.constant 0 : index
    %c0_48 = arith.constant 0 : index
    %53 = vector.load %arg3[%c0_47, %c0_48] : memref<1x8xf32, #tpu.memory_space<vmem>>, vector<1x8xf32>
    %54 = vector.broadcast %53 : vector<1x8xf32> to vector<288x8xf32>
    %55 = arith.addf %52, %54 : vector<288x8xf32>
    %cst_49 = arith.constant 0.000000e+00 : f32
    %56 = vector.broadcast %cst_49 : f32 to vector<288x8xf32>
    %57 = arith.maximumf %55, %56 : vector<288x8xf32>
    %c0_50 = arith.constant 0 : index
    %c0_51 = arith.constant 0 : index
    %58 = vector.load %arg4[%c0_50, %c0_51] : memref<8x16xf32, #tpu.memory_space<vmem>>, vector<8x16xf32>
    %cst_52 = arith.constant 0.000000e+00 : bf16
    %59 = vector.broadcast %cst_52 : bf16 to vector<102x8xbf16>
    %c0_53 = arith.constant 0 : index
    %c0_54 = arith.constant 0 : index
    %c0_55 = arith.constant 0 : index
    %60 = vector.load %arg5[%c0_53, %c0_54, %c0_55] : memref<1x102x8xbf16, #tpu.memory_space<vmem>>, vector<1x102x8xbf16>
    %61 = vector.shape_cast %60 : vector<1x102x8xbf16> to vector<102x8xbf16>
    %62 = vector.shape_cast %59 : vector<102x8xbf16> to vector<1x102x8xbf16>
    tpu.vector_store %arg5[%c0_53, %c0_54, %c0_55], %62 {strides = array<i32>} : memref<1x102x8xbf16, #tpu.memory_space<vmem>>, vector<1x102x8xbf16>,
    %63 = vector.extract_strided_slice %57 {offsets = [1, 0], sizes = [16, 8], strides = [1, 1]} : vector<288x8xf32> to vector<16x8xf32>
    %64 = vector.extract_strided_slice %57 {offsets = [19, 0], sizes = [16, 8], strides = [1, 1]} : vector<288x8xf32> to vector<16x8xf32>
    %65 = arith.addf %63, %64 : vector<16x8xf32>
    %cst_56 = arith.constant dense<0.000000e+00> : vector<8x8xf32>
    %66 = tpu.matmul %58, %65, %cst_56 {dimension_numbers = #tpu.dot_dimension_numbers<[1], [0], [0], [1], [0, 0, 1, 1], [], []>} : vector<8x16xf32>, vector<16x8xf32>, vector<8x8xf32> -> vector<8x8xf32>
    %67 = arith.truncf %66 : vector<8x8xf32> to vector<8x8xbf16>
    %c0_57 = arith.constant 0 : index
    %c12 = arith.constant 12 : index
    %c0_58 = arith.constant 0 : index
    %68 = vector.load %arg5[%c0_57, %c12, %c0_58] : memref<1x102x8xbf16, #tpu.memory_space<vmem>>, vector<1x8x8xbf16>
    %69 = vector.shape_cast %68 : vector<1x8x8xbf16> to vector<8x8xbf16>
    %70 = vector.shape_cast %67 : vector<8x8xbf16> to vector<1x8x8xbf16>
    tpu.vector_store %arg5[%c0_57, %c12, %c0_58], %70 {strides = array<i32>} : memref<1x102x8xbf16, #tpu.memory_space<vmem>>, vector<1x8x8xbf16>,
    %71 = vector.extract_strided_slice %57 {offsets = [37, 0], sizes = [16, 8], strides = [1, 1]} : vector<288x8xf32> to vector<16x8xf32>
    %72 = vector.extract_strided_slice %57 {offsets = [55, 0], sizes = [16, 8], strides = [1, 1]} : vector<288x8xf32> to vector<16x8xf32>
    %73 = arith.addf %71, %72 : vector<16x8xf32>
    %cst_59 = arith.constant dense<0.000000e+00> : vector<8x8xf32>
    %74 = tpu.matmul %58, %73, %cst_59 {dimension_numbers = #tpu.dot_dimension_numbers<[1], [0], [0], [1], [0, 0, 1, 1], [], []>} : vector<8x16xf32>, vector<16x8xf32>, vector<8x8xf32> -> vector<8x8xf32>
    %75 = arith.truncf %74 : vector<8x8xf32> to vector<8x8xbf16>
    %c0_60 = arith.constant 0 : index
    %c22 = arith.constant 22 : index
    %c0_61 = arith.constant 0 : index
    %76 = vector.load %arg5[%c0_60, %c22, %c0_61] : memref<1x102x8xbf16, #tpu.memory_space<vmem>>, vector<1x8x8xbf16>
    %77 = vector.shape_cast %76 : vector<1x8x8xbf16> to vector<8x8xbf16>
    %78 = vector.shape_cast %75 : vector<8x8xbf16> to vector<1x8x8xbf16>
    tpu.vector_store %arg5[%c0_60, %c22, %c0_61], %78 {strides = array<i32>} : memref<1x102x8xbf16, #tpu.memory_space<vmem>>, vector<1x8x8xbf16>,
    %79 = vector.extract_strided_slice %57 {offsets = [73, 0], sizes = [16, 8], strides = [1, 1]} : vector<288x8xf32> to vector<16x8xf32>
    %80 = vector.extract_strided_slice %57 {offsets = [91, 0], sizes = [16, 8], strides = [1, 1]} : vector<288x8xf32> to vector<16x8xf32>
    %81 = arith.addf %79, %80 : vector<16x8xf32>
    %cst_62 = arith.constant dense<0.000000e+00> : vector<8x8xf32>
    %82 = tpu.matmul %58, %81, %cst_62 {dimension_numbers = #tpu.dot_dimension_numbers<[1], [0], [0], [1], [0, 0, 1, 1], [], []>} : vector<8x16xf32>, vector<16x8xf32>, vector<8x8xf32> -> vector<8x8xf32>
    %83 = arith.truncf %82 : vector<8x8xf32> to vector<8x8xbf16>
    %c0_63 = arith.constant 0 : index
    %c32 = arith.constant 32 : index
    %c0_64 = arith.constant 0 : index
    %84 = vector.load %arg5[%c0_63, %c32, %c0_64] : memref<1x102x8xbf16, #tpu.memory_space<vmem>>, vector<1x8x8xbf16>
    %85 = vector.shape_cast %84 : vector<1x8x8xbf16> to vector<8x8xbf16>
    %86 = vector.shape_cast %83 : vector<8x8xbf16> to vector<1x8x8xbf16>
    tpu.vector_store %arg5[%c0_63, %c32, %c0_64], %86 {strides = array<i32>} : memref<1x102x8xbf16, #tpu.memory_space<vmem>>, vector<1x8x8xbf16>,
    %87 = vector.extract_strided_slice %57 {offsets = [109, 0], sizes = [16, 8], strides = [1, 1]} : vector<288x8xf32> to vector<16x8xf32>
    %88 = vector.extract_strided_slice %57 {offsets = [127, 0], sizes = [16, 8], strides = [1, 1]} : vector<288x8xf32> to vector<16x8xf32>
    %89 = arith.addf %87, %88 : vector<16x8xf32>
    %cst_65 = arith.constant dense<0.000000e+00> : vector<8x8xf32>
    %90 = tpu.matmul %58, %89, %cst_65 {dimension_numbers = #tpu.dot_dimension_numbers<[1], [0], [0], [1], [0, 0, 1, 1], [], []>} : vector<8x16xf32>, vector<16x8xf32>, vector<8x8xf32> -> vector<8x8xf32>
    %91 = arith.truncf %90 : vector<8x8xf32> to vector<8x8xbf16>
    %c0_66 = arith.constant 0 : index
    %c42 = arith.constant 42 : index
    %c0_67 = arith.constant 0 : index
    %92 = vector.load %arg5[%c0_66, %c42, %c0_67] : memref<1x102x8xbf16, #tpu.memory_space<vmem>>, vector<1x8x8xbf16>
    %93 = vector.shape_cast %92 : vector<1x8x8xbf16> to vector<8x8xbf16>
    %94 = vector.shape_cast %91 : vector<8x8xbf16> to vector<1x8x8xbf16>
    tpu.vector_store %arg5[%c0_66, %c42, %c0_67], %94 {strides = array<i32>} : memref<1x102x8xbf16, #tpu.memory_space<vmem>>, vector<1x8x8xbf16>,
    %95 = vector.extract_strided_slice %57 {offsets = [145, 0], sizes = [16, 8], strides = [1, 1]} : vector<288x8xf32> to vector<16x8xf32>
    %96 = vector.extract_strided_slice %57 {offsets = [163, 0], sizes = [16, 8], strides = [1, 1]} : vector<288x8xf32> to vector<16x8xf32>
    %97 = arith.addf %95, %96 : vector<16x8xf32>
    %cst_68 = arith.constant dense<0.000000e+00> : vector<8x8xf32>
    %98 = tpu.matmul %58, %97, %cst_68 {dimension_numbers = #tpu.dot_dimension_numbers<[1], [0], [0], [1], [0, 0, 1, 1], [], []>} : vector<8x16xf32>, vector<16x8xf32>, vector<8x8xf32> -> vector<8x8xf32>
    %99 = arith.truncf %98 : vector<8x8xf32> to vector<8x8xbf16>
    %c0_69 = arith.constant 0 : index
    %c52 = arith.constant 52 : index
    %c0_70 = arith.constant 0 : index
    %100 = vector.load %arg5[%c0_69, %c52, %c0_70] : memref<1x102x8xbf16, #tpu.memory_space<vmem>>, vector<1x8x8xbf16>
    %101 = vector.shape_cast %100 : vector<1x8x8xbf16> to vector<8x8xbf16>
    %102 = vector.shape_cast %99 : vector<8x8xbf16> to vector<1x8x8xbf16>
    tpu.vector_store %arg5[%c0_69, %c52, %c0_70], %102 {strides = array<i32>} : memref<1x102x8xbf16, #tpu.memory_space<vmem>>, vector<1x8x8xbf16>,
    %103 = vector.extract_strided_slice %57 {offsets = [181, 0], sizes = [16, 8], strides = [1, 1]} : vector<288x8xf32> to vector<16x8xf32>
    %104 = vector.extract_strided_slice %57 {offsets = [199, 0], sizes = [16, 8], strides = [1, 1]} : vector<288x8xf32> to vector<16x8xf32>
    %105 = arith.addf %103, %104 : vector<16x8xf32>
    %cst_71 = arith.constant dense<0.000000e+00> : vector<8x8xf32>
    %106 = tpu.matmul %58, %105, %cst_71 {dimension_numbers = #tpu.dot_dimension_numbers<[1], [0], [0], [1], [0, 0, 1, 1], [], []>} : vector<8x16xf32>, vector<16x8xf32>, vector<8x8xf32> -> vector<8x8xf32>
    %107 = arith.truncf %106 : vector<8x8xf32> to vector<8x8xbf16>
    %c0_72 = arith.constant 0 : index
    %c62 = arith.constant 62 : index
    %c0_73 = arith.constant 0 : index
    %108 = vector.load %arg5[%c0_72, %c62, %c0_73] : memref<1x102x8xbf16, #tpu.memory_space<vmem>>, vector<1x8x8xbf16>
    %109 = vector.shape_cast %108 : vector<1x8x8xbf16> to vector<8x8xbf16>
    %110 = vector.shape_cast %107 : vector<8x8xbf16> to vector<1x8x8xbf16>
    tpu.vector_store %arg5[%c0_72, %c62, %c0_73], %110 {strides = array<i32>} : memref<1x102x8xbf16, #tpu.memory_space<vmem>>, vector<1x8x8xbf16>,
    %111 = vector.extract_strided_slice %57 {offsets = [217, 0], sizes = [16, 8], strides = [1, 1]} : vector<288x8xf32> to vector<16x8xf32>
    %112 = vector.extract_strided_slice %57 {offsets = [235, 0], sizes = [16, 8], strides = [1, 1]} : vector<288x8xf32> to vector<16x8xf32>
    %113 = arith.addf %111, %112 : vector<16x8xf32>
    %cst_74 = arith.constant dense<0.000000e+00> : vector<8x8xf32>
    %114 = tpu.matmul %58, %113, %cst_74 {dimension_numbers = #tpu.dot_dimension_numbers<[1], [0], [0], [1], [0, 0, 1, 1], [], []>} : vector<8x16xf32>, vector<16x8xf32>, vector<8x8xf32> -> vector<8x8xf32>
    %115 = arith.truncf %114 : vector<8x8xf32> to vector<8x8xbf16>
    %c0_75 = arith.constant 0 : index
    %c72 = arith.constant 72 : index
    %c0_76 = arith.constant 0 : index
    %116 = vector.load %arg5[%c0_75, %c72, %c0_76] : memref<1x102x8xbf16, #tpu.memory_space<vmem>>, vector<1x8x8xbf16>
    %117 = vector.shape_cast %116 : vector<1x8x8xbf16> to vector<8x8xbf16>
    %118 = vector.shape_cast %115 : vector<8x8xbf16> to vector<1x8x8xbf16>
    tpu.vector_store %arg5[%c0_75, %c72, %c0_76], %118 {strides = array<i32>} : memref<1x102x8xbf16, #tpu.memory_space<vmem>>, vector<1x8x8xbf16>,
    %119 = vector.extract_strided_slice %57 {offsets = [253, 0], sizes = [16, 8], strides = [1, 1]} : vector<288x8xf32> to vector<16x8xf32>
    %120 = vector.extract_strided_slice %57 {offsets = [271, 0], sizes = [16, 8], strides = [1, 1]} : vector<288x8xf32> to vector<16x8xf32>
    %121 = arith.addf %119, %120 : vector<16x8xf32>
    %cst_77 = arith.constant dense<0.000000e+00> : vector<8x8xf32>
    %122 = tpu.matmul %58, %121, %cst_77 {dimension_numbers = #tpu.dot_dimension_numbers<[1], [0], [0], [1], [0, 0, 1, 1], [], []>} : vector<8x16xf32>, vector<16x8xf32>, vector<8x8xf32> -> vector<8x8xf32>
    %123 = arith.truncf %122 : vector<8x8xf32> to vector<8x8xbf16>
    %c0_78 = arith.constant 0 : index
    %c82 = arith.constant 82 : index
    %c0_79 = arith.constant 0 : index
    %124 = vector.load %arg5[%c0_78, %c82, %c0_79] : memref<1x102x8xbf16, #tpu.memory_space<vmem>>, vector<1x8x8xbf16>
    %125 = vector.shape_cast %124 : vector<1x8x8xbf16> to vector<8x8xbf16>
    %126 = vector.shape_cast %123 : vector<8x8xbf16> to vector<1x8x8xbf16>
    tpu.vector_store %arg5[%c0_78, %c82, %c0_79], %126 {strides = array<i32>} : memref<1x102x8xbf16, #tpu.memory_space<vmem>>, vector<1x8x8xbf16>,
    return
  }
  func.func @transform_0(%arg0: i32) -> (i32, i32, i32) {
    %c0_i32 = arith.constant 0 : i32
    %c0_i32_0 = arith.constant 0 : i32
    %c0_i32_1 = arith.constant 0 : i32
    return %arg0, %c0_i32, %c0_i32_0 : i32, i32, i32
  }
  func.func @transform_1(%arg0: i32) -> (i32, i32, i32) {
    %c0_i32 = arith.constant 0 : i32
    %c0_i32_0 = arith.constant 0 : i32
    %c0_i32_1 = arith.constant 0 : i32
    %c0_i32_2 = arith.constant 0 : i32
    return %c0_i32, %c0_i32_0, %c0_i32_1 : i32, i32, i32
  }
  func.func @transform_2(%arg0: i32) -> (i32, i32) {
    %c0_i32 = arith.constant 0 : i32
    %c0_i32_0 = arith.constant 0 : i32
    %c0_i32_1 = arith.constant 0 : i32
    return %c0_i32, %c0_i32_0 : i32, i32
  }
  func.func @transform_3(%arg0: i32) -> (i32, i32) {
    %c0_i32 = arith.constant 0 : i32
    %c0_i32_0 = arith.constant 0 : i32
    %c0_i32_1 = arith.constant 0 : i32
    return %c0_i32, %c0_i32_0 : i32, i32
  }
  func.func @transform_4(%arg0: i32) -> (i32, i32, i32) {
    %c0_i32 = arith.constant 0 : i32
    %c0_i32_0 = arith.constant 0 : i32
    %c0_i32_1 = arith.constant 0 : i32
    return %arg0, %c0_i32, %c0_i32_0 : i32, i32, i32
  }
}

module attributes {stable_mosaic.version = 11 : i64} {
  func.func @conv3x3_kernel(%arg0: i32, %arg1: memref<1x38x32xbf16, #tpu.memory_space<vmem>>, %arg2: memref<9x32x32xbf16, #tpu.memory_space<vmem>>, %arg3: memref<1x32xf32, #tpu.memory_space<vmem>>, %arg4: memref<2x4xf32, #tpu.memory_space<vmem>>, %arg5: memref<1x18x32xbf16, #tpu.memory_space<vmem>>) attributes {dimension_semantics = [#tpu.dimension_semantics<parallel>], iteration_bounds = array<i64: 2>, scalar_prefetch = 0 : i64, scratch_operands = 0 : i64, tpu.core_type = #tpu.core_type<tc>, window_params = [{transform_indices = @transform_0, window_bounds = array<i64: 1, 38, 32>}, {pipeline_mode = #tpu.pipeline_mode<synchronous>, transform_indices = @transform_1, window_bounds = array<i64: 9, 32, 32>}, {pipeline_mode = #tpu.pipeline_mode<synchronous>, transform_indices = @transform_2, window_bounds = array<i64: 1, 32>}, {pipeline_mode = #tpu.pipeline_mode<synchronous>, transform_indices = @transform_3, window_bounds = array<i64: 2, 4>}, {transform_indices = @transform_4, window_bounds = array<i64: 1, 18, 32>}]} {
    %c0 = arith.constant 0 : index
    %c0_0 = arith.constant 0 : index
    %c0_1 = arith.constant 0 : index
    %0 = vector.load %arg1[%c0, %c0_0, %c0_1] : memref<1x38x32xbf16, #tpu.memory_space<vmem>>, vector<1x24x32xbf16>
    %1 = vector.shape_cast %0 : vector<1x24x32xbf16> to vector<24x32xbf16>
    %c0_2 = arith.constant 0 : index
    %c0_3 = arith.constant 0 : index
    %c0_4 = arith.constant 0 : index
    %2 = vector.load %arg2[%c0_2, %c0_3, %c0_4] : memref<9x32x32xbf16, #tpu.memory_space<vmem>>, vector<1x32x32xbf16>
    %3 = vector.shape_cast %2 : vector<1x32x32xbf16> to vector<32x32xbf16>
    %cst = arith.constant dense<0.000000e+00> : vector<24x32xf32>
    %4 = tpu.matmul %1, %3, %cst {dimension_numbers = #tpu.dot_dimension_numbers<[1], [0], [0], [1], [0, 0, 1, 1], [], []>} : vector<24x32xbf16>, vector<32x32xbf16>, vector<24x32xf32> -> vector<24x32xf32>
    %c0_5 = arith.constant 0 : index
    %c1 = arith.constant 1 : index
    %c0_6 = arith.constant 0 : index
    %5 = vector.load %arg1[%c0_5, %c1, %c0_6] : memref<1x38x32xbf16, #tpu.memory_space<vmem>>, vector<1x24x32xbf16>
    %6 = vector.shape_cast %5 : vector<1x24x32xbf16> to vector<24x32xbf16>
    %c1_7 = arith.constant 1 : index
    %c0_8 = arith.constant 0 : index
    %c0_9 = arith.constant 0 : index
    %7 = vector.load %arg2[%c1_7, %c0_8, %c0_9] : memref<9x32x32xbf16, #tpu.memory_space<vmem>>, vector<1x32x32xbf16>
    %8 = vector.shape_cast %7 : vector<1x32x32xbf16> to vector<32x32xbf16>
    %cst_10 = arith.constant dense<0.000000e+00> : vector<24x32xf32>
    %9 = tpu.matmul %6, %8, %cst_10 {dimension_numbers = #tpu.dot_dimension_numbers<[1], [0], [0], [1], [0, 0, 1, 1], [], []>} : vector<24x32xbf16>, vector<32x32xbf16>, vector<24x32xf32> -> vector<24x32xf32>
    %10 = arith.addf %4, %9 : vector<24x32xf32>
    %c0_11 = arith.constant 0 : index
    %c2 = arith.constant 2 : index
    %c0_12 = arith.constant 0 : index
    %11 = vector.load %arg1[%c0_11, %c2, %c0_12] : memref<1x38x32xbf16, #tpu.memory_space<vmem>>, vector<1x24x32xbf16>
    %12 = vector.shape_cast %11 : vector<1x24x32xbf16> to vector<24x32xbf16>
    %c2_13 = arith.constant 2 : index
    %c0_14 = arith.constant 0 : index
    %c0_15 = arith.constant 0 : index
    %13 = vector.load %arg2[%c2_13, %c0_14, %c0_15] : memref<9x32x32xbf16, #tpu.memory_space<vmem>>, vector<1x32x32xbf16>
    %14 = vector.shape_cast %13 : vector<1x32x32xbf16> to vector<32x32xbf16>
    %cst_16 = arith.constant dense<0.000000e+00> : vector<24x32xf32>
    %15 = tpu.matmul %12, %14, %cst_16 {dimension_numbers = #tpu.dot_dimension_numbers<[1], [0], [0], [1], [0, 0, 1, 1], [], []>} : vector<24x32xbf16>, vector<32x32xbf16>, vector<24x32xf32> -> vector<24x32xf32>
    %16 = arith.addf %10, %15 : vector<24x32xf32>
    %c0_17 = arith.constant 0 : index
    %c6 = arith.constant 6 : index
    %c0_18 = arith.constant 0 : index
    %17 = vector.load %arg1[%c0_17, %c6, %c0_18] : memref<1x38x32xbf16, #tpu.memory_space<vmem>>, vector<1x24x32xbf16>
    %18 = vector.shape_cast %17 : vector<1x24x32xbf16> to vector<24x32xbf16>
    %c3 = arith.constant 3 : index
    %c0_19 = arith.constant 0 : index
    %c0_20 = arith.constant 0 : index
    %19 = vector.load %arg2[%c3, %c0_19, %c0_20] : memref<9x32x32xbf16, #tpu.memory_space<vmem>>, vector<1x32x32xbf16>
    %20 = vector.shape_cast %19 : vector<1x32x32xbf16> to vector<32x32xbf16>
    %cst_21 = arith.constant dense<0.000000e+00> : vector<24x32xf32>
    %21 = tpu.matmul %18, %20, %cst_21 {dimension_numbers = #tpu.dot_dimension_numbers<[1], [0], [0], [1], [0, 0, 1, 1], [], []>} : vector<24x32xbf16>, vector<32x32xbf16>, vector<24x32xf32> -> vector<24x32xf32>
    %22 = arith.addf %16, %21 : vector<24x32xf32>
    %c0_22 = arith.constant 0 : index
    %c7 = arith.constant 7 : index
    %c0_23 = arith.constant 0 : index
    %23 = vector.load %arg1[%c0_22, %c7, %c0_23] : memref<1x38x32xbf16, #tpu.memory_space<vmem>>, vector<1x24x32xbf16>
    %24 = vector.shape_cast %23 : vector<1x24x32xbf16> to vector<24x32xbf16>
    %c4 = arith.constant 4 : index
    %c0_24 = arith.constant 0 : index
    %c0_25 = arith.constant 0 : index
    %25 = vector.load %arg2[%c4, %c0_24, %c0_25] : memref<9x32x32xbf16, #tpu.memory_space<vmem>>, vector<1x32x32xbf16>
    %26 = vector.shape_cast %25 : vector<1x32x32xbf16> to vector<32x32xbf16>
    %cst_26 = arith.constant dense<0.000000e+00> : vector<24x32xf32>
    %27 = tpu.matmul %24, %26, %cst_26 {dimension_numbers = #tpu.dot_dimension_numbers<[1], [0], [0], [1], [0, 0, 1, 1], [], []>} : vector<24x32xbf16>, vector<32x32xbf16>, vector<24x32xf32> -> vector<24x32xf32>
    %28 = arith.addf %22, %27 : vector<24x32xf32>
    %c0_27 = arith.constant 0 : index
    %c8 = arith.constant 8 : index
    %c0_28 = arith.constant 0 : index
    %29 = vector.load %arg1[%c0_27, %c8, %c0_28] : memref<1x38x32xbf16, #tpu.memory_space<vmem>>, vector<1x24x32xbf16>
    %30 = vector.shape_cast %29 : vector<1x24x32xbf16> to vector<24x32xbf16>
    %c5 = arith.constant 5 : index
    %c0_29 = arith.constant 0 : index
    %c0_30 = arith.constant 0 : index
    %31 = vector.load %arg2[%c5, %c0_29, %c0_30] : memref<9x32x32xbf16, #tpu.memory_space<vmem>>, vector<1x32x32xbf16>
    %32 = vector.shape_cast %31 : vector<1x32x32xbf16> to vector<32x32xbf16>
    %cst_31 = arith.constant dense<0.000000e+00> : vector<24x32xf32>
    %33 = tpu.matmul %30, %32, %cst_31 {dimension_numbers = #tpu.dot_dimension_numbers<[1], [0], [0], [1], [0, 0, 1, 1], [], []>} : vector<24x32xbf16>, vector<32x32xbf16>, vector<24x32xf32> -> vector<24x32xf32>
    %34 = arith.addf %28, %33 : vector<24x32xf32>
    %c0_32 = arith.constant 0 : index
    %c12 = arith.constant 12 : index
    %c0_33 = arith.constant 0 : index
    %35 = vector.load %arg1[%c0_32, %c12, %c0_33] : memref<1x38x32xbf16, #tpu.memory_space<vmem>>, vector<1x24x32xbf16>
    %36 = vector.shape_cast %35 : vector<1x24x32xbf16> to vector<24x32xbf16>
    %c6_34 = arith.constant 6 : index
    %c0_35 = arith.constant 0 : index
    %c0_36 = arith.constant 0 : index
    %37 = vector.load %arg2[%c6_34, %c0_35, %c0_36] : memref<9x32x32xbf16, #tpu.memory_space<vmem>>, vector<1x32x32xbf16>
    %38 = vector.shape_cast %37 : vector<1x32x32xbf16> to vector<32x32xbf16>
    %cst_37 = arith.constant dense<0.000000e+00> : vector<24x32xf32>
    %39 = tpu.matmul %36, %38, %cst_37 {dimension_numbers = #tpu.dot_dimension_numbers<[1], [0], [0], [1], [0, 0, 1, 1], [], []>} : vector<24x32xbf16>, vector<32x32xbf16>, vector<24x32xf32> -> vector<24x32xf32>
    %40 = arith.addf %34, %39 : vector<24x32xf32>
    %c0_38 = arith.constant 0 : index
    %c13 = arith.constant 13 : index
    %c0_39 = arith.constant 0 : index
    %41 = vector.load %arg1[%c0_38, %c13, %c0_39] : memref<1x38x32xbf16, #tpu.memory_space<vmem>>, vector<1x24x32xbf16>
    %42 = vector.shape_cast %41 : vector<1x24x32xbf16> to vector<24x32xbf16>
    %c7_40 = arith.constant 7 : index
    %c0_41 = arith.constant 0 : index
    %c0_42 = arith.constant 0 : index
    %43 = vector.load %arg2[%c7_40, %c0_41, %c0_42] : memref<9x32x32xbf16, #tpu.memory_space<vmem>>, vector<1x32x32xbf16>
    %44 = vector.shape_cast %43 : vector<1x32x32xbf16> to vector<32x32xbf16>
    %cst_43 = arith.constant dense<0.000000e+00> : vector<24x32xf32>
    %45 = tpu.matmul %42, %44, %cst_43 {dimension_numbers = #tpu.dot_dimension_numbers<[1], [0], [0], [1], [0, 0, 1, 1], [], []>} : vector<24x32xbf16>, vector<32x32xbf16>, vector<24x32xf32> -> vector<24x32xf32>
    %46 = arith.addf %40, %45 : vector<24x32xf32>
    %c0_44 = arith.constant 0 : index
    %c14 = arith.constant 14 : index
    %c0_45 = arith.constant 0 : index
    %47 = vector.load %arg1[%c0_44, %c14, %c0_45] : memref<1x38x32xbf16, #tpu.memory_space<vmem>>, vector<1x24x32xbf16>
    %48 = vector.shape_cast %47 : vector<1x24x32xbf16> to vector<24x32xbf16>
    %c8_46 = arith.constant 8 : index
    %c0_47 = arith.constant 0 : index
    %c0_48 = arith.constant 0 : index
    %49 = vector.load %arg2[%c8_46, %c0_47, %c0_48] : memref<9x32x32xbf16, #tpu.memory_space<vmem>>, vector<1x32x32xbf16>
    %50 = vector.shape_cast %49 : vector<1x32x32xbf16> to vector<32x32xbf16>
    %cst_49 = arith.constant dense<0.000000e+00> : vector<24x32xf32>
    %51 = tpu.matmul %48, %50, %cst_49 {dimension_numbers = #tpu.dot_dimension_numbers<[1], [0], [0], [1], [0, 0, 1, 1], [], []>} : vector<24x32xbf16>, vector<32x32xbf16>, vector<24x32xf32> -> vector<24x32xf32>
    %52 = arith.addf %46, %51 : vector<24x32xf32>
    %c0_50 = arith.constant 0 : index
    %c0_51 = arith.constant 0 : index
    %53 = vector.load %arg3[%c0_50, %c0_51] : memref<1x32xf32, #tpu.memory_space<vmem>>, vector<1x32xf32>
    %54 = vector.broadcast %53 : vector<1x32xf32> to vector<24x32xf32>
    %55 = arith.addf %52, %54 : vector<24x32xf32>
    %cst_52 = arith.constant 0.000000e+00 : f32
    %56 = vector.broadcast %cst_52 : f32 to vector<24x32xf32>
    %57 = arith.maximumf %55, %56 : vector<24x32xf32>
    %c0_53 = arith.constant 0 : index
    %c0_54 = arith.constant 0 : index
    %58 = vector.load %arg4[%c0_53, %c0_54] : memref<2x4xf32, #tpu.memory_space<vmem>>, vector<2x4xf32>
    %cst_55 = arith.constant 0.000000e+00 : bf16
    %59 = vector.broadcast %cst_55 : bf16 to vector<18x32xbf16>
    %c0_56 = arith.constant 0 : index
    %c0_57 = arith.constant 0 : index
    %c0_58 = arith.constant 0 : index
    %60 = vector.load %arg5[%c0_56, %c0_57, %c0_58] : memref<1x18x32xbf16, #tpu.memory_space<vmem>>, vector<1x18x32xbf16>
    %61 = vector.shape_cast %60 : vector<1x18x32xbf16> to vector<18x32xbf16>
    %62 = vector.shape_cast %59 : vector<18x32xbf16> to vector<1x18x32xbf16>
    tpu.vector_store %arg5[%c0_56, %c0_57, %c0_58], %62 {strides = array<i32>} : memref<1x18x32xbf16, #tpu.memory_space<vmem>>, vector<1x18x32xbf16>,
    %63 = vector.extract_strided_slice %57 {offsets = [1, 0], sizes = [4, 32], strides = [1, 1]} : vector<24x32xf32> to vector<4x32xf32>
    %64 = vector.extract_strided_slice %57 {offsets = [7, 0], sizes = [4, 32], strides = [1, 1]} : vector<24x32xf32> to vector<4x32xf32>
    %65 = arith.addf %63, %64 : vector<4x32xf32>
    %cst_59 = arith.constant dense<0.000000e+00> : vector<2x32xf32>
    %66 = tpu.matmul %58, %65, %cst_59 {dimension_numbers = #tpu.dot_dimension_numbers<[1], [0], [0], [1], [0, 0, 1, 1], [], []>} : vector<2x4xf32>, vector<4x32xf32>, vector<2x32xf32> -> vector<2x32xf32>
    %67 = arith.truncf %66 : vector<2x32xf32> to vector<2x32xbf16>
    %c0_60 = arith.constant 0 : index
    %c6_61 = arith.constant 6 : index
    %c0_62 = arith.constant 0 : index
    %68 = vector.load %arg5[%c0_60, %c6_61, %c0_62] : memref<1x18x32xbf16, #tpu.memory_space<vmem>>, vector<1x2x32xbf16>
    %69 = vector.shape_cast %68 : vector<1x2x32xbf16> to vector<2x32xbf16>
    %70 = vector.shape_cast %67 : vector<2x32xbf16> to vector<1x2x32xbf16>
    tpu.vector_store %arg5[%c0_60, %c6_61, %c0_62], %70 {strides = array<i32>} : memref<1x18x32xbf16, #tpu.memory_space<vmem>>, vector<1x2x32xbf16>,
    %71 = vector.extract_strided_slice %57 {offsets = [13, 0], sizes = [4, 32], strides = [1, 1]} : vector<24x32xf32> to vector<4x32xf32>
    %72 = vector.extract_strided_slice %57 {offsets = [19, 0], sizes = [4, 32], strides = [1, 1]} : vector<24x32xf32> to vector<4x32xf32>
    %73 = arith.addf %71, %72 : vector<4x32xf32>
    %cst_63 = arith.constant dense<0.000000e+00> : vector<2x32xf32>
    %74 = tpu.matmul %58, %73, %cst_63 {dimension_numbers = #tpu.dot_dimension_numbers<[1], [0], [0], [1], [0, 0, 1, 1], [], []>} : vector<2x4xf32>, vector<4x32xf32>, vector<2x32xf32> -> vector<2x32xf32>
    %75 = arith.truncf %74 : vector<2x32xf32> to vector<2x32xbf16>
    %c0_64 = arith.constant 0 : index
    %c10 = arith.constant 10 : index
    %c0_65 = arith.constant 0 : index
    %76 = vector.load %arg5[%c0_64, %c10, %c0_65] : memref<1x18x32xbf16, #tpu.memory_space<vmem>>, vector<1x2x32xbf16>
    %77 = vector.shape_cast %76 : vector<1x2x32xbf16> to vector<2x32xbf16>
    %78 = vector.shape_cast %75 : vector<2x32xbf16> to vector<1x2x32xbf16>
    tpu.vector_store %arg5[%c0_64, %c10, %c0_65], %78 {strides = array<i32>} : memref<1x18x32xbf16, #tpu.memory_space<vmem>>, vector<1x2x32xbf16>,
    return
  }
  func.func @transform_0(%arg0: i32) -> (i32, i32, i32) {
    %c0_i32 = arith.constant 0 : i32
    %c0_i32_0 = arith.constant 0 : i32
    %c0_i32_1 = arith.constant 0 : i32
    return %arg0, %c0_i32, %c0_i32_0 : i32, i32, i32
  }
  func.func @transform_1(%arg0: i32) -> (i32, i32, i32) {
    %c0_i32 = arith.constant 0 : i32
    %c0_i32_0 = arith.constant 0 : i32
    %c0_i32_1 = arith.constant 0 : i32
    %c0_i32_2 = arith.constant 0 : i32
    return %c0_i32, %c0_i32_0, %c0_i32_1 : i32, i32, i32
  }
  func.func @transform_2(%arg0: i32) -> (i32, i32) {
    %c0_i32 = arith.constant 0 : i32
    %c0_i32_0 = arith.constant 0 : i32
    %c0_i32_1 = arith.constant 0 : i32
    return %c0_i32, %c0_i32_0 : i32, i32
  }
  func.func @transform_3(%arg0: i32) -> (i32, i32) {
    %c0_i32 = arith.constant 0 : i32
    %c0_i32_0 = arith.constant 0 : i32
    %c0_i32_1 = arith.constant 0 : i32
    return %c0_i32, %c0_i32_0 : i32, i32
  }
  func.func @transform_4(%arg0: i32) -> (i32, i32, i32) {
    %c0_i32 = arith.constant 0 : i32
    %c0_i32_0 = arith.constant 0 : i32
    %c0_i32_1 = arith.constant 0 : i32
    return %arg0, %c0_i32, %c0_i32_0 : i32, i32, i32
  }
}

module attributes {stable_mosaic.version = 11 : i64} {
  func.func @conv3x3_kernel(%arg0: i32, %arg1: memref<1x38x16xbf16, #tpu.memory_space<vmem>>, %arg2: memref<9x16x32xbf16, #tpu.memory_space<vmem>>, %arg3: memref<1x32xf32, #tpu.memory_space<vmem>>, %arg4: memref<24x1xf32, #tpu.memory_space<vmem>>, %arg5: memref<1x38x32xbf16, #tpu.memory_space<vmem>>) attributes {dimension_semantics = [#tpu.dimension_semantics<parallel>], iteration_bounds = array<i64: 2>, scalar_prefetch = 0 : i64, scratch_operands = 0 : i64, tpu.core_type = #tpu.core_type<tc>, window_params = [{transform_indices = @transform_0, window_bounds = array<i64: 1, 38, 16>}, {pipeline_mode = #tpu.pipeline_mode<synchronous>, transform_indices = @transform_1, window_bounds = array<i64: 9, 16, 32>}, {pipeline_mode = #tpu.pipeline_mode<synchronous>, transform_indices = @transform_2, window_bounds = array<i64: 1, 32>}, {pipeline_mode = #tpu.pipeline_mode<synchronous>, transform_indices = @transform_3, window_bounds = array<i64: 24, 1>}, {transform_indices = @transform_4, window_bounds = array<i64: 1, 38, 32>}]} {
    %c0 = arith.constant 0 : index
    %c0_0 = arith.constant 0 : index
    %c0_1 = arith.constant 0 : index
    %0 = vector.load %arg1[%c0, %c0_0, %c0_1] : memref<1x38x16xbf16, #tpu.memory_space<vmem>>, vector<1x24x16xbf16>
    %1 = vector.shape_cast %0 : vector<1x24x16xbf16> to vector<24x16xbf16>
    %c0_2 = arith.constant 0 : index
    %c0_3 = arith.constant 0 : index
    %c0_4 = arith.constant 0 : index
    %2 = vector.load %arg2[%c0_2, %c0_3, %c0_4] : memref<9x16x32xbf16, #tpu.memory_space<vmem>>, vector<1x16x32xbf16>
    %3 = vector.shape_cast %2 : vector<1x16x32xbf16> to vector<16x32xbf16>
    %cst = arith.constant dense<0.000000e+00> : vector<24x32xf32>
    %4 = tpu.matmul %1, %3, %cst {dimension_numbers = #tpu.dot_dimension_numbers<[1], [0], [0], [1], [0, 0, 1, 1], [], []>} : vector<24x16xbf16>, vector<16x32xbf16>, vector<24x32xf32> -> vector<24x32xf32>
    %c0_5 = arith.constant 0 : index
    %c1 = arith.constant 1 : index
    %c0_6 = arith.constant 0 : index
    %5 = vector.load %arg1[%c0_5, %c1, %c0_6] : memref<1x38x16xbf16, #tpu.memory_space<vmem>>, vector<1x24x16xbf16>
    %6 = vector.shape_cast %5 : vector<1x24x16xbf16> to vector<24x16xbf16>
    %c1_7 = arith.constant 1 : index
    %c0_8 = arith.constant 0 : index
    %c0_9 = arith.constant 0 : index
    %7 = vector.load %arg2[%c1_7, %c0_8, %c0_9] : memref<9x16x32xbf16, #tpu.memory_space<vmem>>, vector<1x16x32xbf16>
    %8 = vector.shape_cast %7 : vector<1x16x32xbf16> to vector<16x32xbf16>
    %cst_10 = arith.constant dense<0.000000e+00> : vector<24x32xf32>
    %9 = tpu.matmul %6, %8, %cst_10 {dimension_numbers = #tpu.dot_dimension_numbers<[1], [0], [0], [1], [0, 0, 1, 1], [], []>} : vector<24x16xbf16>, vector<16x32xbf16>, vector<24x32xf32> -> vector<24x32xf32>
    %10 = arith.addf %4, %9 : vector<24x32xf32>
    %c0_11 = arith.constant 0 : index
    %c2 = arith.constant 2 : index
    %c0_12 = arith.constant 0 : index
    %11 = vector.load %arg1[%c0_11, %c2, %c0_12] : memref<1x38x16xbf16, #tpu.memory_space<vmem>>, vector<1x24x16xbf16>
    %12 = vector.shape_cast %11 : vector<1x24x16xbf16> to vector<24x16xbf16>
    %c2_13 = arith.constant 2 : index
    %c0_14 = arith.constant 0 : index
    %c0_15 = arith.constant 0 : index
    %13 = vector.load %arg2[%c2_13, %c0_14, %c0_15] : memref<9x16x32xbf16, #tpu.memory_space<vmem>>, vector<1x16x32xbf16>
    %14 = vector.shape_cast %13 : vector<1x16x32xbf16> to vector<16x32xbf16>
    %cst_16 = arith.constant dense<0.000000e+00> : vector<24x32xf32>
    %15 = tpu.matmul %12, %14, %cst_16 {dimension_numbers = #tpu.dot_dimension_numbers<[1], [0], [0], [1], [0, 0, 1, 1], [], []>} : vector<24x16xbf16>, vector<16x32xbf16>, vector<24x32xf32> -> vector<24x32xf32>
    %16 = arith.addf %10, %15 : vector<24x32xf32>
    %c0_17 = arith.constant 0 : index
    %c6 = arith.constant 6 : index
    %c0_18 = arith.constant 0 : index
    %17 = vector.load %arg1[%c0_17, %c6, %c0_18] : memref<1x38x16xbf16, #tpu.memory_space<vmem>>, vector<1x24x16xbf16>
    %18 = vector.shape_cast %17 : vector<1x24x16xbf16> to vector<24x16xbf16>
    %c3 = arith.constant 3 : index
    %c0_19 = arith.constant 0 : index
    %c0_20 = arith.constant 0 : index
    %19 = vector.load %arg2[%c3, %c0_19, %c0_20] : memref<9x16x32xbf16, #tpu.memory_space<vmem>>, vector<1x16x32xbf16>
    %20 = vector.shape_cast %19 : vector<1x16x32xbf16> to vector<16x32xbf16>
    %cst_21 = arith.constant dense<0.000000e+00> : vector<24x32xf32>
    %21 = tpu.matmul %18, %20, %cst_21 {dimension_numbers = #tpu.dot_dimension_numbers<[1], [0], [0], [1], [0, 0, 1, 1], [], []>} : vector<24x16xbf16>, vector<16x32xbf16>, vector<24x32xf32> -> vector<24x32xf32>
    %22 = arith.addf %16, %21 : vector<24x32xf32>
    %c0_22 = arith.constant 0 : index
    %c7 = arith.constant 7 : index
    %c0_23 = arith.constant 0 : index
    %23 = vector.load %arg1[%c0_22, %c7, %c0_23] : memref<1x38x16xbf16, #tpu.memory_space<vmem>>, vector<1x24x16xbf16>
    %24 = vector.shape_cast %23 : vector<1x24x16xbf16> to vector<24x16xbf16>
    %c4 = arith.constant 4 : index
    %c0_24 = arith.constant 0 : index
    %c0_25 = arith.constant 0 : index
    %25 = vector.load %arg2[%c4, %c0_24, %c0_25] : memref<9x16x32xbf16, #tpu.memory_space<vmem>>, vector<1x16x32xbf16>
    %26 = vector.shape_cast %25 : vector<1x16x32xbf16> to vector<16x32xbf16>
    %cst_26 = arith.constant dense<0.000000e+00> : vector<24x32xf32>
    %27 = tpu.matmul %24, %26, %cst_26 {dimension_numbers = #tpu.dot_dimension_numbers<[1], [0], [0], [1], [0, 0, 1, 1], [], []>} : vector<24x16xbf16>, vector<16x32xbf16>, vector<24x32xf32> -> vector<24x32xf32>
    %28 = arith.addf %22, %27 : vector<24x32xf32>
    %c0_27 = arith.constant 0 : index
    %c8 = arith.constant 8 : index
    %c0_28 = arith.constant 0 : index
    %29 = vector.load %arg1[%c0_27, %c8, %c0_28] : memref<1x38x16xbf16, #tpu.memory_space<vmem>>, vector<1x24x16xbf16>
    %30 = vector.shape_cast %29 : vector<1x24x16xbf16> to vector<24x16xbf16>
    %c5 = arith.constant 5 : index
    %c0_29 = arith.constant 0 : index
    %c0_30 = arith.constant 0 : index
    %31 = vector.load %arg2[%c5, %c0_29, %c0_30] : memref<9x16x32xbf16, #tpu.memory_space<vmem>>, vector<1x16x32xbf16>
    %32 = vector.shape_cast %31 : vector<1x16x32xbf16> to vector<16x32xbf16>
    %cst_31 = arith.constant dense<0.000000e+00> : vector<24x32xf32>
    %33 = tpu.matmul %30, %32, %cst_31 {dimension_numbers = #tpu.dot_dimension_numbers<[1], [0], [0], [1], [0, 0, 1, 1], [], []>} : vector<24x16xbf16>, vector<16x32xbf16>, vector<24x32xf32> -> vector<24x32xf32>
    %34 = arith.addf %28, %33 : vector<24x32xf32>
    %c0_32 = arith.constant 0 : index
    %c12 = arith.constant 12 : index
    %c0_33 = arith.constant 0 : index
    %35 = vector.load %arg1[%c0_32, %c12, %c0_33] : memref<1x38x16xbf16, #tpu.memory_space<vmem>>, vector<1x24x16xbf16>
    %36 = vector.shape_cast %35 : vector<1x24x16xbf16> to vector<24x16xbf16>
    %c6_34 = arith.constant 6 : index
    %c0_35 = arith.constant 0 : index
    %c0_36 = arith.constant 0 : index
    %37 = vector.load %arg2[%c6_34, %c0_35, %c0_36] : memref<9x16x32xbf16, #tpu.memory_space<vmem>>, vector<1x16x32xbf16>
    %38 = vector.shape_cast %37 : vector<1x16x32xbf16> to vector<16x32xbf16>
    %cst_37 = arith.constant dense<0.000000e+00> : vector<24x32xf32>
    %39 = tpu.matmul %36, %38, %cst_37 {dimension_numbers = #tpu.dot_dimension_numbers<[1], [0], [0], [1], [0, 0, 1, 1], [], []>} : vector<24x16xbf16>, vector<16x32xbf16>, vector<24x32xf32> -> vector<24x32xf32>
    %40 = arith.addf %34, %39 : vector<24x32xf32>
    %c0_38 = arith.constant 0 : index
    %c13 = arith.constant 13 : index
    %c0_39 = arith.constant 0 : index
    %41 = vector.load %arg1[%c0_38, %c13, %c0_39] : memref<1x38x16xbf16, #tpu.memory_space<vmem>>, vector<1x24x16xbf16>
    %42 = vector.shape_cast %41 : vector<1x24x16xbf16> to vector<24x16xbf16>
    %c7_40 = arith.constant 7 : index
    %c0_41 = arith.constant 0 : index
    %c0_42 = arith.constant 0 : index
    %43 = vector.load %arg2[%c7_40, %c0_41, %c0_42] : memref<9x16x32xbf16, #tpu.memory_space<vmem>>, vector<1x16x32xbf16>
    %44 = vector.shape_cast %43 : vector<1x16x32xbf16> to vector<16x32xbf16>
    %cst_43 = arith.constant dense<0.000000e+00> : vector<24x32xf32>
    %45 = tpu.matmul %42, %44, %cst_43 {dimension_numbers = #tpu.dot_dimension_numbers<[1], [0], [0], [1], [0, 0, 1, 1], [], []>} : vector<24x16xbf16>, vector<16x32xbf16>, vector<24x32xf32> -> vector<24x32xf32>
    %46 = arith.addf %40, %45 : vector<24x32xf32>
    %c0_44 = arith.constant 0 : index
    %c14 = arith.constant 14 : index
    %c0_45 = arith.constant 0 : index
    %47 = vector.load %arg1[%c0_44, %c14, %c0_45] : memref<1x38x16xbf16, #tpu.memory_space<vmem>>, vector<1x24x16xbf16>
    %48 = vector.shape_cast %47 : vector<1x24x16xbf16> to vector<24x16xbf16>
    %c8_46 = arith.constant 8 : index
    %c0_47 = arith.constant 0 : index
    %c0_48 = arith.constant 0 : index
    %49 = vector.load %arg2[%c8_46, %c0_47, %c0_48] : memref<9x16x32xbf16, #tpu.memory_space<vmem>>, vector<1x16x32xbf16>
    %50 = vector.shape_cast %49 : vector<1x16x32xbf16> to vector<16x32xbf16>
    %cst_49 = arith.constant dense<0.000000e+00> : vector<24x32xf32>
    %51 = tpu.matmul %48, %50, %cst_49 {dimension_numbers = #tpu.dot_dimension_numbers<[1], [0], [0], [1], [0, 0, 1, 1], [], []>} : vector<24x16xbf16>, vector<16x32xbf16>, vector<24x32xf32> -> vector<24x32xf32>
    %52 = arith.addf %46, %51 : vector<24x32xf32>
    %c0_50 = arith.constant 0 : index
    %c0_51 = arith.constant 0 : index
    %53 = vector.load %arg3[%c0_50, %c0_51] : memref<1x32xf32, #tpu.memory_space<vmem>>, vector<1x32xf32>
    %54 = vector.broadcast %53 : vector<1x32xf32> to vector<24x32xf32>
    %55 = arith.addf %52, %54 : vector<24x32xf32>
    %cst_52 = arith.constant 0.000000e+00 : f32
    %56 = vector.broadcast %cst_52 : f32 to vector<24x32xf32>
    %57 = arith.maximumf %55, %56 : vector<24x32xf32>
    %c0_53 = arith.constant 0 : index
    %c0_54 = arith.constant 0 : index
    %58 = vector.load %arg4[%c0_53, %c0_54] : memref<24x1xf32, #tpu.memory_space<vmem>>, vector<24x1xf32>
    %59 = vector.broadcast %58 : vector<24x1xf32> to vector<24x32xf32>
    %60 = arith.mulf %57, %59 : vector<24x32xf32>
    %61 = arith.truncf %60 : vector<24x32xf32> to vector<24x32xbf16>
    %cst_55 = arith.constant 0.000000e+00 : bf16
    %62 = vector.broadcast %cst_55 : bf16 to vector<7x32xbf16>
    %c0_56 = arith.constant 0 : index
    %c0_57 = arith.constant 0 : index
    %c0_58 = arith.constant 0 : index
    %63 = vector.load %arg5[%c0_56, %c0_57, %c0_58] : memref<1x38x32xbf16, #tpu.memory_space<vmem>>, vector<1x7x32xbf16>
    %64 = vector.shape_cast %63 : vector<1x7x32xbf16> to vector<7x32xbf16>
    %65 = vector.shape_cast %62 : vector<7x32xbf16> to vector<1x7x32xbf16>
    tpu.vector_store %arg5[%c0_56, %c0_57, %c0_58], %65 {strides = array<i32>} : memref<1x38x32xbf16, #tpu.memory_space<vmem>>, vector<1x7x32xbf16>,
    %c0_59 = arith.constant 0 : index
    %c31 = arith.constant 31 : index
    %c0_60 = arith.constant 0 : index
    %66 = vector.load %arg5[%c0_59, %c31, %c0_60] : memref<1x38x32xbf16, #tpu.memory_space<vmem>>, vector<1x7x32xbf16>
    %67 = vector.shape_cast %66 : vector<1x7x32xbf16> to vector<7x32xbf16>
    %68 = vector.shape_cast %62 : vector<7x32xbf16> to vector<1x7x32xbf16>
    tpu.vector_store %arg5[%c0_59, %c31, %c0_60], %68 {strides = array<i32>} : memref<1x38x32xbf16, #tpu.memory_space<vmem>>, vector<1x7x32xbf16>,
    %c0_61 = arith.constant 0 : index
    %c7_62 = arith.constant 7 : index
    %c0_63 = arith.constant 0 : index
    %69 = vector.load %arg5[%c0_61, %c7_62, %c0_63] : memref<1x38x32xbf16, #tpu.memory_space<vmem>>, vector<1x24x32xbf16>
    %70 = vector.shape_cast %69 : vector<1x24x32xbf16> to vector<24x32xbf16>
    %71 = vector.shape_cast %61 : vector<24x32xbf16> to vector<1x24x32xbf16>
    tpu.vector_store %arg5[%c0_61, %c7_62, %c0_63], %71 {strides = array<i32>} : memref<1x38x32xbf16, #tpu.memory_space<vmem>>, vector<1x24x32xbf16>,
    return
  }
  func.func @transform_0(%arg0: i32) -> (i32, i32, i32) {
    %c0_i32 = arith.constant 0 : i32
    %c0_i32_0 = arith.constant 0 : i32
    %c0_i32_1 = arith.constant 0 : i32
    return %arg0, %c0_i32, %c0_i32_0 : i32, i32, i32
  }
  func.func @transform_1(%arg0: i32) -> (i32, i32, i32) {
    %c0_i32 = arith.constant 0 : i32
    %c0_i32_0 = arith.constant 0 : i32
    %c0_i32_1 = arith.constant 0 : i32
    %c0_i32_2 = arith.constant 0 : i32
    return %c0_i32, %c0_i32_0, %c0_i32_1 : i32, i32, i32
  }
  func.func @transform_2(%arg0: i32) -> (i32, i32) {
    %c0_i32 = arith.constant 0 : i32
    %c0_i32_0 = arith.constant 0 : i32
    %c0_i32_1 = arith.constant 0 : i32
    return %c0_i32, %c0_i32_0 : i32, i32
  }
  func.func @transform_3(%arg0: i32) -> (i32, i32) {
    %c0_i32 = arith.constant 0 : i32
    %c0_i32_0 = arith.constant 0 : i32
    %c0_i32_1 = arith.constant 0 : i32
    return %c0_i32, %c0_i32_0 : i32, i32
  }
  func.func @transform_4(%arg0: i32) -> (i32, i32, i32) {
    %c0_i32 = arith.constant 0 : i32
    %c0_i32_0 = arith.constant 0 : i32
    %c0_i32_1 = arith.constant 0 : i32
    return %arg0, %c0_i32, %c0_i32_0 : i32, i32, i32
  }
}

module attributes {stable_mosaic.version = 11 : i64} {
  func.func @gap_fc_kernel(%arg0: memref<2x18x32xbf16, #tpu.memory_space<vmem>>, %arg1: memref<32x10xbf16, #tpu.memory_space<vmem>>, %arg2: memref<1x10xf32, #tpu.memory_space<vmem>>, %arg3: memref<2x10xf32, #tpu.memory_space<vmem>>) attributes {dimension_semantics = [], scalar_prefetch = 0 : i64, scratch_operands = 0 : i64, tpu.core_type = #tpu.core_type<tc>} {
    %c0 = arith.constant 0 : index
    %c0_0 = arith.constant 0 : index
    %c0_1 = arith.constant 0 : index
    %0 = vector.load %arg0[%c0, %c0_0, %c0_1] : memref<2x18x32xbf16, #tpu.memory_space<vmem>>, vector<2x18x32xbf16>
    %1 = arith.extf %0 : vector<2x18x32xbf16> to vector<2x18x32xf32>
    %cst = arith.constant dense<0.000000e+00> : vector<2x32xf32>
    %2 = vector.multi_reduction <add>, %1, %cst [1] : vector<2x18x32xf32> to vector<2x32xf32>
    %cst_2 = arith.constant 2.500000e-01 : f32
    %3 = vector.broadcast %cst_2 : f32 to vector<2x32xf32>
    %4 = arith.mulf %2, %3 : vector<2x32xf32>
    %5 = arith.truncf %4 : vector<2x32xf32> to vector<2x32xbf16>
    %c0_3 = arith.constant 0 : index
    %c0_4 = arith.constant 0 : index
    %6 = vector.load %arg1[%c0_3, %c0_4] : memref<32x10xbf16, #tpu.memory_space<vmem>>, vector<32x10xbf16>
    %cst_5 = arith.constant dense<0.000000e+00> : vector<2x10xf32>
    %7 = tpu.matmul %5, %6, %cst_5 {dimension_numbers = #tpu.dot_dimension_numbers<[1], [0], [0], [1], [0, 0, 1, 1], [], []>} : vector<2x32xbf16>, vector<32x10xbf16>, vector<2x10xf32> -> vector<2x10xf32>
    %c0_6 = arith.constant 0 : index
    %c0_7 = arith.constant 0 : index
    %8 = vector.load %arg2[%c0_6, %c0_7] : memref<1x10xf32, #tpu.memory_space<vmem>>, vector<1x10xf32>
    %9 = vector.broadcast %8 : vector<1x10xf32> to vector<2x10xf32>
    %10 = arith.addf %7, %9 : vector<2x10xf32>
    %c0_8 = arith.constant 0 : index
    %c0_9 = arith.constant 0 : index
    %11 = vector.load %arg3[%c0_8, %c0_9] : memref<2x10xf32, #tpu.memory_space<vmem>>, vector<2x10xf32>
    tpu.vector_store %arg3[%c0_8, %c0_9], %10 {strides = array<i32>} : memref<2x10xf32, #tpu.memory_space<vmem>>, vector<2x10xf32>,
    return
  }
}

</mosaic_0001>

<bundles_post_ra>
// kernel: vgg_forward.8
= control target key start
LH: loop header
LB: loop body
LE: loop exit
PB: predicated region body
PF: predicated region fallthrough
CT: control target
= control target key end

     0   :  { %s1541_s15 = smov 0   ;;  %s1696_s0 = inlined_call_operand.vmem [shape: bf16[2,38,32], index: 0, kind: input, shape index: {}]   ;;  %s1697_s1 = inlined_call_operand.vmem [shape: bf16[9,32,32], index: 1, kind: input, shape index: {}]   ;;  %s1698_s2 = inlined_call_operand.vmem [shape: f32[1,32], index: 2, kind: input, shape index: {}]   ;;  %s1699_s3 = inlined_call_operand.vmem [shape: f32[2,4], index: 3, kind: input, shape index: {}]   ;;  %s1700_s4 = inlined_call_operand.vmem [shape: bf16[2,18,32], index: 4, kind: output, shape index: {}]  }
   0x1 LB: > { %s1240_s16 = sadd.s32 4294967295, %s1511_s15   ;;  %p1244_p0 = scmp.ge.s32.totalorder %s1511_s15, 1  ;;  %s1511_s15 = sphi %s1541_s15, %s14_s15  }
   0x2   : > { %p162_p1 = scmp.lt.s32.totalorder %s1511_s15, 3 }
   0x4   : > { %p163_p2 = pnand %p1244_p0, %p162_p1 }
   0x5   : > { %p188_p3 = scmp.lt.s32.totalorder (!%p163_p2), %s1240_s16, 1 }
   0x6   : > { %166 = sbr.rel (%p163_p2) target bundleno = 473 (0x1d9), region = 36 }
   0xb   : > { %v1474_v0 = vld [vmem:[%s1697_s1 + $0x18] sm:$0xff]   ;;  %v1475_v1 = vld [vmem:[%s1697_s1 + $0x8] sm:$0xff]   ;;  %v1476_v2 = vld [vmem:[%s1697_s1 + $0x10] sm:$0xff]   ;;  %s1702_s16 = smov (!%p188_p3, %s1240_s16), 1  ;;  %vm250_vm0 = vcmask 261120   ;;  %vm380_vm2 = vcmask 1046528  }
   0xc   : > { %1379 = vmatprep.subr.bf16.mxu0 %v1474_v0  ;;  %1387 = vmatprep.subr.bf16.mxu1 %v1475_v1  ;;  %v1477_v3 = vld [vmem:[%s1697_s1] sm:$0xff]   ;;  %s1461_s25 = smul.u32 20, %s1702_s16  ;;  %v1481_v4 = vld [vmem:[%s1697_s1 + $0x28] sm:$0xff]   ;;  %v1482_v5 = vld [vmem:[%s1697_s1 + $0x38] sm:$0xff]   ;;  %vm222_vm1 = vsmask.f32 7424 }
   0xd   : > { %1380 = vmatpush3.bf16.msra.mxu0 %v1474_v0  ;;  %1388 = vmatpush3.bf16.msra.mxu1 %v1475_v1  ;;  %v1484_v13 = vld [vmem:[%s1697_s1 + $0x30] sm:$0xff]   ;;  %vm466_vm3 = vcmask 1044480   ;;  %v1489_v31 = vld [vmem:[%s1697_s1 + $0x58] sm:$0xff]   ;;  %v1483_v35 = vld [vmem:[%s1697_s1 + $0x20] sm:$0xff]   ;;  %vm548_vm4 = vsmask.f32 4352 }
   0xe   : > { %1381 = vmatprep.subr.bf16.mxu0 %v1476_v2  ;;  %1389 = vmatprep.subr.bf16.mxu1 %v1477_v3  ;;  %s1570_s30 = scalar_lea.vmem %s1696_s0, %s1461_s25  ;;  %v1491_v39 = vld [vmem:[%s1697_s1 + $0x50] sm:$0xff]   ;;  %v1488_v43 = vld [vmem:[%s1697_s1 + $0x48] sm:$0xff]   ;;  %v1496_v55 = vld [vmem:[%s1697_s1 + $0x78] sm:$0xff]   ;;  %vm812_vm5 = vsmask.f32 5376  ;;  %vm730_vm6 = vcmask 1045504  }
   0xf   : > { %v199_v6 = vld [vmem:[%s1570_s30] sm:$0xf]  ;;  %v1577_v7 = vld [vmem:[%s1570_s30 + $0x4] sm:$0xf]  ;;  %v1580_v8 = vld [vmem:[%s1570_s30 + $0x8] sm:$0xf] }
  0x10   : > { %v206_v9 = vld [vmem:[%s1570_s30 + $0xc] sm:$0x1]  ;;  %v1251_v10 = vcombine.low %v199_v6, %v1577_v7  ;;  %v1257_v11 = vcombine.low %v1580_v8, %v1580_v8  ;;  %v371_v14 = vld [vmem:[%s1570_s30] sm:$0xe]  ;;  %v1294_v42 = vcombine.low %v1577_v7, %v1580_v8  ;;  %v711_v51 = vld [vmem:[%s1570_s30 + $0x4] sm:$0xc] }
  0x11   : > { %1382 = vmatpush3.bf16.msra.mxu0 %v1476_v2  ;;  %1390 = vmatpush3.bf16.msra.mxu1 %v1477_v3  ;;  %v1587_v12 = vcombine.low %v1580_v8, %v206_v9  ;;  %v1266_v17 = vcombine.low %v371_v14, %v1577_v7  ;;  %v453_v18 = vld [vmem:[%s1570_s30] sm:$0x8]  ;;  %v454_v19 = vld [vmem:[%s1570_s30 + $0xc] sm:$0x7]  ;;  %v712_v52 = vld [vmem:[%s1570_s30 + $0x8] sm:$0xf] }
  0x12   : > { %1395 = vmatprep.subr.bf16.mxu0 %v1481_v4  ;;  %1403 = vmatprep.subr.bf16.mxu1 %v1482_v5  ;;  %v224_v15 = vshrl.u32 %v1251_v10, 16  ;;  %v226_v16 = vshll.u32 %v1251_v10, 16  ;;  %v1275_v23 = vcombine.low %v453_v18, %v1577_v7  ;;  %v1276_v26 = vcombine.low %v1580_v8, %v454_v19  ;;  %v539_v33 = vld [vmem:[%s1570_s30 + $0xc] sm:$0xf]  ;;  %v714_v56 = vld [vmem:[%s1570_s30 + $0x10] sm:$0x3] }
  0x13   : > { %1391 = vmatprep.mubr.msk.bf16.mxu1 %vm250_vm0, %v1251_v10  ;;  %v231_v20 = vshll.u32 %v1587_v12, 16  ;;  %v235_v21 = vshrl.u32 %v1587_v12, 16  ;;  %v382_v22 = vrot.slane %v1587_v12, 1  ;;  %v381_v25 = vrot.slane %v1266_v17, 1  ;;  %v713_v53 = vld [vmem:[%s1570_s30 + $0xc] sm:$0xf] }
  0x14   : > { %1392 = vmatmul.mubr.msk.bf16.vlgmr.msra.gmra.mxu1 %vm250_vm0, %v1257_v11  ;;  %v228_v24 = vrot.slane %v226_v16, 1  ;;  %v467_v28 = vrot.slane %v1275_v23, 3  ;;  %v468_v30 = vrot.slane %v1276_v26, 3  ;;  %v1285_v38 = vcombine.low %v1580_v8, %v539_v33  ;;  %v803_v58 = vld [vmem:[%s1570_s30 + $0x10] sm:$0x7]  ;;  %v1490_v61 = vld [vmem:[%s1697_s1 + $0x40] sm:$0xff]  }
  0x15   : > { %1404 = vmatpush3.bf16.msra.mxu1 %v1482_v5  ;;  %v233_v27 = vrot.slane %v231_v20, 1  ;;  %v383_v36 = vsel %vm380_vm2, %v381_v25, %v382_v22  ;;  %v550_v40 = vshrl.u32 %v1275_v23, 16  ;;  %v553_v41 = vshll.u32 %v1275_v23, 16  ;;  %v1495_v9 = vld [vmem:[%s1697_s1 + $0x68] sm:$0xff]   ;;  %v899_v14 = vld [vmem:[%s1570_s30 + $0x4] sm:$0x8] }
  0x16   : > { %1405 = vmatprep.subr.bf16.mxu1 %v1484_v13  ;;  %v229_v29 = vor.u32 %v228_v24, %v224_v15  ;;  %v469_v37 = vsel %vm466_vm3, %v467_v28, %v468_v30  ;;  %v558_v44 = vshrl.u32 %v1285_v38, 16  ;;  %v561_v45 = vshll.u32 %v1285_v38, 16  ;;  %v1497_v16 = vld [vmem:[%s1697_s1 + $0x60] sm:$0xff]   ;;  %v1502_v19 = vld [vmem:[%s1697_s1 + $0x88] sm:$0xff]   ;;  %s1462_s7 = smul.u32 12, %s1702_s16 }
  0x17   : > { %v237_v32 = vor.u32 %v235_v21, %v233_v27  ;;  %1407 = vmatprep.mubr.msk.bf16.mxu1 %vm250_vm0, %v469_v37  ;;  %v552_v46 = vrot.slane %v550_v40, 3  ;;  %v555_v47 = vrot.slane %v553_v41, 4  ;;  %v1304_v57 = vcombine.low %v711_v51, %v712_v52 }
  0x18   : > { %v234_v34 = vsel %vm222_vm1, %v229_v29, %v233_v27  ;;  %v560_v48 = vrot.slane %v558_v44, 3  ;;  %v563_v49 = vrot.slane %v561_v45, 4  ;;  %v1295_v59 = vcombine.low %v539_v33, %v539_v33  ;;  %s1677_s10 = scalar_lea.vmem %s1700_s4, %s1462_s7 }
  0x19   : > { %1406 = vmatpush3.bf16.msra.mxu1 %v1484_v13  ;;  %1383 = vmatprep.mubr.msk.bf16.mxu0 %vm250_vm0, %v234_v34  ;;  %v556_v50 = vor.u32 %v555_v47, %v552_v46  ;;  %v1314_v60 = vcombine.low %v713_v53, %v803_v58  ;;  %v1305_v63 = vcombine.low %v713_v53, %v714_v56  ;;  %v814_v0 = vshrl.u32 %v1304_v57, 16 }
  0x1a   : > { %1384 = vmatmul.mubr.msk.bf16.vlgmr.msra.gmra.mxu0 %vm250_vm0, %v237_v32  ;;  %1419 = vmatprep.subr.bf16.mxu1 %v1489_v31  ;;  %v564_v54 = vor.u32 %v563_v49, %v560_v48  ;;  %v817_v1 = vshll.u32 %v1304_v57, 16  ;;  %v731_v10 = vrot.slane %v1304_v57, 2  ;;  %v1323_v18 = vcombine.low %v899_v14, %v712_v52 }
  0x1b   : > { %1396 = vmatpush3.bf16.msra.mxu0 %v1481_v4  ;;  %1399 = vmatprep.mubr.msk.bf16.mxu0 %vm250_vm0, %v383_v36  ;;  %v822_v2 = vshrl.u32 %v1314_v60, 16  ;;  %v825_v3 = vshll.u32 %v1314_v60, 16  ;;  %v1498_v4 = vld [vmem:[%s1697_s1 + $0x70] sm:$0xff]   ;;  %v816_v5 = vrot.slane %v814_v0, 2  ;;  %v732_v11 = vrot.slane %v1305_v63, 2 }
  0x1c   : > { %1397 = vmatprep.subr.bf16.mxu0 %v1483_v35  ;;  %1408 = vmatmul.mubr.msk.bf16.vlgmr.msra.gmra.mxu1 %vm250_vm0, %v468_v30  ;;  %v565_v62 = vsel %vm548_vm4, %v556_v50, %v564_v54  ;;  %v819_v6 = vrot.slane %v817_v1, 3  ;;  %v908_v20 = vrot.slane %v1323_v18, 3  ;;  %v909_v21 = vrot.slane %v1314_v60, 3 }
  0x1d   : > { %1420 = vmatpush3.bf16.msra.mxu1 %v1489_v31  ;;  %1423 = vmatprep.mubr.msk.bf16.mxu1 %vm250_vm0, %v1294_v42  ;;  %v824_v7 = vrot.slane %v822_v2, 2  ;;  %v827_v8 = vrot.slane %v825_v3, 3  ;;  %v733_v17 = vsel %vm730_vm6, %v731_v10, %v732_v11  ;;  %v1513_v24 = vmov 0.0  }
  0x1e   : > { %1421 = vmatprep.subr.bf16.mxu1 %v1491_v39  ;;  %v820_v12 = vor.u32 %v819_v6, %v816_v5  ;;  %v910_v23 = vsel %vm466_vm3, %v908_v20, %v909_v21  ;;  %vm1514_vm7 = vmmov 0   ;;  %vm994_vm8 = vcmask 257024  }
  0x1f   : > { %1398 = vmatpush3.bf16.msra.mxu0 %v1483_v35  ;;  %v828_v13 = vor.u32 %v827_v8, %v824_v7  ;;  %vm997_vm9 = vcmask 253952   ;;  %v1515_v25 = vmov 0   ;;  %vm1001_vm10 = vcmask 1041408  }
  0x20   : > { %1411 = vmatprep.subr.bf16.mxu0 %v1488_v43  ;;  %995 = vst.msk [vmem:[%s1677_s10] sm:$0xf] %vm994_vm8, %v1515_v25  ;;  %996 = vst.msk [vmem:[%s1677_s10 + $0x4] sm:$0xf] %vm994_vm8, %v1515_v25  ;;  %vm1013_vm11 = vcmask 1043456   ;;  %vm1009_vm12 = vcmask 31744  }
  0x21   : > { %1422 = vmatpush3.bf16.msra.mxu1 %v1491_v39  ;;  %v829_v15 = vsel %vm812_vm5, %v820_v12, %v828_v13  ;;  %998 = vst.msk [vmem:[%s1677_s10 + $0x8] sm:$0x1] %vm997_vm9, %v1515_v25  ;;  %v1328_v12 = vld [vmem:[%s1698_s2] ss:$0 sm:$0xff]  ;;  %vm1101_vm13 = vcmask 1042432   ;;  %vm1092_vm14 = vcmask 257027  }
  0x22   : > { %1400 = vmatmul.mubr.msk.bf16.vlgmr.msra.gmra.mxu0 %vm250_vm0, %v382_v22  ;;  %1435 = vmatprep.subr.bf16.mxu1 %v1496_v55  ;;  %v1503_v22 = vld [vmem:[%s1697_s1 + $0x80] sm:$0xff]   ;;  %vm1183_vm15 = vcmask 254977  }
  0x23   : > { %1412 = vmatpush3.bf16.msra.mxu0 %v1488_v43  ;;  %1415 = vmatprep.mubr.msk.bf16.mxu0 %vm250_vm0, %v565_v62 }
  0x24   : > { %1413 = vmatprep.subr.bf16.mxu0 %v1490_v61  ;;  %1424 = vmatmul.mubr.msk.bf16.vlgmr.msra.gmra.mxu1 %vm250_vm0, %v1295_v59 }
  0x25   : > { %1436 = vmatpush3.bf16.msra.mxu1 %v1496_v55  ;;  %1439 = vmatprep.mubr.msk.bf16.mxu1 %vm250_vm0, %v829_v15 }
  0x26   : > { %1437 = vmatprep.subr.bf16.mxu1 %v1498_v4 }
  0x27   : > { %1414 = vmatpush3.bf16.msra.mxu0 %v1490_v61 }
  0x28   : > { %1427 = vmatprep.subr.bf16.mxu0 %v1495_v9 }
  0x29   : > { %1438 = vmatpush3.bf16.msra.mxu1 %v1498_v4 }
  0x2a   : > { %1416 = vmatmul.mubr.msk.bf16.vlgmr.msra.gmra.mxu0 %vm250_vm0, %v564_v54  ;;  %1451 = vmatprep.subr.mxu1 %v1513_v24 }
  0x2b   : > { %1428 = vmatpush3.bf16.msra.mxu0 %v1495_v9  ;;  %1431 = vmatprep.mubr.msk.bf16.mxu0 %vm250_vm0, %v733_v17 }
  0x2c   : > { %1429 = vmatprep.subr.bf16.mxu0 %v1497_v16  ;;  %1440 = vmatmul.mubr.msk.bf16.vlgmr.msra.gmra.mxu1 %vm250_vm0, %v828_v13 }
  0x2d   : > { %1453 = vmatprep.mubr.msk.f32.mxu1 %vm1514_vm7, %v1513_v24 }
  0x2f   : > { %1430 = vmatpush3.bf16.msra.mxu0 %v1497_v16 }
  0x30   : > { %1443 = vmatprep.subr.bf16.mxu0 %v1502_v19 }
  0x32   : > { %1432 = vmatmul.mubr.msk.bf16.vlgmr.msra.gmra.mxu0 %vm250_vm0, %v732_v11 }
  0x33   : > { %1444 = vmatpush3.bf16.msra.mxu0 %v1502_v19  ;;  %1447 = vmatprep.mubr.msk.bf16.mxu0 %vm250_vm0, %v910_v23 }
  0x34   : > { %1445 = vmatprep.subr.bf16.mxu0 %v1503_v22 }
  0x37   : > { %1446 = vmatpush3.bf16.msra.mxu0 %v1503_v22 }
  0x3a   : > { %1448 = vmatmul.mubr.msk.bf16.vlgmr.msra.gmra.mxu0 %vm250_vm0, %v909_v21 }
  0xd4   : > { %v1393_v26 = vpop.f32.mrf.mxu1 }
  0xd6   : > { %v357_v27 = vpop.f32.mrf.mxu1 }
  0xd8   : > { %v1394_v28 = vpop.f32.mrf.mxu1 }
  0xda   : > { %v360_v29 = vpop.f32.mrf.mxu1  ;;  %v1385_v30 = vpop.f32.mrf.mxu0 }
  0xdb   : > { %v366_v43 = vadd.f32 %v1393_v26, %v1385_v30 }
  0xdc   : > { %v291_v31 = vpop.f32.mrf.mxu0  ;;  %v1409_v32 = vpop.f32.mrf.mxu1 }
  0xdd   : > { %v358_v46 = vadd.f32 %v357_v27, %v291_v31 }
  0xde   : > { %v1386_v33 = vpop.f32.mrf.mxu0  ;;  %v522_v34 = vpop.f32.mrf.mxu1 }
  0xe0   : > { %v294_v35 = vpop.f32.mrf.mxu0  ;;  %v1410_v36 = vpop.f32.mrf.mxu1 }
  0xe1   : > { %v361_v53 = vadd.f32 %v360_v29, %v294_v35 }
  0xe2   : > { %v1401_v37 = vpop.f32.mrf.mxu0  ;;  %v525_v38 = vpop.f32.mrf.mxu1 }
  0xe3   : > { %v452_v47 = vadd.f32 %v1401_v37, %v366_v43 }
  0xe4   : > { %v436_v39 = vpop.f32.mrf.mxu0  ;;  %v1425_v40 = vpop.f32.mrf.mxu1 }
  0xe5   : > { %v450_v50 = vadd.f32 %v436_v39, %v358_v46  ;;  %v538_v54 = vadd.f32 %v1409_v32, %v452_v47  ;;  %v993_v39 = vld [vmem:[%s1699_s3] sm:$0x3] }
  0xe6   : > { %v1402_v41 = vpop.f32.mrf.mxu0  ;;  %v694_v42 = vpop.f32.mrf.mxu1 }
  0xe7   : > { %v536_v57 = vadd.f32 %v522_v34, %v450_v50 }
  0xe8   : > { %v439_v44 = vpop.f32.mrf.mxu0  ;;  %v1426_v45 = vpop.f32.mrf.mxu1 }
  0xe9   : > { %v451_v58 = vadd.f32 %v439_v44, %v361_v53 }
  0xea   : > { %v1417_v48 = vpop.f32.mrf.mxu0  ;;  %v697_v49 = vpop.f32.mrf.mxu1 }
  0xeb   : > { %v634_v59 = vadd.f32 %v1417_v48, %v538_v54  ;;  %v537_v0 = vadd.f32 %v525_v38, %v451_v58 }
  0xec   : > { %v618_v51 = vpop.f32.mrf.mxu0  ;;  %v1441_v52 = vpop.f32.mrf.mxu1 }
  0xed   : > { %v632_v62 = vadd.f32 %v618_v51, %v536_v57  ;;  %v710_v1 = vadd.f32 %v1425_v40, %v634_v59 }
  0xee   : > { %v1418_v55 = vpop.f32.mrf.mxu0  ;;  %v882_v56 = vpop.f32.mrf.mxu1 }
  0xef   : > { %v708_v3 = vadd.f32 %v694_v42, %v632_v62 }
  0xf0   : > { %v621_v60 = vpop.f32.mrf.mxu0  ;;  %v1442_v61 = vpop.f32.mrf.mxu1 }
  0xf1   : > { %v633_v4 = vadd.f32 %v621_v60, %v537_v0 }
  0xf2   : > { %v1433_v63 = vpop.f32.mrf.mxu0  ;;  %v885_v19 = vpop.f32.mrf.mxu1 }
  0xf3   : > { %v802_v5 = vadd.f32 %v1433_v63, %v710_v1  ;;  %v709_v9 = vadd.f32 %v697_v49, %v633_v4 }
  0xf4   : > { %v786_v2 = vpop.f32.mrf.mxu0 }
  0xf5   : > { %v800_v7 = vadd.f32 %v786_v2, %v708_v3  ;;  %v898_v10 = vadd.f32 %v1441_v52, %v802_v5 }
  0xf6   : > { %v1434_v6 = vpop.f32.mrf.mxu0 }
  0xf7   : > { %v896_v13 = vadd.f32 %v882_v56, %v800_v7 }
  0xf8   : > { %v789_v8 = vpop.f32.mrf.mxu0 }
  0xf9   : > { %v801_v14 = vadd.f32 %v789_v8, %v709_v9 }
  0xfa   : > { %v1449_v11 = vpop.f32.mrf.mxu0 }
  0xfb   : > { %v979_v15 = vadd.f32 %v1449_v11, %v898_v10  ;;  %v897_v21 = vadd.f32 %v885_v19, %v801_v14 }
  0xfc   : > { %v963_v16 = vpop.f32.mrf.mxu0 }
  0xfd   : > { %v989_v17 = vadd.f32 %v1328_v12, %v979_v15  ;;  %v977_v18 = vadd.f32 %v963_v16, %v896_v13 }
  0xfe   : > { %v1450_v20 = vpop.f32.mrf.mxu0 }
  0xff   : > { %v987_v22 = vadd.f32 %v1328_v12, %v977_v18  ;;  %v992_v25 = vmax.f32 %v989_v17, 0.0 }
 0x100   : > { %v966_v23 = vpop.f32.mrf.mxu0 }
 0x101   : > { %v978_v26 = vadd.f32 %v966_v23, %v897_v21  ;;  %v990_v27 = vmax.f32 %v987_v22, 0.0  ;;  %v1095_v29 = vrot.slane %v992_v25, 6 }
 0x103   : > { %v988_v28 = vadd.f32 %v1328_v12, %v978_v26  ;;  %v1002_v31 = vrot.slane %v990_v27, 6  ;;  %v1098_v34 = vadd.f32 %v1095_v29, %v992_v25 }
 0x105   : > { %v991_v30 = vmax.f32 %v988_v28, 0.0  ;;  %v1103_v40 = vrot.slane %v1098_v34, 5 }
 0x107   : > { %v1003_v32 = vrot.slane %v991_v30, 6  ;;  %v1097_v33 = vadd.f32 %v1095_v29, %v991_v30 }
 0x109   : > { %v1004_v35 = vsel %vm1001_vm10, %v1002_v31, %v1003_v32  ;;  %v1102_v37 = vrot.slane %v1097_v33, 5 }
 0x10a   : > { %v1006_v36 = vadd.f32 %v1004_v35, %v990_v27 }
 0x10b   : > { %v1104_v41 = vsel %vm1101_vm13, %v1102_v37, %v1103_v40 }
 0x10c   : > { %v1008_v38 = vrot.slane %v1006_v36, 1 }
 0x10e   : > { %1452 = vmatpush3.msk.msra.mxu1 %vm1013_vm11, %v1008_v38 }
 0x10f   : > { %1456 = vmatprep.subr.mxu1 %v1513_v24  ;;  %1454 = vmatmul.mubr.msk.f32.vlgmr.msra.gmra.mxu1 %vm1009_vm12, %v993_v39 }
 0x110   : > { %1457 = vmatpush3.msk.msra.mxu1 %vm1013_vm11, %v1104_v41  ;;  %1458 = vmatprep.mubr.msk.f32.mxu1 %vm1514_vm7, %v1513_v24 }
 0x113   : > { %1459 = vmatmul.mubr.msk.f32.vlgmr.msra.gmra.mxu1 %vm1009_vm12, %v993_v39 }
 0x1cf   : > { %v1082_v42 = vpop.f32.mrf.mxu1 }
 0x1d0   : > { %v1337_v43 = vpack.c.bf16 %v1082_v42, %v1082_v42 }
 0x1d1   : > { %v1455_v44 = vpop.f32.mrf.mxu1 }
 0x1d2   : > { %v1090_v45 = vrot.slane %v1337_v43, 5 }
 0x1d3   : > { %v1173_v46 = vpop.f32.mrf.mxu1 }
 0x1d4   : > { %1093 = vst.msk [vmem:[%s1677_s10] sm:$0x8] %vm1092_vm14, %v1090_v45  ;;  %v1338_v47 = vpack.c.bf16 %v1173_v46, %v1173_v46 }
 0x1d5   : > { %v1460_v48 = vpop.f32.mrf.mxu1 }
 0x1d6   : > { %v1181_v49 = vrot.slane %v1338_v47, 7 }
 0x1d8   : > { %1184 = vst.msk [vmem:[%s1677_s10 + $0x4] sm:$0x2] %vm1183_vm15, %v1181_v49 }
 0x1d9 PF: > { %s14_s15 = sadd.s32 1, %s1511_s15  }
 0x1da   : > { %p11_p4 = scmp.ge.s32.totalorder %s14_s15, 4  }
 0x1dc   :  { %13 = sbr.rel (!%p11_p4) target bundleno = 1 (0x1), region = 74 }

// kernel: vgg_forward.6
= control target key start
LH: loop header
LB: loop body
LE: loop exit
PB: predicated region body
PF: predicated region fallthrough
CT: control target
= control target key end

     0   :  { %s2367_s15 = smov 0   ;;  %s2866_s0 = inlined_call_operand.vmem [shape: bf16[2,102,8], index: 0, kind: input, shape index: {}]   ;;  %s2867_s1 = inlined_call_operand.vmem [shape: bf16[9,8,16], index: 1, kind: input, shape index: {}]   ;;  %s2868_s2 = inlined_call_operand.vmem [shape: f32[1,16], index: 2, kind: input, shape index: {}]   ;;  %s2869_s3 = inlined_call_operand.vmem [shape: f32[4,8], index: 3, kind: input, shape index: {}]   ;;  %s2870_s4 = inlined_call_operand.vmem [shape: bf16[2,38,16], index: 4, kind: output, shape index: {}]  }
   0x1 LB: > { %s1917_s16 = sadd.s32 4294967295, %s2337_s15   ;;  %p1921_p0 = scmp.ge.s32.totalorder %s2337_s15, 1  ;;  %s2337_s15 = sphi %s2367_s15, %s14_s15  }
   0x2   : > { %p162_p1 = scmp.lt.s32.totalorder %s2337_s15, 3 }
   0x4   : > { %p163_p2 = pnand %p1921_p0, %p162_p1 }
   0x5   : > { %p188_p3 = scmp.lt.s32.totalorder (!%p163_p2), %s1917_s16, 1 }
   0x6   : > { %166 = sbr.rel (%p163_p2) target bundleno = 619 (0x26b), region = 36 }
   0xb   : > { %v1924_v0 = vld [vmem:[%s2867_s1 + $0x4] sm:$0xf]  ;;  %vm302_vm0 = vcmask 1043456   ;;  %v2339_v1 = vmov 0.0   ;;  %s2872_s16 = smov (!%p188_p3, %s1917_s16), 1  ;;  %vm2340_vm1 = vmmov 0  }
   0xc   : > { %2075 = vmatprep.subr.bf16.mxu0 %v2339_v1  ;;  %2293 = vmatprep.subr.bf16.mxu1 %v2339_v1  ;;  %v304_v2 = vsel %vm302_vm0, %v1924_v0, 0  ;;  %s2295_s19 = smul.u32 52, %s2872_s16  ;;  %vm241_vm2 = vsmask.f32 7424  ;;  %v209_v17 = vld [vmem:[%s2867_s1] sm:$0xf] }
   0xd   : > { %2076 = vmatpush3.bf16.msra.mxu0 %v304_v2  ;;  %2294 = vmatpush3.bf16.msra.mxu1 %v304_v2  ;;  %vm286_vm3 = vcmask 64512   ;;  %v1941_v24 = vld [vmem:[%s2867_s1 + $0x8] sm:$0xf]  ;;  %v390_v27 = vsel %vm302_vm0, %v209_v17, 0  ;;  %v1948_v33 = vld [vmem:[%s2867_s1 + $0xc] sm:$0xf] }
   0xe   : > { %2077 = vmatprep.mubr.msk.bf16.mxu0 %vm2340_vm1, %v2339_v1  ;;  %2093 = vmatprep.mubr.msk.bf16.mxu1 %vm2340_vm1, %v2339_v1  ;;  %s2393_s22 = scalar_lea.vmem %s2866_s0, %s2295_s19  ;;  %v499_v29 = vsel %vm302_vm0, %v1941_v24, 0  ;;  %v652_v37 = vsel %vm302_vm0, %v1948_v33, 0  ;;  %vm471_vm4 = vcmask 1046528   ;;  %v1960_v48 = vld [vmem:[%s2867_s1 + $0x10] sm:$0xf]  ;;  %vm904_vm6 = vcmask 1045504  }
   0xf   : > { %2097 = vmatprep.subr.bf16.mxu1 %v2339_v1  ;;  %2119 = vmatprep.subr.bf16.mxu0 %v2339_v1  ;;  %v199_v3 = vld [vmem:[%s2393_s22] sm:$0xf]  ;;  %v2397_v4 = vld [vmem:[%s2393_s22 + $0x4] sm:$0xf]  ;;  %v2401_v6 = vld [vmem:[%s2393_s22 + $0x8] sm:$0xff]   ;;  %v813_v50 = vsel %vm302_vm0, %v1960_v48, 0 }
  0x10   : > { %v1925_v5 = vcombine.low %v199_v3, %v2397_v4  ;;  %v2404_v7 = vld [vmem:[%s2393_s22 + $0x20] sm:$0xff]   ;;  %v250_v10 = vshll.u32 %v2401_v6, 16  ;;  %v2408_v11 = vld [vmem:[%s2393_s22 + $0x28] ss:$0 sps:$4 sm:$0x11]   ;;  %v2417_v18 = vld [vmem:[%s2393_s22 + $0x10] sm:$0xff]  }
  0x11   : > { %v274_v12 = vshll.u32 %v2404_v7, 16  ;;  %v278_v13 = vshrl.u32 %v2404_v7, 16  ;;  %v282_v16 = vshll.u32 %v2408_v11, 16  ;;  %v254_v22 = vshrl.u32 %v2401_v6, 16  ;;  %v2433_v32 = vld [vmem:[%s2393_s22 + $0x18] sm:$0xff]   ;;  %v2494_v56 = vld [vmem:[%s2393_s22 + $0xc] sm:$0xff]  }
  0x12   : > { %v243_v8 = vshrl.u32 %v1925_v5, 16  ;;  %v245_v9 = vshll.u32 %v1925_v5, 16  ;;  %v252_v15 = vrot.slane %v250_v10, 1  ;;  %v258_v23 = vshll.u32 %v2417_v18, 16  ;;  %v465_v43 = vld [vmem:[%s2393_s22] sm:$0xe] }
  0x13   : > { %v276_v19 = vrot.slane %v274_v12, 1  ;;  %v284_v21 = vrot.slane %v282_v16, 1  ;;  %v262_v35 = vshrl.u32 %v2417_v18, 16  ;;  %v266_v36 = vshll.u32 %v2433_v32, 16  ;;  %v584_v52 = vld [vmem:[%s2393_s22 + $0x4] sm:$0xe] }
  0x14   : > { %v247_v14 = vrot.slane %v245_v9, 1  ;;  %v256_v30 = vor.u32 %v254_v22, %v252_v15  ;;  %v260_v31 = vrot.slane %v258_v23, 1  ;;  %v270_v41 = vshrl.u32 %v2433_v32, 16  ;;  %v2488_v53 = vld [vmem:[%s2393_s22 + $0x8] sm:$0xf]  ;;  %v2511_v63 = vld [vmem:[%s2393_s22 + $0x14] sm:$0xff]  }
  0x15   : > { %v280_v25 = vor.u32 %v278_v13, %v276_v19  ;;  %v268_v39 = vrot.slane %v266_v36, 1  ;;  %v1942_v45 = vcombine.low %v465_v43, %v2397_v4  ;;  %v473_v47 = vrot.slane %v2401_v6, 1  ;;  %v1967_v60 = vld [vmem:[%s2867_s1 + $0x14] sm:$0xf]  ;;  %v898_v36 = vld [vmem:[%s2393_s22 + $0x4] sm:$0xc] }
  0x16   : > { %v248_v20 = vor.u32 %v247_v14, %v243_v8  ;;  %v261_v34 = vsel %vm241_vm2, %v256_v30, %v260_v31  ;;  %v264_v38 = vor.u32 %v262_v35, %v260_v31  ;;  %v475_v51 = vrot.slane %v2417_v18, 1  ;;  %v2320_v30 = vld [vmem:[%s2393_s22 + $0x2c] ss:$0 sps:$4 sm:$0x11]   ;;  %s2296_s13 = smul.u32 20, %s2872_s16 }
  0x17   : > { %v285_v28 = vsel %vm241_vm2, %v280_v25, %v284_v21  ;;  %v272_v42 = vor.u32 %v270_v41, %v268_v39  ;;  %v472_v46 = vrot.slane %v1942_v45, 1  ;;  %v1949_v55 = vcombine.low %v584_v52, %v2488_v53  ;;  %v1974_v25 = vld [vmem:[%s2867_s1 + $0x18] sm:$0xf] }
  0x18   : > { %v253_v26 = vsel %vm241_vm2, %v248_v20, %v252_v15  ;;  %2094 = vmatmul.mubr.msk.bf16.vlgmr.msra.gmra.mxu1 %vm286_vm3, %v285_v28  ;;  %v269_v40 = vsel %vm241_vm2, %v264_v38, %v268_v39  ;;  %v476_v54 = vsel %vm471_vm4, %v473_v47, %v475_v51  ;;  %v477_v57 = vrot.slane %v2433_v32, 1  ;;  %s2727_s18 = scalar_lea.vmem %s2870_s4, %s2296_s13 }
  0x19   : > { %2078 = vmatmul.mubr.msk.bf16.vlgmr.msra.gmra.mxu0 %vm286_vm3, %v253_v26  ;;  %2098 = vmatpush3.bf16.msra.mxu1 %v390_v27  ;;  %v277_v44 = vsel %vm241_vm2, %v272_v42, %v276_v19  ;;  %v474_v49 = vsel %vm471_vm4, %v472_v46, %v473_v47  ;;  %v625_v58 = vrot.slane %v1949_v55, 1  ;;  %v626_v59 = vrot.slane %v2494_v56, 1  ;;  %v2541_v19 = vld [vmem:[%s2393_s22 + $0x24] sm:$0xff]   ;;  %v1986_v47 = vld [vmem:[%s2867_s1 + $0x1c] sm:$0xf] }
  0x1a   : > { %2081 = vmatprep.mubr.msk.bf16.mxu0 %vm2340_vm1, %v2339_v1  ;;  %2099 = vmatprep.mubr.msk.bf16.mxu1 %vm2340_vm1, %v2339_v1  ;;  %v478_v61 = vsel %vm471_vm4, %v475_v51, %v477_v57  ;;  %v932_v0 = vsel %vm302_vm0, %v1967_v60, 0  ;;  %v479_v2 = vrot.slane %v2404_v7, 1  ;;  %v628_v3 = vrot.slane %v2511_v63, 1  ;;  %v2322_v51 = vld [vmem:[%s2393_s22 + $0x2c] ss:$0 sps:$4 sm:$0x33]  }
  0x1b   : > { %2120 = vmatpush3.bf16.msra.mxu0 %v499_v29  ;;  %2141 = vmatprep.subr.bf16.mxu1 %v2339_v1  ;;  %v627_v62 = vsel %vm471_vm4, %v625_v58, %v626_v59  ;;  %v481_v8 = vrot.slane %v2408_v11, 1  ;;  %v748_v9 = vshll.u32 %v1949_v55, 16  ;;  %v753_v10 = vshrl.u32 %v2494_v56, 16 }
  0x1c   : > { %2163 = vmatprep.subr.bf16.mxu0 %v2339_v1  ;;  %v480_v4 = vsel %vm471_vm4, %v477_v57, %v479_v2  ;;  %v756_v12 = vshll.u32 %v2494_v56, 16  ;;  %v762_v22 = vshrl.u32 %v2511_v63, 16  ;;  %v765_v23 = vshll.u32 %v2511_v63, 16 }
  0x1d   : > { %v482_v14 = vsel %vm471_vm4, %v479_v2, %v481_v8  ;;  %v750_v11 = vrot.slane %v748_v9, 2  ;;  %v755_v16 = vrot.slane %v753_v10, 1  ;;  %v632_v24 = vrot.slane %v2541_v19, 1  ;;  %v2607_v2 = vld [vmem:[%s2393_s22 + $0xc] sm:$0xf] }
  0x1e   : > { %v758_v17 = vrot.slane %v756_v12, 2  ;;  %vm743_vm5 = vsmask.f32 6400  ;;  %v764_v27 = vrot.slane %v762_v22, 1  ;;  %v767_v28 = vrot.slane %v765_v23, 2  ;;  %v2644_v23 = vld [vmem:[%s2393_s22 + $0x20] sm:$0xff]  }
  0x1f   : > { %v1085_v31 = vsel %vm302_vm0, %v1974_v25, 0  ;;  %v634_v35 = vrot.slane %v2320_v30, 1  ;;  %v1968_v41 = vcombine.low %v898_v36, %v2488_v53  ;;  %v780_v43 = vshrl.u32 %v2541_v19, 16  ;;  %v1993_v10 = vld [vmem:[%s2867_s1 + $0x20] sm:$0xf] }
  0x20   : > { %2100 = vmatmul.mubr.msk.bf16.vlgmr.msra.gmra.mxu1 %vm286_vm3, %v1925_v5  ;;  %v629_v5 = vsel %vm471_vm4, %v626_v59, %v628_v3  ;;  %v759_v21 = vor.u32 %v758_v17, %v755_v16  ;;  %v906_v46 = vrot.slane %v2494_v56, 2  ;;  %v1246_v53 = vsel %vm302_vm0, %v1986_v47, 0 }
  0x21   : > { %2082 = vmatmul.mubr.msk.bf16.gmra.mxu0 %vm286_vm3, %v261_v34  ;;  %2103 = vmatprep.mubr.msk.bf16.mxu1 %vm2340_vm1, %v2339_v1  ;;  %v905_v45 = vrot.slane %v1968_v41, 2  ;;  %v792_v56 = vshll.u32 %v2322_v51, 16  ;;  %v908_v57 = vrot.slane %v2511_v63, 2  ;;  %v912_v9 = vrot.slane %v2541_v19, 2 }
  0x22   : > { %2085 = vmatprep.mubr.msk.bf16.mxu0 %vm2340_vm1, %v2339_v1  ;;  %2142 = vmatpush3.bf16.msra.mxu1 %v652_v37  ;;  %vm1176_vm7 = vsmask.f32 5376  ;;  %v1207_v41 = vshll.u32 %v2644_v23, 16  ;;  %vm1337_vm8 = vcmask 1044480   ;;  %vm1478_vm9 = vcmask 125952  }
  0x23   : > { %2185 = vmatprep.subr.bf16.mxu1 %v2339_v1  ;;  %v907_v52 = vsel %vm904_vm6, %v905_v45, %v906_v46  ;;  %v794_v60 = vrot.slane %v792_v56, 2  ;;  %vm1483_vm10 = vcmask 124928   ;;  %vm1589_vm11 = vcmask 1042432  }
  0x24   : > { %vm1576_vm12 = vcmask 123904   ;;  %vm1672_vm13 = vcmask 125955   ;;  %vm1674_vm14 = vcmask 122880   ;;  %vm1767_vm15 = vcmask 125954  }
  0x28   : > { %2104 = vmatmul.mubr.msk.bf16.gmra.mxu1 %vm286_vm3, %v2401_v6  ;;  %v2526_v6 = vld [vmem:[%s2393_s22 + $0x1c] sm:$0xff]  }
  0x29   : > { %2086 = vmatmul.mubr.msk.bf16.gmra.mxu0 %vm286_vm3, %v269_v40  ;;  %2107 = vmatprep.mubr.msk.bf16.mxu1 %vm2340_vm1, %v2339_v1  ;;  %v630_v13 = vrot.slane %v2526_v6, 1  ;;  %v771_v33 = vshrl.u32 %v2526_v6, 16  ;;  %v774_v34 = vshll.u32 %v2526_v6, 16  ;;  %v635_v40 = vsel %vm471_vm4, %v632_v24, %v634_v35 }
  0x2a   : > { %2089 = vmatprep.mubr.msk.bf16.mxu0 %vm2340_vm1, %v2339_v1  ;;  %v910_v63 = vrot.slane %v2526_v6, 2 }
  0x2b   : > { %v633_v29 = vsel %vm471_vm4, %v630_v13, %v632_v24  ;;  %v773_v38 = vrot.slane %v771_v33, 1  ;;  %v776_v39 = vrot.slane %v774_v34, 2  ;;  %v2657_v34 = vld [vmem:[%s2393_s22 + $0x28] sm:$0xff]  }
  0x2c   : > { %v911_v8 = vsel %vm904_vm6, %v908_v57, %v910_v63 }
  0x2d   : > { %v777_v42 = vor.u32 %v776_v39, %v773_v38  ;;  %v1065_v38 = vrot.slane %v2657_v34, 2 }
  0x30   : > { %2108 = vmatmul.mubr.msk.bf16.gmra.mxu1 %vm286_vm3, %v2417_v18  ;;  %v631_v18 = vsel %vm471_vm4, %v628_v3, %v630_v13  ;;  %v2628_v13 = vld [vmem:[%s2393_s22 + $0x18] sm:$0xff]  }
  0x31   : > { %2090 = vmatmul.mubr.msk.bf16.gmra.mxu0 %vm286_vm3, %v277_v44  ;;  %2111 = vmatprep.mubr.msk.bf16.mxu1 %vm2340_vm1, %v2339_v1  ;;  %v783_v44 = vshll.u32 %v2541_v19, 16  ;;  %v1061_v16 = vrot.slane %v2628_v13, 2 }
  0x32   : > { %2121 = vmatprep.mubr.msk.bf16.mxu0 %vm2340_vm1, %v2339_v1 }
  0x38   : > { %2112 = vmatmul.mubr.msk.bf16.gmra.mxu1 %vm286_vm3, %v2433_v32  ;;  %v768_v32 = vor.u32 %v767_v28, %v764_v27  ;;  %v1063_v28 = vrot.slane %v2644_v23, 2 }
  0x39   : > { %2122 = vmatmul.mubr.msk.bf16.vlgmr.msra.gmra.mxu0 %vm286_vm3, %v474_v49  ;;  %2115 = vmatprep.mubr.msk.bf16.mxu1 %vm2340_vm1, %v2339_v1  ;;  %v782_v49 = vrot.slane %v780_v43, 1  ;;  %v2328_v43 = vld [vmem:[%s2393_s22 + $0x30] ss:$0 sps:$4 sm:$0x33]  }
  0x3a   : > { %2125 = vmatprep.mubr.msk.bf16.mxu0 %vm2340_vm1, %v2339_v1  ;;  %2164 = vmatpush3.bf16.msra.mxu0 %v813_v50  ;;  %v769_v37 = vsel %vm743_vm5, %v759_v21, %v768_v32  ;;  %v778_v48 = vsel %vm743_vm5, %v768_v32, %v777_v42  ;;  %v785_v50 = vrot.slane %v783_v44, 2  ;;  %v1198_v32 = vshll.u32 %v2628_v13, 16 }
  0x3b   : > { %2207 = vmatprep.subr.bf16.mxu0 %v2339_v1  ;;  %v1064_v33 = vsel %vm904_vm6, %v1061_v16, %v1063_v28  ;;  %v1067_v47 = vrot.slane %v2328_v43, 2 }
  0x40   : > { %2116 = vmatmul.mubr.msk.bf16.gmra.mxu1 %vm286_vm3, %v2404_v7  ;;  %v745_v7 = vshrl.u32 %v1949_v55, 16  ;;  %v789_v55 = vshrl.u32 %v2322_v51, 16 }
  0x41   : > { %2126 = vmatmul.mubr.msk.bf16.gmra.mxu0 %vm286_vm3, %v476_v54  ;;  %2143 = vmatprep.mubr.msk.bf16.mxu1 %vm2340_vm1, %v2339_v1  ;;  %v786_v54 = vor.u32 %v785_v50, %v782_v49  ;;  %v1213_v49 = vshrl.u32 %v2657_v34, 16  ;;  %v1216_v50 = vshll.u32 %v2657_v34, 16 }
  0x42   : > { %2129 = vmatprep.mubr.msk.bf16.mxu0 %vm2340_vm1, %v2339_v1  ;;  %v747_v15 = vrot.slane %v745_v7, 1  ;;  %v791_v59 = vrot.slane %v789_v55, 1 }
  0x43   : > { %v787_v58 = vsel %vm743_vm5, %v777_v42, %v786_v54  ;;  %v1066_v42 = vsel %vm904_vm6, %v1063_v28, %v1065_v38  ;;  %v1215_v55 = vrot.slane %v1213_v49, 2  ;;  %v1218_v56 = vrot.slane %v1216_v50, 3 }
  0x44   : > { %v751_v20 = vor.u32 %v750_v11, %v747_v15  ;;  %v1365_v15 = vsel %vm302_vm0, %v1993_v10, 0  ;;  %v914_v11 = vrot.slane %v2322_v51, 2  ;;  %v1331_v51 = vld [vmem:[%s2393_s22 + $0x8] sm:$0x8]  ;;  %v1345_v10 = vrot.slane %v2657_v34, 3 }
  0x45   : > { %vm1860_vm0 = vcmask 124929  }
  0x46   : > { %v760_v26 = vsel %vm743_vm5, %v751_v20, %v759_v21  ;;  %v915_v21 = vsel %vm904_vm6, %v912_v9, %v914_v11 }
  0x48   : > { %2144 = vmatmul.mubr.msk.bf16.vlgmr.msra.gmra.mxu1 %vm286_vm3, %v627_v62  ;;  %v795_v62 = vor.u32 %v794_v60, %v791_v59  ;;  %v1219_v60 = vor.u32 %v1218_v56, %v1215_v55 }
  0x49   : > { %2130 = vmatmul.mubr.msk.bf16.gmra.mxu0 %vm286_vm3, %v478_v61  ;;  %2147 = vmatprep.mubr.msk.bf16.mxu1 %vm2340_vm1, %v2339_v1  ;;  %v909_v61 = vsel %vm904_vm6, %v906_v46, %v908_v57  ;;  %v1209_v46 = vrot.slane %v1207_v41, 3  ;;  %v2330_v57 = vld [vmem:[%s2393_s22 + $0x30] ss:$0 sps:$4 sm:$0x77]  }
  0x4a   : > { %2133 = vmatprep.mubr.msk.bf16.mxu0 %vm2340_vm1, %v2339_v1  ;;  %2186 = vmatpush3.bf16.msra.mxu1 %v932_v0  ;;  %v1017_v0 = vld [vmem:[%s2393_s22 + $0x8] sm:$0xc]  ;;  %v796_v3 = vsel %vm743_vm5, %v786_v54, %v795_v62  ;;  %v1225_v62 = vshll.u32 %v2330_v57, 16 }
  0x4b   : > { %2229 = vmatprep.subr.bf16.mxu1 %v2339_v1 }
  0x50   : > { %2148 = vmatmul.mubr.msk.bf16.gmra.mxu1 %vm286_vm3, %v629_v5  ;;  %v2612_v5 = vld [vmem:[%s2393_s22 + $0x10] sm:$0xff]  }
  0x51   : > { %2134 = vmatmul.mubr.msk.bf16.gmra.mxu0 %vm286_vm3, %v480_v4  ;;  %2151 = vmatprep.mubr.msk.bf16.mxu1 %vm2340_vm1, %v2339_v1  ;;  %v1975_v4 = vcombine.low %v1017_v0, %v2607_v2  ;;  %v1059_v7 = vrot.slane %v2612_v5, 2  ;;  %v1186_v19 = vshrl.u32 %v2612_v5, 16  ;;  %v1189_v20 = vshll.u32 %v2612_v5, 16 }
  0x52   : > { %2137 = vmatprep.mubr.msk.bf16.mxu0 %vm2340_vm1, %v2339_v1  ;;  %v1339_v59 = vrot.slane %v2612_v5, 3 }
  0x53   : > { %v1058_v6 = vrot.slane %v1975_v4, 2  ;;  %v1178_v17 = vshrl.u32 %v1975_v4, 16  ;;  %v1062_v22 = vsel %vm904_vm6, %v1059_v7, %v1061_v16  ;;  %v1191_v27 = vrot.slane %v1189_v20, 3 }
  0x55   : > { %v1060_v12 = vsel %vm904_vm6, %v1058_v6, %v1059_v7  ;;  %v1180_v24 = vrot.slane %v1178_v17, 2  ;;  %v1343_v7 = vrot.slane %v2644_v23, 3 }
  0x58   : > { %2152 = vmatmul.mubr.msk.bf16.gmra.mxu1 %vm286_vm3, %v631_v18  ;;  %v1181_v18 = vshll.u32 %v1975_v4, 16  ;;  %v1341_v4 = vrot.slane %v2628_v13, 3 }
  0x59   : > { %2138 = vmatmul.mubr.msk.bf16.gmra.mxu0 %vm286_vm3, %v482_v14  ;;  %2155 = vmatprep.mubr.msk.bf16.mxu1 %vm2340_vm1, %v2339_v1  ;;  %v913_v14 = vsel %vm904_vm6, %v910_v63, %v912_v9 }
  0x5a   : > { %2165 = vmatprep.mubr.msk.bf16.mxu0 %vm2340_vm1, %v2339_v1  ;;  %v1183_v25 = vrot.slane %v1181_v18, 3  ;;  %v1344_v9 = vsel %vm1337_vm8, %v1341_v4, %v1343_v7 }
  0x60   : > { %2156 = vmatmul.mubr.msk.bf16.gmra.mxu1 %vm286_vm3, %v633_v29  ;;  %v1184_v29 = vor.u32 %v1183_v25, %v1180_v24 }
  0x61   : > { %2166 = vmatmul.mubr.msk.bf16.vlgmr.msra.gmra.mxu0 %vm286_vm3, %v760_v26  ;;  %2159 = vmatprep.mubr.msk.bf16.mxu1 %vm2340_vm1, %v2339_v1  ;;  %v1188_v26 = vrot.slane %v1186_v19, 2 }
  0x62   : > { %2169 = vmatprep.mubr.msk.bf16.mxu0 %vm2340_vm1, %v2339_v1  ;;  %2208 = vmatpush3.bf16.msra.mxu0 %v1085_v31  ;;  %v1195_v31 = vshrl.u32 %v2628_v13, 16  ;;  %v1347_v13 = vrot.slane %v2330_v57, 3 }
  0x63   : > { %2251 = vmatprep.subr.bf16.mxu0 %v2339_v1  ;;  %v1192_v30 = vor.u32 %v1191_v27, %v1188_v26 }
  0x64   : > { %v1197_v36 = vrot.slane %v1195_v31, 2 }
  0x65   : > { %v1193_v35 = vsel %vm1176_vm7, %v1184_v29, %v1192_v30 }
  0x68   : > { %2160 = vmatmul.mubr.msk.bf16.gmra.mxu1 %vm286_vm3, %v635_v40  ;;  %v1204_v40 = vshrl.u32 %v2644_v23, 16 }
  0x69   : > { %2170 = vmatmul.mubr.msk.bf16.gmra.mxu0 %vm286_vm3, %v769_v37  ;;  %2187 = vmatprep.mubr.msk.bf16.mxu1 %vm2340_vm1, %v2339_v1  ;;  %v1200_v37 = vrot.slane %v1198_v32, 3 }
  0x6a   : > { %2173 = vmatprep.mubr.msk.bf16.mxu0 %vm2340_vm1, %v2339_v1  ;;  %v1206_v45 = vrot.slane %v1204_v40, 2 }
  0x6b   : > { %v1201_v39 = vor.u32 %v1200_v37, %v1197_v36 }
  0x6d   : > { %v1202_v44 = vsel %vm1176_vm7, %v1192_v30, %v1201_v39 }
  0x70   : > { %2188 = vmatmul.mubr.msk.bf16.vlgmr.msra.gmra.mxu1 %vm286_vm3, %v907_v52  ;;  %v1068_v52 = vsel %vm904_vm6, %v1065_v38, %v1067_v47 }
  0x71   : > { %2174 = vmatmul.mubr.msk.bf16.gmra.mxu0 %vm286_vm3, %v778_v48  ;;  %2191 = vmatprep.mubr.msk.bf16.mxu1 %vm2340_vm1, %v2339_v1  ;;  %v1210_v48 = vor.u32 %v1209_v46, %v1206_v45 }
  0x72   : > { %2177 = vmatprep.mubr.msk.bf16.mxu0 %vm2340_vm1, %v2339_v1  ;;  %2230 = vmatpush3.bf16.msra.mxu1 %v1246_v53  ;;  %v1994_v53 = vcombine.low %v1331_v51, %v2607_v2 }
  0x73   : > { %2273 = vmatprep.subr.mxu1 %v2339_v1  ;;  %v1211_v54 = vsel %vm1176_vm7, %v1201_v39, %v1210_v48  ;;  %v1220_v0 = vsel %vm1176_vm7, %v1210_v48, %v1219_v60 }
  0x78   : > { %2192 = vmatmul.mubr.msk.bf16.gmra.mxu1 %vm286_vm3, %v909_v61  ;;  %v1222_v61 = vshrl.u32 %v2330_v57, 16 }
  0x79   : > { %2178 = vmatmul.mubr.msk.bf16.gmra.mxu0 %vm286_vm3, %v787_v58  ;;  %2195 = vmatprep.mubr.msk.bf16.mxu1 %vm2340_vm1, %v2339_v1  ;;  %v1338_v58 = vrot.slane %v1994_v53, 3 }
  0x7a   : > { %2181 = vmatprep.mubr.msk.bf16.mxu0 %vm2340_vm1, %v2339_v1  ;;  %v1224_v2 = vrot.slane %v1222_v61, 2 }
  0x7b   : > { %v1340_v63 = vsel %vm1337_vm8, %v1338_v58, %v1339_v59 }
  0x80   : > { %2196 = vmatmul.mubr.msk.bf16.gmra.mxu1 %vm286_vm3, %v911_v8  ;;  %v1342_v8 = vsel %vm1337_vm8, %v1339_v59, %v1341_v4 }
  0x81   : > { %2182 = vmatmul.mubr.msk.bf16.gmra.mxu0 %vm286_vm3, %v796_v3  ;;  %2199 = vmatprep.mubr.msk.bf16.mxu1 %vm2340_vm1, %v2339_v1  ;;  %v1227_v3 = vrot.slane %v1225_v62, 3 }
  0x82   : > { %2209 = vmatprep.mubr.msk.bf16.mxu0 %vm2340_vm1, %v2339_v1 }
  0x83   : > { %v1228_v5 = vor.u32 %v1227_v3, %v1224_v2 }
  0x85   : > { %v1229_v6 = vsel %vm1176_vm7, %v1219_v60, %v1228_v5 }
  0x88   : > { %2200 = vmatmul.mubr.msk.bf16.gmra.mxu1 %vm286_vm3, %v913_v14  ;;  %v1348_v14 = vsel %vm1337_vm8, %v1345_v10, %v1347_v13 }
  0x89   : > { %2210 = vmatmul.mubr.msk.bf16.vlgmr.msra.gmra.mxu0 %vm286_vm3, %v1060_v12  ;;  %2203 = vmatprep.mubr.msk.bf16.mxu1 %vm2340_vm1, %v2339_v1  ;;  %v1346_v12 = vsel %vm1337_vm8, %v1343_v7, %v1345_v10 }
  0x8a   : > { %2213 = vmatprep.mubr.msk.bf16.mxu0 %vm2340_vm1, %v2339_v1  ;;  %2252 = vmatpush3.bf16.msra.mxu0 %v1365_v15 }
  0x90   : > { %2204 = vmatmul.mubr.msk.bf16.gmra.mxu1 %vm286_vm3, %v915_v21 }
  0x91   : > { %2214 = vmatmul.mubr.msk.bf16.gmra.mxu0 %vm286_vm3, %v1062_v22  ;;  %2231 = vmatprep.mubr.msk.bf16.mxu1 %vm2340_vm1, %v2339_v1 }
  0x92   : > { %2217 = vmatprep.mubr.msk.bf16.mxu0 %vm2340_vm1, %v2339_v1 }
  0x98   : > { %2232 = vmatmul.mubr.msk.bf16.vlgmr.msra.gmra.mxu1 %vm286_vm3, %v1193_v35 }
  0x99   : > { %2218 = vmatmul.mubr.msk.bf16.gmra.mxu0 %vm286_vm3, %v1064_v33  ;;  %2235 = vmatprep.mubr.msk.bf16.mxu1 %vm2340_vm1, %v2339_v1 }
  0x9a   : > { %2221 = vmatprep.mubr.msk.bf16.mxu0 %vm2340_vm1, %v2339_v1 }
  0xa0   : > { %2236 = vmatmul.mubr.msk.bf16.gmra.mxu1 %vm286_vm3, %v1202_v44 }
  0xa1   : > { %2222 = vmatmul.mubr.msk.bf16.gmra.mxu0 %vm286_vm3, %v1066_v42  ;;  %2239 = vmatprep.mubr.msk.bf16.mxu1 %vm2340_vm1, %v2339_v1 }
  0xa2   : > { %2225 = vmatprep.mubr.msk.bf16.mxu0 %vm2340_vm1, %v2339_v1 }
  0xa8   : > { %2240 = vmatmul.mubr.msk.bf16.gmra.mxu1 %vm286_vm3, %v1211_v54 }
  0xa9   : > { %2226 = vmatmul.mubr.msk.bf16.gmra.mxu0 %vm286_vm3, %v1068_v52  ;;  %2243 = vmatprep.mubr.msk.bf16.mxu1 %vm2340_vm1, %v2339_v1 }
  0xaa   : > { %2253 = vmatprep.mubr.msk.bf16.mxu0 %vm2340_vm1, %v2339_v1 }
  0xb0   : > { %2244 = vmatmul.mubr.msk.bf16.gmra.mxu1 %vm286_vm3, %v1220_v0 }
  0xb1   : > { %2254 = vmatmul.mubr.msk.bf16.vlgmr.msra.gmra.mxu0 %vm286_vm3, %v1340_v63  ;;  %2247 = vmatprep.mubr.msk.bf16.mxu1 %vm2340_vm1, %v2339_v1 }
  0xb2   : > { %2257 = vmatprep.mubr.msk.bf16.mxu0 %vm2340_vm1, %v2339_v1 }
  0xb8   : > { %2248 = vmatmul.mubr.msk.bf16.gmra.mxu1 %vm286_vm3, %v1229_v6 }
  0xb9   : > { %2258 = vmatmul.mubr.msk.bf16.gmra.mxu0 %vm286_vm3, %v1342_v8  ;;  %2275 = vmatprep.mubr.msk.f32.mxu1 %vm2340_vm1, %v2339_v1 }
  0xba   : > { %2261 = vmatprep.mubr.msk.bf16.mxu0 %vm2340_vm1, %v2339_v1 }
  0xc1   : > { %2262 = vmatmul.mubr.msk.bf16.gmra.mxu0 %vm286_vm3, %v1344_v9 }
  0xc2   : > { %2265 = vmatprep.mubr.msk.bf16.mxu0 %vm2340_vm1, %v2339_v1 }
  0xc9   : > { %2266 = vmatmul.mubr.msk.bf16.gmra.mxu0 %vm286_vm3, %v1346_v12 }
  0xca   : > { %2269 = vmatprep.mubr.msk.bf16.mxu0 %vm2340_vm1, %v2339_v1 }
  0xd1   : > { %2270 = vmatmul.mubr.msk.bf16.gmra.mxu0 %vm286_vm3, %v1348_v14 }
  0xd8   : > { %v372_v11 = vpop.f32.mrf.mxu1 }
  0xd9   : > { %v340_v15 = vpop.f32.mrf.mxu0 }
  0xda   : > { %v2095_v17 = vpop.f32.mrf.mxu1 }
  0xdb   : > { %v2079_v16 = vpop.f32.mrf.mxu0 }
  0xdc   : > { %v375_v19 = vpop.f32.mrf.mxu1 }
  0xdd   : > { %v343_v18 = vpop.f32.mrf.mxu0 }
  0xde   : > { %v2096_v21 = vpop.f32.mrf.mxu1 }
  0xdf   : > { %v2080_v20 = vpop.f32.mrf.mxu0 }
  0xe0   : > { %v426_v23 = vpop.f32.mrf.mxu1 }
  0xe1   : > { %v348_v22 = vpop.f32.mrf.mxu0  ;;  %v427_v24 = vadd.f32 %v426_v23, %v340_v15 }
  0xe2   : > { %v2101_v26 = vpop.f32.mrf.mxu1 }
  0xe3   : > { %v2083_v25 = vpop.f32.mrf.mxu0 }
  0xe4   : > { %v429_v28 = vpop.f32.mrf.mxu1 }
  0xe5   : > { %v351_v27 = vpop.f32.mrf.mxu0  ;;  %v430_v29 = vadd.f32 %v429_v28, %v343_v18 }
  0xe6   : > { %v2102_v31 = vpop.f32.mrf.mxu1 }
  0xe7   : > { %v2084_v30 = vpop.f32.mrf.mxu0 }
  0xe8   : > { %v434_v33 = vpop.f32.mrf.mxu1 }
  0xe9   : > { %v356_v32 = vpop.f32.mrf.mxu0  ;;  %v435_v34 = vadd.f32 %v434_v33, %v348_v22 }
  0xea   : > { %v2105_v36 = vpop.f32.mrf.mxu1 }
  0xeb   : > { %v2087_v35 = vpop.f32.mrf.mxu0 }
  0xec   : > { %v437_v38 = vpop.f32.mrf.mxu1 }
  0xed   : > { %v359_v37 = vpop.f32.mrf.mxu0  ;;  %v438_v39 = vadd.f32 %v437_v38, %v351_v27 }
  0xee   : > { %v2106_v41 = vpop.f32.mrf.mxu1 }
  0xef   : > { %v2088_v40 = vpop.f32.mrf.mxu0 }
  0xf0   : > { %v442_v43 = vpop.f32.mrf.mxu1 }
  0xf1   : > { %v364_v42 = vpop.f32.mrf.mxu0  ;;  %v443_v44 = vadd.f32 %v442_v43, %v356_v32 }
  0xf2   : > { %v2109_v46 = vpop.f32.mrf.mxu1 }
  0xf3   : > { %v2091_v45 = vpop.f32.mrf.mxu0 }
  0xf4   : > { %v445_v48 = vpop.f32.mrf.mxu1 }
  0xf5   : > { %v367_v47 = vpop.f32.mrf.mxu0  ;;  %v446_v49 = vadd.f32 %v445_v48, %v359_v37 }
  0xf6   : > { %v2110_v51 = vpop.f32.mrf.mxu1 }
  0xf7   : > { %v2092_v50 = vpop.f32.mrf.mxu0 }
  0xf8   : > { %v450_v53 = vpop.f32.mrf.mxu1 }
  0xf9   : > { %v535_v52 = vpop.f32.mrf.mxu0  ;;  %v451_v55 = vadd.f32 %v450_v53, %v364_v42 }
  0xfa   : > { %v574_v54 = vadd.f32 %v535_v52, %v427_v24  ;;  %v2113_v57 = vpop.f32.mrf.mxu1 }
  0xfb   : > { %v2123_v56 = vpop.f32.mrf.mxu0 }
  0xfc   : > { %v453_v59 = vpop.f32.mrf.mxu1 }
  0xfd   : > { %v538_v58 = vpop.f32.mrf.mxu0  ;;  %v454_v61 = vadd.f32 %v453_v59, %v367_v47 }
  0xfe   : > { %v575_v60 = vadd.f32 %v538_v58, %v430_v29  ;;  %v2114_v63 = vpop.f32.mrf.mxu1 }
  0xff   : > { %v2124_v62 = vpop.f32.mrf.mxu0 }
 0x100   : > { %v458_v2 = vpop.f32.mrf.mxu1 }
 0x101   : > { %v543_v0 = vpop.f32.mrf.mxu0  ;;  %v459_v4 = vadd.f32 %v458_v2, %v372_v11 }
 0x102   : > { %v576_v3 = vadd.f32 %v543_v0, %v435_v34  ;;  %v2117_v8 = vpop.f32.mrf.mxu1 }
 0x103   : > { %v2127_v5 = vpop.f32.mrf.mxu0 }
 0x104   : > { %v461_v7 = vpop.f32.mrf.mxu1 }
 0x105   : > { %v546_v6 = vpop.f32.mrf.mxu0  ;;  %v462_v10 = vadd.f32 %v461_v7, %v375_v19 }
 0x106   : > { %v577_v9 = vadd.f32 %v546_v6, %v438_v39  ;;  %v2118_v13 = vpop.f32.mrf.mxu1 }
 0x107   : > { %v2128_v12 = vpop.f32.mrf.mxu0 }
 0x108   : > { %v688_v16 = vpop.f32.mrf.mxu1 }
 0x109   : > { %v551_v14 = vpop.f32.mrf.mxu0  ;;  %v727_v17 = vadd.f32 %v688_v16, %v574_v54 }
 0x10a   : > { %v578_v15 = vadd.f32 %v551_v14, %v443_v44  ;;  %v2145_v20 = vpop.f32.mrf.mxu1 }
 0x10b   : > { %v2131_v18 = vpop.f32.mrf.mxu0 }
 0x10c   : > { %v691_v23 = vpop.f32.mrf.mxu1 }
 0x10d   : > { %v554_v21 = vpop.f32.mrf.mxu0  ;;  %v728_v24 = vadd.f32 %v691_v23, %v575_v60 }
 0x10e   : > { %v579_v22 = vadd.f32 %v554_v21, %v446_v49  ;;  %v2146_v11 = vpop.f32.mrf.mxu1 }
 0x10f   : > { %v2132_v25 = vpop.f32.mrf.mxu0 }
 0x110   : > { %v696_v28 = vpop.f32.mrf.mxu1 }
 0x111   : > { %v559_v26 = vpop.f32.mrf.mxu0  ;;  %v729_v29 = vadd.f32 %v696_v28, %v576_v3 }
 0x112   : > { %v580_v27 = vadd.f32 %v559_v26, %v451_v55  ;;  %v2149_v19 = vpop.f32.mrf.mxu1 }
 0x113   : > { %v2135_v30 = vpop.f32.mrf.mxu0 }
 0x114   : > { %v699_v33 = vpop.f32.mrf.mxu1 }
 0x115   : > { %v562_v31 = vpop.f32.mrf.mxu0  ;;  %v730_v34 = vadd.f32 %v699_v33, %v577_v9 }
 0x116   : > { %v581_v32 = vadd.f32 %v562_v31, %v454_v61  ;;  %v2150_v36 = vpop.f32.mrf.mxu1  ;;  %v2341_v61 = vmov 0  }
 0x117   : > { %v2136_v35 = vpop.f32.mrf.mxu0  ;;  %1479 = vst.msk [vmem:[%s2727_s18] sm:$0xf] %vm1478_vm9, %v2341_v61  ;;  %1480 = vst.msk [vmem:[%s2727_s18 + $0x4] sm:$0xf] %vm1478_vm9, %v2341_v61 }
 0x118   : > { %v704_v39 = vpop.f32.mrf.mxu1  ;;  %1484 = vst.msk [vmem:[%s2727_s18 + $0x10] sm:$0x7] %vm1483_vm10, %v2341_v61 }
 0x119   : > { %v567_v37 = vpop.f32.mrf.mxu0  ;;  %v731_v40 = vadd.f32 %v704_v39, %v578_v15  ;;  %1481 = vst.msk [vmem:[%s2727_s18 + $0x8] sm:$0xf] %vm1478_vm9, %v2341_v61  ;;  %1482 = vst.msk [vmem:[%s2727_s18 + $0xc] sm:$0xf] %vm1478_vm9, %v2341_v61 }
 0x11a   : > { %v582_v38 = vadd.f32 %v567_v37, %v459_v4  ;;  %v2153_v42 = vpop.f32.mrf.mxu1 }
 0x11b   : > { %v2139_v41 = vpop.f32.mrf.mxu0 }
 0x11c   : > { %v707_v45 = vpop.f32.mrf.mxu1 }
 0x11d   : > { %v570_v43 = vpop.f32.mrf.mxu0  ;;  %v732_v46 = vadd.f32 %v707_v45, %v579_v22 }
 0x11e   : > { %v583_v44 = vadd.f32 %v570_v43, %v462_v10  ;;  %v2154_v48 = vpop.f32.mrf.mxu1 }
 0x11f   : > { %v2140_v47 = vpop.f32.mrf.mxu0 }
 0x120   : > { %v712_v50 = vpop.f32.mrf.mxu1 }
 0x121   : > { %v849_v49 = vpop.f32.mrf.mxu0  ;;  %v733_v52 = vadd.f32 %v712_v50, %v580_v27 }
 0x122   : > { %v888_v51 = vadd.f32 %v849_v49, %v727_v17  ;;  %v2157_v54 = vpop.f32.mrf.mxu1 }
 0x123   : > { %v2167_v53 = vpop.f32.mrf.mxu0 }
 0x124   : > { %v715_v56 = vpop.f32.mrf.mxu1 }
 0x125   : > { %v852_v55 = vpop.f32.mrf.mxu0  ;;  %v734_v58 = vadd.f32 %v715_v56, %v581_v32 }
 0x126   : > { %v2722_v57 = vadd.f32 %v852_v55, %v728_v24  ;;  %v2158_v60 = vpop.f32.mrf.mxu1 }
 0x127   : > { %v2168_v59 = vpop.f32.mrf.mxu0 }
 0x128   : > { %v720_v63 = vpop.f32.mrf.mxu1 }
 0x129   : > { %v857_v62 = vpop.f32.mrf.mxu0  ;;  %v735_v2 = vadd.f32 %v720_v63, %v582_v38 }
 0x12a   : > { %v2734_v0 = vadd.f32 %v857_v62, %v729_v29  ;;  %v2161_v4 = vpop.f32.mrf.mxu1 }
 0x12b   : > { %v2171_v3 = vpop.f32.mrf.mxu0 }
 0x12c   : > { %v723_v8 = vpop.f32.mrf.mxu1 }
 0x12d   : > { %v860_v5 = vpop.f32.mrf.mxu0  ;;  %v736_v7 = vadd.f32 %v723_v8, %v583_v44 }
 0x12e   : > { %v2736_v6 = vadd.f32 %v860_v5, %v730_v34  ;;  %v2162_v10 = vpop.f32.mrf.mxu1 }
 0x12f   : > { %v2172_v9 = vpop.f32.mrf.mxu0 }
 0x130   : > { %v968_v14 = vpop.f32.mrf.mxu1 }
 0x131   : > { %v865_v12 = vpop.f32.mrf.mxu0  ;;  %v2740_v15 = vadd.f32 %v968_v14, %v888_v51 }
 0x132   : > { %v2738_v13 = vadd.f32 %v865_v12, %v731_v40  ;;  %v2189_v17 = vpop.f32.mrf.mxu1 }
 0x133   : > { %v2175_v16 = vpop.f32.mrf.mxu0 }
 0x134   : > { %v2742_v21 = vpop.f32.mrf.mxu1 }
 0x135   : > { %v868_v18 = vpop.f32.mrf.mxu0 }
 0x136   : > { %v893_v20 = vadd.f32 %v868_v18, %v732_v46  ;;  %v2190_v23 = vpop.f32.mrf.mxu1 }
 0x137   : > { %v2176_v22 = vpop.f32.mrf.mxu0 }
 0x138   : > { %v2746_v11 = vpop.f32.mrf.mxu1 }
 0x139   : > { %v873_v24 = vpop.f32.mrf.mxu0 }
 0x13a   : > { %v2744_v25 = vadd.f32 %v873_v24, %v733_v52  ;;  %v2193_v27 = vpop.f32.mrf.mxu1 }
 0x13b   : > { %v2179_v26 = vpop.f32.mrf.mxu0 }
 0x13c   : > { %v2750_v30 = vpop.f32.mrf.mxu1 }
 0x13d   : > { %v876_v28 = vpop.f32.mrf.mxu0 }
 0x13e   : > { %v2748_v29 = vadd.f32 %v876_v28, %v734_v58  ;;  %v2194_v31 = vpop.f32.mrf.mxu1  ;;  %v1008_v28 = vadd.f32 %v2742_v21, %v2722_v57  ;;  %v2790_v57 = vld [vmem:[%s2868_s2] ss:$0 sm:$0xff] }
 0x13f   : > { %v2180_v19 = vpop.f32.mrf.mxu0 }
 0x140   : > { %v2754_v34 = vpop.f32.mrf.mxu1 }
 0x141   : > { %v881_v32 = vpop.f32.mrf.mxu0 }
 0x142   : > { %v2752_v33 = vadd.f32 %v881_v32, %v735_v2  ;;  %v2197_v36 = vpop.f32.mrf.mxu1 }
 0x143   : > { %v2183_v35 = vpop.f32.mrf.mxu0 }
 0x144   : > { %v987_v39 = vpop.f32.mrf.mxu1 }
 0x145   : > { %v884_v37 = vpop.f32.mrf.mxu0  ;;  %v2758_v40 = vadd.f32 %v987_v39, %v893_v20 }
 0x146   : > { %v2756_v38 = vadd.f32 %v884_v37, %v736_v7  ;;  %v2198_v42 = vpop.f32.mrf.mxu1  ;;  %v1009_v37 = vadd.f32 %v2746_v11, %v2734_v0 }
 0x147   : > { %v2184_v41 = vpop.f32.mrf.mxu0 }
 0x148   : > { %v2760_v44 = vpop.f32.mrf.mxu1 }
 0x149   : > { %v1121_v43 = vpop.f32.mrf.mxu0 }
 0x14a   : > { %v2201_v46 = vpop.f32.mrf.mxu1  ;;  %v1160_v42 = vadd.f32 %v1121_v43, %v2740_v15 }
 0x14b   : > { %v2211_v45 = vpop.f32.mrf.mxu0 }
 0x14c   : > { %v2762_v48 = vpop.f32.mrf.mxu1 }
 0x14d   : > { %v1124_v47 = vpop.f32.mrf.mxu0 }
 0x14e   : > { %v2202_v50 = vpop.f32.mrf.mxu1  ;;  %v1161_v32 = vadd.f32 %v1124_v47, %v1008_v28  ;;  %v1010_v47 = vadd.f32 %v2750_v30, %v2736_v6 }
 0x14f   : > { %v2212_v49 = vpop.f32.mrf.mxu0 }
 0x150   : > { %v2764_v52 = vpop.f32.mrf.mxu1 }
 0x151   : > { %v1129_v51 = vpop.f32.mrf.mxu0 }
 0x152   : > { %v2205_v54 = vpop.f32.mrf.mxu1  ;;  %v1162_v46 = vadd.f32 %v1129_v51, %v1009_v37 }
 0x153   : > { %v2215_v53 = vpop.f32.mrf.mxu0 }
 0x154   : > { %v2766_v56 = vpop.f32.mrf.mxu1 }
 0x155   : > { %v1132_v55 = vpop.f32.mrf.mxu0 }
 0x156   : > { %v2206_v59 = vpop.f32.mrf.mxu1  ;;  %v1163_v51 = vadd.f32 %v1132_v55, %v1010_v47 }
 0x157   : > { %v2216_v58 = vpop.f32.mrf.mxu0 }
 0x158   : > { %v1282_v61 = vpop.f32.mrf.mxu1 }
 0x159   : > { %v1137_v60 = vpop.f32.mrf.mxu0  ;;  %v1321_v53 = vadd.f32 %v1282_v61, %v1160_v42 }
 0x15a   : > { %v2233_v63 = vpop.f32.mrf.mxu1 }
 0x15b   : > { %v2219_v62 = vpop.f32.mrf.mxu0 }
 0x15c   : > { %v1285_v3 = vpop.f32.mrf.mxu1  ;;  %v1011_v62 = vadd.f32 %v2754_v34, %v2738_v13 }
 0x15d   : > { %v2768_v2 = vpop.f32.mrf.mxu0  ;;  %v1322_v39 = vadd.f32 %v1285_v3, %v1161_v32 }
 0x15e   : > { %v2234_v5 = vpop.f32.mrf.mxu1 }
 0x15f   : > { %v2220_v4 = vpop.f32.mrf.mxu0 }
 0x160   : > { %v1290_v7 = vpop.f32.mrf.mxu1 }
 0x161   : > { %v2770_v8 = vpop.f32.mrf.mxu0  ;;  %v1323_v0 = vadd.f32 %v1290_v7, %v1162_v46  ;;  %v1164_v7 = vadd.f32 %v1137_v60, %v1011_v62  ;;  %v1013_v60 = vadd.f32 %v2760_v44, %v2744_v25  ;;  %v1014_v25 = vadd.f32 %v2762_v48, %v2748_v29 }
 0x162   : > { %v2237_v10 = vpop.f32.mrf.mxu1 }
 0x163   : > { %v2223_v9 = vpop.f32.mrf.mxu0 }
 0x164   : > { %v1293_v14 = vpop.f32.mrf.mxu1 }
 0x165   : > { %v2772_v12 = vpop.f32.mrf.mxu0  ;;  %v1324_v63 = vadd.f32 %v1293_v14, %v1163_v51 }
 0x166   : > { %v2238_v17 = vpop.f32.mrf.mxu1 }
 0x167   : > { %v2224_v16 = vpop.f32.mrf.mxu0 }
 0x168   : > { %v1298_v20 = vpop.f32.mrf.mxu1 }
 0x169   : > { %v2774_v18 = vpop.f32.mrf.mxu0  ;;  %v1325_v17 = vadd.f32 %v1298_v20, %v1164_v7 }
 0x16a   : > { %v2241_v23 = vpop.f32.mrf.mxu1 }
 0x16b   : > { %v2227_v22 = vpop.f32.mrf.mxu0 }
 0x16c   : > { %v2778_v26 = vpop.f32.mrf.mxu1 }
 0x16d   : > { %v2776_v24 = vpop.f32.mrf.mxu0 }
 0x16e   : > { %v2242_v19 = vpop.f32.mrf.mxu1 }
 0x16f   : > { %v2228_v27 = vpop.f32.mrf.mxu0 }
 0x170   : > { %v1306_v35 = vpop.f32.mrf.mxu1 }
 0x171   : > { %v1401_v31 = vpop.f32.mrf.mxu0 }
 0x172   : > { %v2245_v41 = vpop.f32.mrf.mxu1  ;;  %v1440_v15 = vadd.f32 %v1401_v31, %v1321_v53 }
 0x173   : > { %v2255_v36 = vpop.f32.mrf.mxu0 }
 0x174   : > { %v2785_v49 = vpop.f32.mrf.mxu1  ;;  %v1457_v6 = vadd.f32 %v2790_v57, %v1440_v15 }
 0x175   : > { %v1404_v45 = vpop.f32.mrf.mxu0 }
 0x176   : > { %v1441_v50 = vadd.f32 %v1404_v45, %v1322_v39  ;;  %v2246_v54 = vpop.f32.mrf.mxu1  ;;  %v1467_v34 = vmax.f32 %v1457_v6, 0.0  ;;  %v1166_v45 = vadd.f32 %v2770_v8, %v1013_v60  ;;  %v1016_v6 = vadd.f32 %v2766_v56, %v2756_v38 }
 0x177   : > { %v2256_v21 = vpop.f32.mrf.mxu0  ;;  %v1167_v54 = vadd.f32 %v2772_v12, %v1014_v25 }
 0x178   : > { %v1458_v11 = vadd.f32 %v2790_v57, %v1441_v50  ;;  %v2795_v58 = vpop.f32.mrf.mxu1  ;;  %v2812_v50 = vld [vmem:[%s2869_s3] sm:$0xf]  ;;  %v1327_v44 = vadd.f32 %v1306_v35, %v1166_v45 }
 0x179   : > { %v1409_v43 = vpop.f32.mrf.mxu0 }
 0x17a   : > { %v1442_v59 = vadd.f32 %v1409_v43, %v1323_v0  ;;  %v1468_v3 = vmax.f32 %v1458_v11, 0.0  ;;  %v2249_v5 = vpop.f32.mrf.mxu1  ;;  %v1165_v11 = vadd.f32 %v2768_v2, %v2758_v40  ;;  %v1015_v40 = vadd.f32 %v2764_v52, %v2752_v33 }
 0x17b   : > { %v2259_v61 = vpop.f32.mrf.mxu0  ;;  %v1328_v2 = vadd.f32 %v2785_v49, %v1167_v54 }
 0x17c   : > { %v1459_v4 = vadd.f32 %v2790_v57, %v1442_v59  ;;  %v2801_v10 = vpop.f32.mrf.mxu1  ;;  %v1488_v22 = vrot.slane %v1468_v3, 2  ;;  %v1326_v29 = vadd.f32 %v2778_v26, %v1165_v11 }
 0x17d   : > { %v1412_v30 = vpop.f32.mrf.mxu0 }
 0x17e   : > { %v1469_v9 = vmax.f32 %v1459_v4, 0.0  ;;  %v1443_v55 = vadd.f32 %v1412_v30, %v1324_v63  ;;  %v2250_v13 = vpop.f32.mrf.mxu1 }
 0x17f   : > { %v2260_v16 = vpop.f32.mrf.mxu0 }
 0x180   : > { %v1489_v23 = vrot.slane %v1469_v9, 2  ;;  %v1460_v27 = vadd.f32 %v2790_v57, %v1443_v55 }
 0x181   : > { %v1417_v14 = vpop.f32.mrf.mxu0 }
 0x182   : > { %v1494_v28 = vadd.f32 %v1489_v23, %v1468_v3  ;;  %v1444_v19 = vadd.f32 %v1417_v14, %v1325_v17  ;;  %v1490_v31 = vsel %vm904_vm6, %v1488_v22, %v1489_v23  ;;  %v1470_v39 = vmax.f32 %v1460_v27, 0.0 }
 0x183   : > { %v2263_v32 = vpop.f32.mrf.mxu0  ;;  %v1493_v36 = vadd.f32 %v1490_v31, %v1467_v34  ;;  %v1168_v3 = vadd.f32 %v2774_v18, %v1015_v40  ;;  %v1169_v18 = vadd.f32 %v2776_v24, %v1016_v6 }
 0x184   : > { %v1499_v37 = vrot.slane %v1494_v28, 1  ;;  %v1461_v20 = vadd.f32 %v2790_v57, %v1444_v19  ;;  %v1580_v47 = vrot.slane %v1470_v39, 2 }
 0x185   : > { %v1420_v41 = vpop.f32.mrf.mxu0  ;;  %v1498_v42 = vrot.slane %v1493_v36, 1  ;;  %v1329_v30 = vadd.f32 %v2795_v58, %v1168_v3  ;;  %v1330_v56 = vadd.f32 %v2801_v10, %v1169_v18 }
 0x186   : > { %v1471_v46 = vmax.f32 %v1461_v20, 0.0  ;;  %v1445_v61 = vadd.f32 %v1420_v41, %v1326_v29 }
 0x187   : > { %v2264_v53 = vpop.f32.mrf.mxu0  ;;  %v1500_v21 = vsel %vm471_vm4, %v1498_v42, %v1499_v37 }
 0x188   : > { %v1581_v0 = vrot.slane %v1471_v46, 2  ;;  %2274 = vmatpush3.msra.mxu1 %v1500_v21  ;;  %v1462_v49 = vadd.f32 %v2790_v57, %v1445_v61 }
 0x189   : > { %v1425_v8 = vpop.f32.mrf.mxu0  ;;  %2278 = vmatprep.subr.mxu1 %v2339_v1  ;;  %2276 = vmatmul.mubr.msk.f32.vlgmr.msra.gmra.mxu1 %vm286_vm3, %v2812_v50 }
 0x18a   : > { %v1582_v15 = vsel %vm904_vm6, %v1580_v47, %v1581_v0  ;;  %v1586_v43 = vadd.f32 %v1581_v0, %v1470_v39  ;;  %v1446_v51 = vadd.f32 %v1425_v8, %v1327_v44  ;;  %2280 = vmatprep.mubr.msk.f32.mxu1 %vm2340_vm1, %v2339_v1  ;;  %v1472_v22 = vmax.f32 %v1462_v49, 0.0 }
 0x18b   : > { %v2267_v48 = vpop.f32.mrf.mxu0  ;;  %v1585_v35 = vadd.f32 %v1582_v15, %v1469_v9 }
 0x18c   : > { %v1591_v59 = vrot.slane %v1586_v43, 5  ;;  %v1463_v12 = vadd.f32 %v2790_v57, %v1446_v51 }
 0x18d   : > { %v1428_v62 = vpop.f32.mrf.mxu0  ;;  %v1590_v63 = vrot.slane %v1585_v35, 5 }
 0x18e   : > { %v1447_v4 = vadd.f32 %v1428_v62, %v1328_v2  ;;  %v1473_v33 = vmax.f32 %v1463_v12, 0.0 }
 0x18f   : > { %v2268_v5 = vpop.f32.mrf.mxu0  ;;  %v1592_v26 = vsel %vm1589_vm11, %v1590_v63, %v1591_v59 }
 0x190   : > { %v1464_v52 = vadd.f32 %v2790_v57, %v1447_v4  ;;  %2279 = vmatpush3.msra.mxu1 %v1592_v26  ;;  %v1678_v58 = vrot.slane %v1473_v33, 2 }
 0x191   : > { %v1433_v7 = vpop.f32.mrf.mxu0  ;;  %2283 = vmatprep.subr.mxu1 %v2339_v1  ;;  %2281 = vmatmul.mubr.msk.f32.vlgmr.msra.gmra.mxu1 %vm286_vm3, %v2812_v50 }
 0x192   : > { %v1474_v9 = vmax.f32 %v1464_v52, 0.0  ;;  %v1448_v55 = vadd.f32 %v1433_v7, %v1329_v30  ;;  %2285 = vmatprep.mubr.msk.f32.mxu1 %vm2340_vm1, %v2339_v1 }
 0x193   : > { %v2271_v38 = vpop.f32.mrf.mxu0 }
 0x194   : > { %v1679_v16 = vrot.slane %v1474_v9, 2  ;;  %v1465_v17 = vadd.f32 %v2790_v57, %v1448_v55 }
 0x195   : > { %v1436_v23 = vpop.f32.mrf.mxu0 }
 0x196   : > { %v1684_v27 = vadd.f32 %v1679_v16, %v1473_v33  ;;  %v1449_v13 = vadd.f32 %v1436_v23, %v1330_v56  ;;  %v1680_v34 = vsel %vm904_vm6, %v1678_v58, %v1679_v16  ;;  %v1475_v19 = vmax.f32 %v1465_v17, 0.0 }
 0x197   : > { %v1683_v14 = vadd.f32 %v1680_v34, %v1472_v22  ;;  %v2272_v24 = vpop.f32.mrf.mxu0 }
 0x198   : > { %v1688_v28 = vrot.slane %v1684_v27, 1  ;;  %v1466_v31 = vadd.f32 %v2790_v57, %v1449_v13  ;;  %v1771_v60 = vrot.slane %v1475_v19, 2 }
 0x199   : > { %v1687_v32 = vrot.slane %v1683_v14, 1 }
 0x19a   : > { %v1476_v36 = vmax.f32 %v1466_v31, 0.0 }
 0x19b   : > { %v1689_v10 = vsel %vm471_vm4, %v1687_v32, %v1688_v28 }
 0x19c   : > { %v1772_v37 = vrot.slane %v1476_v36, 2  ;;  %2284 = vmatpush3.msra.mxu1 %v1689_v10 }
 0x19d   : > { %2288 = vmatprep.subr.mxu1 %v2339_v1  ;;  %2286 = vmatmul.mubr.msk.f32.vlgmr.msra.gmra.mxu1 %vm286_vm3, %v2812_v50 }
 0x19e   : > { %v1773_v39 = vsel %vm904_vm6, %v1771_v60, %v1772_v37  ;;  %v1777_v20 = vadd.f32 %v1772_v37, %v1475_v19  ;;  %2290 = vmatprep.mubr.msk.f32.mxu1 %vm2340_vm1, %v2339_v1 }
 0x19f   : > { %v1776_v57 = vadd.f32 %v1773_v39, %v1474_v9 }
 0x1a0   : > { %v1781_v41 = vrot.slane %v1777_v20, 5 }
 0x1a1   : > { %v1780_v42 = vrot.slane %v1776_v57, 5 }
 0x1a3   : > { %v1782_v45 = vsel %vm1589_vm11, %v1780_v42, %v1781_v41 }
 0x1a4   : > { %2289 = vmatpush3.msra.mxu1 %v1782_v45 }
 0x1a5   : > { %2291 = vmatmul.mubr.msk.f32.vlgmr.msra.gmra.mxu1 %vm286_vm3, %v2812_v50 }
 0x249   : > { %v1571_v46 = vpop.f32.mrf.mxu1 }
 0x24a   : > { %v1575_v53 = vpack.c.bf16 %v1571_v46, %v1571_v46 }
 0x24b   : > { %v2277_v21 = vpop.f32.mrf.mxu1 }
 0x24c   : > { %1577 = vst.msk [vmem:[%s2727_s18 + $0x4] sm:$0x3] %vm1576_vm12, %v1575_v53 }
 0x251   : > { %v1660_v25 = vpop.f32.mrf.mxu1 }
 0x252   : > { %v2010_v44 = vpack.c.bf16 %v1660_v25, %v1660_v25 }
 0x253   : > { %v2282_v1 = vpop.f32.mrf.mxu1 }
 0x254   : > { %v1668_v47 = vrot.slane %v2010_v44, 5 }
 0x256   : > { %v1669_v0 = vrot.slane %v1668_v47, 4  ;;  %1673 = vst.msk [vmem:[%s2727_s18 + $0x4] sm:$0x8] %vm1672_vm13, %v1668_v47 }
 0x258   : > { %1675 = vst.msk [vmem:[%s2727_s18 + $0x8] sm:$0x1] %vm1674_vm14, %v1669_v0 }
 0x25d   : > { %v1757_v11 = vpop.f32.mrf.mxu1 }
 0x25e   : > { %v2011_v8 = vpack.c.bf16 %v1757_v11, %v1757_v11 }
 0x25f   : > { %v2287_v50 = vpop.f32.mrf.mxu1 }
 0x260   : > { %v1765_v54 = vrot.slane %v2011_v8, 6 }
 0x262   : > { %1768 = vst.msk [vmem:[%s2727_s18 + $0x8] sm:$0xc] %vm1767_vm15, %v1765_v54 }
 0x265   : > { %v1850_v15 = vpop.f32.mrf.mxu1 }
 0x266   : > { %v2012_v43 = vpack.c.bf16 %v1850_v15, %v1850_v15 }
 0x267   : > { %v2292_v51 = vpop.f32.mrf.mxu1 }
 0x268   : > { %v1858_v29 = vrot.slane %v2012_v43, 7 }
 0x26a   : > { %1861 = vst.msk [vmem:[%s2727_s18 + $0xc] sm:$0x6] %vm1860_vm0, %v1858_v29 }
 0x26b PF: > { %s14_s15 = sadd.s32 1, %s2337_s15  }
 0x26c   : > { %p11_p4 = scmp.ge.s32.totalorder %s14_s15, 4  }
 0x26e   :  { %13 = sbr.rel (!%p11_p4) target bundleno = 1 (0x1), region = 74 }

// kernel: vgg_forward.7
= control target key start
LH: loop header
LB: loop body
LE: loop exit
PB: predicated region body
PF: predicated region fallthrough
CT: control target
= control target key end

     0   :  { %s1286_s15 = smov 0   ;;  %s1467_s0 = inlined_call_operand.vmem [shape: bf16[2,38,16], index: 0, kind: input, shape index: {}]   ;;  %s1468_s1 = inlined_call_operand.vmem [shape: bf16[9,16,32], index: 1, kind: input, shape index: {}]   ;;  %s1469_s2 = inlined_call_operand.vmem [shape: f32[1,32], index: 2, kind: input, shape index: {}]   ;;  %s1470_s3 = inlined_call_operand.vmem [shape: f32[24,1], index: 3, kind: input, shape index: {}]   ;;  %s1471_s4 = inlined_call_operand.vmem [shape: bf16[2,38,32], index: 4, kind: output, shape index: {}]  }
   0x1 LB: > { %s1065_s16 = sadd.s32 4294967295, %s1258_s15   ;;  %p1069_p0 = scmp.ge.s32.totalorder %s1258_s15, 1  ;;  %s1258_s15 = sphi %s1286_s15, %s14_s15  }
   0x2   : > { %p162_p1 = scmp.lt.s32.totalorder %s1258_s15, 3 }
   0x4   : > { %p163_p2 = pnand %p1069_p0, %p162_p1 }
   0x5   : > { %p188_p3 = scmp.lt.s32.totalorder (!%p163_p2), %s1065_s16, 1 }
   0x6   : > { %166 = sbr.rel (%p163_p2) target bundleno = 278 (0x116), region = 36 }
   0xb   : > { %v1230_v0 = vld [vmem:[%s1468_s1 + $0x8] sm:$0xff]   ;;  %v1231_v1 = vld [vmem:[%s1468_s1] sm:$0xff]   ;;  %s1477_s16 = smov (!%p188_p3, %s1065_s16), 1  ;;  %v1305_v2 = vld [vmem:[%s1468_s1 + $0x10] sm:$0xff]   ;;  %vm240_vm0 = vcmask 130048   ;;  %vm362_vm2 = vcmask 1046528  }
   0xc   : > { %1164 = vmatprep.subr.bf16.mxu0 %v1230_v0  ;;  %1170 = vmatprep.subr.bf16.mxu1 %v1231_v1  ;;  %s1218_s23 = smul.u32 20, %s1477_s16  ;;  %v1236_v3 = vld [vmem:[%s1468_s1 + $0x18] sm:$0xff]   ;;  %vm218_vm1 = vsmask.f32 7424  ;;  %vm440_vm3 = vcmask 1044480   ;;  %v1329_v7 = vld [vmem:[%s1468_s1 + $0x28] sm:$0xff]  }
   0xd   : > { %1165 = vmatpush3.bf16.msra.mxu0 %v1230_v0  ;;  %1171 = vmatpush3.bf16.msra.mxu1 %v1231_v1  ;;  %v1240_v41 = vld [vmem:[%s1468_s1 + $0x20] sm:$0xff]   ;;  %v1246_v51 = vld [vmem:[%s1468_s1 + $0x38] sm:$0xff]   ;;  %v1260_v53 = vmov 0   ;;  %vm514_vm4 = vsmask.f32 4352  ;;  %v923_v1 = vld [vmem:[%s1470_s3 + $0x10] sm:$0xff] }
   0xe   : > { %1176 = vmatprep.subr.bf16.mxu0 %v1305_v2  ;;  %s1317_s28 = scalar_lea.vmem %s1467_s0, %s1218_s23  ;;  %1182 = vmatprep.subr.bf16.mxu1 %v1236_v3  ;;  %v921_v57 = vld [vmem:[%s1470_s3] sm:$0xff]  ;;  %vm956_vm5 = vcmask 256000   ;;  %s1399_s17 = scalar_lea.vmem %s1471_s4, %s1218_s23  ;;  %vm754_vm6 = vsmask.f32 5376  ;;  %vm680_vm7 = vcmask 1045504   ;;  %vm944_vm8 = vcmask 257024  }
   0xf   : > { %v199_v4 = vld [vmem:[%s1317_s28] sm:$0xf]  ;;  %v1321_v5 = vld [vmem:[%s1317_s28 + $0x4] sm:$0xf]  ;;  %v1324_v6 = vld [vmem:[%s1317_s28 + $0x8] sm:$0xf]  ;;  %1228 = vset.pattern.permute.xlu0 %v1260_v53  ;;  %1229 = vset.pattern.permute.xlu1 %v1260_v53 }
  0x10   : > { %v204_v8 = vld [vmem:[%s1317_s28 + $0xc] sm:$0x1]  ;;  %v1074_v9 = vcombine.low %v199_v4, %v1321_v5  ;;  %v1079_v10 = vcombine.low %v1324_v6, %v1324_v6  ;;  %v355_v11 = vld [vmem:[%s1317_s28] sm:$0xe]  ;;  %v663_v33 = vld [vmem:[%s1317_s28 + $0x4] sm:$0xc]  ;;  %v1104_v49 = vcombine.low %v1321_v5, %v1324_v6  ;;  %926 = vperm.xlu0 %1228, %v921_v57   ;;  %936 = vperm.xlu1 %1229, %v923_v1  }
  0x11   : > { %v429_v12 = vld [vmem:[%s1317_s28] sm:$0x8]  ;;  %v1338_v13 = vcombine.low %v1324_v6, %v204_v8  ;;  %v1085_v14 = vcombine.low %v355_v11, %v1321_v5  ;;  %v430_v15 = vld [vmem:[%s1317_s28 + $0xc] sm:$0x7]  ;;  %v1358_v37 = vld [vmem:[%s1317_s28 + $0x8] sm:$0xf] }
  0x12   : > { %v1091_v16 = vcombine.low %v429_v12, %v1321_v5  ;;  %v1344_v17 = vld [vmem:[%s1317_s28 + $0xc] sm:$0xf]  ;;  %v220_v18 = vshrl.u32 %v1074_v9, 16  ;;  %v222_v19 = vshll.u32 %v1074_v9, 16  ;;  %1172 = vmatprep.mubr.msk.bf16.mxu1 %vm240_vm0, %v1074_v9  ;;  %v1092_v20 = vcombine.low %v1324_v6, %v430_v15  ;;  %v747_v44 = vld [vmem:[%s1317_s28 + $0x10] sm:$0x7] }
  0x13   : > { %v1098_v21 = vcombine.low %v1324_v6, %v1344_v17  ;;  %v227_v22 = vshll.u32 %v1338_v13, 16  ;;  %v231_v23 = vshrl.u32 %v1338_v13, 16  ;;  %1173 = vmatmul.mubr.msk.bf16.vlgmr.msra.gmra.mxu1 %vm240_vm0, %v1079_v10  ;;  %v363_v24 = vrot.slane %v1085_v14, 1  ;;  %v665_v38 = vld [vmem:[%s1317_s28 + $0xc] sm:$0xf]  ;;  %v1244_v6 = vld [vmem:[%s1468_s1 + $0x30] sm:$0xff]  }
  0x14   : > { %v364_v25 = vrot.slane %v1338_v13, 1  ;;  %v224_v26 = vrot.slane %v222_v19, 1  ;;  %1183 = vmatpush3.bf16.msra.mxu1 %v1236_v3  ;;  %v441_v27 = vrot.slane %v1091_v16, 3  ;;  %v442_v28 = vrot.slane %v1092_v20, 3  ;;  %v666_v61 = vld [vmem:[%s1317_s28 + $0x10] sm:$0x3] }
  0x15   : > { %v516_v29 = vshrl.u32 %v1091_v16, 16  ;;  %v229_v30 = vrot.slane %v227_v22, 1  ;;  %1194 = vmatprep.subr.bf16.mxu1 %v1329_v7  ;;  %v519_v31 = vshll.u32 %v1091_v16, 16  ;;  %v524_v32 = vshrl.u32 %v1098_v21, 16  ;;  %957 = vst.msk [vmem:[%s1399_s17 + $0x10] sm:$0x7] %vm956_vm5, %v1260_v53 }
  0x16   : > { %v225_v34 = vor.u32 %v224_v26, %v220_v18  ;;  %v443_v35 = vsel %vm440_vm3, %v441_v27, %v442_v28  ;;  %v527_v36 = vshll.u32 %v1098_v21, 16  ;;  %v365_v40 = vsel %vm362_vm2, %v363_v24, %v364_v25  ;;  %v922_v4 = vld [vmem:[%s1470_s3 + $0x8] sm:$0xff]  ;;  %v835_v12 = vld [vmem:[%s1317_s28 + $0x4] sm:$0x8]  ;;  %v947_v21 = vld [vmem:[%s1399_s17] sm:$0xf] }
  0x17   : > { %v233_v39 = vor.u32 %v231_v23, %v229_v30  ;;  %1184 = vmatprep.mubr.msk.bf16.mxu1 %vm240_vm0, %v443_v35  ;;  %v518_v42 = vrot.slane %v516_v29, 3  ;;  %v521_v43 = vrot.slane %v519_v31, 4  ;;  %v526_v46 = vrot.slane %v524_v32, 3  ;;  %931 = vperm.xlu0 %1228, %v922_v4   ;;  %v1250_v13 = vld [vmem:[%s1468_s1 + $0x40] sm:$0xff]   ;;  %v953_v23 = vld [vmem:[%s1399_s17 + $0xc] sm:$0x8] }
  0x18   : > { %v230_v45 = vsel %vm218_vm1, %v225_v34, %v229_v30  ;;  %v529_v47 = vrot.slane %v527_v36, 4  ;;  %v1111_v48 = vcombine.low %v663_v33, %v1358_v37  ;;  %v1374_v50 = vcombine.low %v665_v38, %v747_v44 }
  0x19   : > { %1166 = vmatprep.mubr.msk.bf16.mxu0 %vm240_vm0, %v230_v45  ;;  %v522_v58 = vor.u32 %v521_v43, %v518_v42  ;;  %v1112_v8 = vcombine.low %v665_v38, %v666_v61  ;;  %v1124_v15 = vcombine.low %v835_v12, %v1358_v37  ;;  %vm945_vm9 = vsmask.f32 3328 }
  0x1a   : > { %1167 = vmatmul.mubr.msk.bf16.vlgmr.msra.gmra.mxu0 %vm240_vm0, %v233_v39  ;;  %v756_v52 = vshrl.u32 %v1111_v48, 16  ;;  %v759_v54 = vshll.u32 %v1111_v48, 16  ;;  %v764_v55 = vshrl.u32 %v1374_v50, 16  ;;  %v767_v56 = vshll.u32 %v1374_v50, 16  ;;  %vm1432_vm12 = vmand %vm944_vm8, %vm945_vm9 }
  0x1b   : > { %1177 = vmatpush3.bf16.msra.mxu0 %v1305_v2  ;;  %1178 = vmatprep.mubr.msk.bf16.mxu0 %vm240_vm0, %v365_v40  ;;  %v530_v59 = vor.u32 %v529_v47, %v526_v46  ;;  %v681_v10 = vrot.slane %v1111_v48, 2  ;;  %v682_v11 = vrot.slane %v1112_v8, 2  ;;  %v842_v16 = vrot.slane %v1124_v15, 3 }
  0x1c   : > { %1188 = vmatprep.subr.bf16.mxu0 %v1240_v41  ;;  %1185 = vmatmul.mubr.msk.bf16.vlgmr.msra.gmra.mxu1 %vm240_vm0, %v442_v28  ;;  %v758_v60 = vrot.slane %v756_v52, 2  ;;  %v761_v62 = vrot.slane %v759_v54, 3  ;;  %v766_v63 = vrot.slane %v764_v55, 2  ;;  %v769_v0 = vrot.slane %v767_v56, 3 }
  0x1d   : > { %1195 = vmatpush3.bf16.msra.mxu1 %v1329_v7  ;;  %1196 = vmatprep.mubr.msk.bf16.mxu1 %vm240_vm0, %v1104_v49  ;;  %v531_v5 = vsel %vm514_vm4, %v522_v58, %v530_v59  ;;  %v1105_v7 = vcombine.low %v1344_v17, %v1344_v17  ;;  %v683_v14 = vsel %vm680_vm7, %v681_v10, %v682_v11  ;;  %v843_v17 = vrot.slane %v1374_v50, 3 }
  0x1e   : > { %1206 = vmatprep.subr.bf16.mxu1 %v1246_v51  ;;  %v762_v2 = vor.u32 %v761_v62, %v758_v60  ;;  %v770_v3 = vor.u32 %v769_v0, %v766_v63  ;;  %vm950_vm10 = vcmask 257027   ;;  %vm951_vm11 = vsmask.f32 7950 }
  0x1f   : > { %v844_v18 = vsel %vm440_vm3, %v842_v16, %v843_v17  ;;  %vm1436_vm13 = vmand %vm950_vm10, %vm951_vm11  ;;  %v948_v22 = vsel %vm1432_vm12, 0, %v947_v21  ;;  %vm966_vm14 = vsmask.f32 7440 }
  0x20   : > { %v771_v9 = vsel %vm754_vm6, %v762_v2, %v770_v3  ;;  %949 = vst [vmem:[%s1399_s17] sm:$0xf] %v948_v22  ;;  %v954_v24 = vsel %vm1436_vm13, 0, %v953_v23  ;;  %vm967_vm15 = vmor %vm945_vm9, %vm966_vm14 }
  0x21   : > { %955 = vst [vmem:[%s1399_s17 + $0xc] sm:$0x8] %v954_v24 }
  0x22   : > { %1179 = vmatmul.mubr.msk.bf16.vlgmr.msra.gmra.mxu0 %vm240_vm0, %v364_v25 }
  0x23   : > { %1189 = vmatpush3.bf16.msra.mxu0 %v1240_v41  ;;  %1190 = vmatprep.mubr.msk.bf16.mxu0 %vm240_vm0, %v531_v5 }
  0x24   : > { %1200 = vmatprep.subr.bf16.mxu0 %v1244_v6  ;;  %1197 = vmatmul.mubr.msk.bf16.vlgmr.msra.gmra.mxu1 %vm240_vm0, %v1105_v7 }
  0x25   : > { %1207 = vmatpush3.bf16.msra.mxu1 %v1246_v51  ;;  %1208 = vmatprep.mubr.msk.bf16.mxu1 %vm240_vm0, %v771_v9 }
  0x2a   : > { %1191 = vmatmul.mubr.msk.bf16.vlgmr.msra.gmra.mxu0 %vm240_vm0, %v530_v59 }
  0x2b   : > { %1201 = vmatpush3.bf16.msra.mxu0 %v1244_v6  ;;  %1202 = vmatprep.mubr.msk.bf16.mxu0 %vm240_vm0, %v683_v14 }
  0x2c   : > { %1212 = vmatprep.subr.bf16.mxu0 %v1250_v13  ;;  %1209 = vmatmul.mubr.msk.bf16.vlgmr.msra.gmra.mxu1 %vm240_vm0, %v770_v3 }
  0x32   : > { %1203 = vmatmul.mubr.msk.bf16.vlgmr.msra.gmra.mxu0 %vm240_vm0, %v682_v11  ;;  %v1128_v11 = vld [vmem:[%s1469_s2] ss:$0 sm:$0xff] }
  0x33   : > { %1213 = vmatpush3.bf16.msra.mxu0 %v1250_v13  ;;  %1214 = vmatprep.mubr.msk.bf16.mxu0 %vm240_vm0, %v844_v18 }
  0x3a   : > { %1215 = vmatmul.mubr.msk.bf16.vlgmr.msra.gmra.mxu0 %vm240_vm0, %v843_v17 }
  0x8b   : > { %v937_v18 = vpop.permute.xlu1 %936 }
  0xd3   : > { %v1174_v25 = vpop.f32.mrf.mxu1 }
  0xd5   : > { %v341_v26 = vpop.f32.mrf.mxu1 }
  0xd7   : > { %v1175_v27 = vpop.f32.mrf.mxu1 }
  0xd8   : > { %v927_v27 = vpop.permute.xlu0 %926 }
  0xd9   : > { %v344_v28 = vpop.f32.mrf.mxu1 }
  0xda   : > { %v1168_v29 = vpop.f32.mrf.mxu0 }
  0xdb   : > { %v350_v42 = vadd.f32 %v1174_v25, %v1168_v29 }
  0xdc   : > { %v281_v30 = vpop.f32.mrf.mxu0  ;;  %v1186_v31 = vpop.f32.mrf.mxu1 }
  0xdd   : > { %v342_v45 = vadd.f32 %v341_v26, %v281_v30 }
  0xde   : > { %v1169_v32 = vpop.f32.mrf.mxu0  ;;  %v490_v33 = vpop.f32.mrf.mxu1 }
  0xe0   : > { %v284_v34 = vpop.f32.mrf.mxu0  ;;  %v1187_v35 = vpop.f32.mrf.mxu1 }
  0xe1   : > { %v345_v52 = vadd.f32 %v344_v28, %v284_v34 }
  0xe2   : > { %v1180_v36 = vpop.f32.mrf.mxu0  ;;  %v493_v37 = vpop.f32.mrf.mxu1 }
  0xe3   : > { %v428_v46 = vadd.f32 %v1180_v36, %v350_v42  ;;  %v932_v42 = vpop.permute.xlu0 %931 }
  0xe4   : > { %v412_v38 = vpop.f32.mrf.mxu0  ;;  %v1198_v39 = vpop.f32.mrf.mxu1 }
  0xe5   : > { %v426_v49 = vadd.f32 %v412_v38, %v342_v45  ;;  %v506_v53 = vadd.f32 %v1186_v31, %v428_v46 }
  0xe6   : > { %v1181_v40 = vpop.f32.mrf.mxu0  ;;  %v646_v41 = vpop.f32.mrf.mxu1 }
  0xe7   : > { %v504_v56 = vadd.f32 %v490_v33, %v426_v49 }
  0xe8   : > { %v415_v43 = vpop.f32.mrf.mxu0  ;;  %v1199_v44 = vpop.f32.mrf.mxu1 }
  0xe9   : > { %v427_v57 = vadd.f32 %v415_v43, %v345_v52  ;;  %v1001_v43 = vld [vmem:[%s1399_s17] sm:$0x8] }
  0xea   : > { %v1192_v47 = vpop.f32.mrf.mxu0  ;;  %v649_v48 = vpop.f32.mrf.mxu1 }
  0xeb   : > { %v594_v58 = vadd.f32 %v1192_v47, %v506_v53  ;;  %v505_v63 = vadd.f32 %v493_v37, %v427_v57 }
  0xec   : > { %v578_v50 = vpop.f32.mrf.mxu0  ;;  %v1210_v51 = vpop.f32.mrf.mxu1 }
  0xed   : > { %v592_v61 = vadd.f32 %v578_v50, %v504_v56  ;;  %v662_v0 = vadd.f32 %v1198_v39, %v594_v58 }
  0xee   : > { %v1193_v54 = vpop.f32.mrf.mxu0  ;;  %v818_v55 = vpop.f32.mrf.mxu1 }
  0xef   : > { %v660_v2 = vadd.f32 %v646_v41, %v592_v61 }
  0xf0   : > { %v581_v59 = vpop.f32.mrf.mxu0  ;;  %v1211_v60 = vpop.f32.mrf.mxu1 }
  0xf1   : > { %v593_v3 = vadd.f32 %v581_v59, %v505_v63 }
  0xf2   : > { %v1204_v62 = vpop.f32.mrf.mxu0  ;;  %v821_v21 = vpop.f32.mrf.mxu1 }
  0xf3   : > { %v746_v4 = vadd.f32 %v1204_v62, %v662_v0  ;;  %v661_v8 = vadd.f32 %v649_v48, %v593_v3  ;;  %v1007_v48 = vld [vmem:[%s1399_s17 + $0xc] sm:$0xf] }
  0xf4   : > { %v730_v1 = vpop.f32.mrf.mxu0 }
  0xf5   : > { %v744_v6 = vadd.f32 %v730_v1, %v660_v2  ;;  %v834_v9 = vadd.f32 %v1210_v51, %v746_v4 }
  0xf6   : > { %v1205_v5 = vpop.f32.mrf.mxu0 }
  0xf7   : > { %v832_v12 = vadd.f32 %v818_v55, %v744_v6 }
  0xf8   : > { %v733_v7 = vpop.f32.mrf.mxu0 }
  0xf9   : > { %v745_v14 = vadd.f32 %v733_v7, %v661_v8 }
  0xfa   : > { %v1216_v10 = vpop.f32.mrf.mxu0 }
  0xfb   : > { %v907_v13 = vadd.f32 %v1216_v10, %v834_v9  ;;  %v833_v23 = vadd.f32 %v821_v21, %v745_v14 }
  0xfc   : > { %v891_v15 = vpop.f32.mrf.mxu0 }
  0xfd   : > { %v917_v16 = vadd.f32 %v1128_v11, %v907_v13  ;;  %v905_v17 = vadd.f32 %v891_v15, %v832_v12 }
  0xfe   : > { %v1217_v22 = vpop.f32.mrf.mxu0 }
  0xff   : > { %v915_v24 = vadd.f32 %v1128_v11, %v905_v17  ;;  %v920_v25 = vmax.f32 %v917_v16, 0.0 }
 0x100   : > { %v894_v26 = vpop.f32.mrf.mxu0 }
 0x101   : > { %v918_v28 = vmax.f32 %v915_v24, 0.0  ;;  %v941_v29 = vmul.f32 %v937_v18, %v920_v25  ;;  %v906_v30 = vadd.f32 %v894_v26, %v833_v23 }
 0x103   : > { %v939_v31 = vmul.f32 %v927_v27, %v918_v28  ;;  %v1136_v32 = vpack.c.bf16 %v941_v29, %v941_v29  ;;  %v916_v33 = vadd.f32 %v1128_v11, %v906_v30 }
 0x105   : > { %v1134_v34 = vpack.c.bf16 %v939_v31, %v939_v31  ;;  %v988_v35 = vshll.u32 %v1136_v32, 16  ;;  %v992_v36 = vshrl.u32 %v1136_v32, 16  ;;  %v919_v37 = vmax.f32 %v916_v33, 0.0 }
 0x107   : > { %v969_v38 = vshll.u32 %v1134_v34, 16  ;;  %v972_v39 = vshrl.u32 %v1134_v34, 16  ;;  %v990_v40 = vrot.slane %v988_v35, 5  ;;  %v994_v41 = vrot.slane %v992_v36, 4 }
 0x108   : > { %v940_v44 = vmul.f32 %v932_v42, %v919_v37 }
 0x109   : > { %v971_v45 = vrot.slane %v969_v38, 5  ;;  %v974_v46 = vrot.slane %v972_v39, 4  ;;  %v995_v47 = vor.u32 %v994_v41, %v990_v40 }
 0x10a   : > { %v1135_v49 = vpack.c.bf16 %v940_v44, %v940_v44 }
 0x10b   : > { %v975_v50 = vor.u32 %v974_v46, %v971_v45  ;;  %v1002_v51 = vsel %vm1436_vm13, %v971_v45, %v1001_v43  ;;  %v996_v52 = vrot.slane %v995_v47, 4 }
 0x10c   : > { %1003 = vst [vmem:[%s1399_s17] sm:$0x8] %v1002_v51  ;;  %v978_v53 = vshll.u32 %v1135_v49, 16  ;;  %v982_v54 = vshrl.u32 %v1135_v49, 16 }
 0x10d   : > { %v976_v55 = vrot.slane %v975_v50, 4  ;;  %v1008_v56 = vsel %vm1432_vm12, %v996_v52, %v1007_v48 }
 0x10e   : > { %1009 = vst [vmem:[%s1399_s17 + $0xc] sm:$0xf] %v1008_v56  ;;  %v980_v57 = vrot.slane %v978_v53, 5  ;;  %v984_v58 = vrot.slane %v982_v54, 4 }
 0x110   : > { %v981_v59 = vsel %vm967_vm15, %v976_v55, %v980_v57  ;;  %v985_v60 = vor.u32 %v984_v58, %v980_v57 }
 0x111   : > { %1005 = vst.msk [vmem:[%s1399_s17 + $0x4] sm:$0xf] %vm944_vm8, %v981_v59 }
 0x112   : > { %v986_v20 = vrot.slane %v985_v60, 4 }
 0x114   : > { %v991_v61 = vsel %vm967_vm15, %v986_v20, %v990_v40 }
 0x115   : > { %1006 = vst.msk [vmem:[%s1399_s17 + $0x8] sm:$0xf] %vm944_vm8, %v991_v61 }
 0x116 PF: > { %s14_s15 = sadd.s32 1, %s1258_s15  }
 0x117   : > { %p11_p4 = scmp.ge.s32.totalorder %s14_s15, 4  }
 0x119   :  { %13 = sbr.rel (!%p11_p4) target bundleno = 1 (0x1), region = 74 }

// kernel: vgg_forward.9
= control target key start
LH: loop header
LB: loop body
LE: loop exit
PB: predicated region body
PF: predicated region fallthrough
CT: control target
= control target key end

     0   :  { %v191_v1 = vmov 0.0   ;;  %vm192_vm0 = vmmov 0   ;;  %vm28_vm1 = vcmask 261120   ;;  %vm32_vm2 = vcmask 254976   ;;  %s245_s0 = inlined_call_operand.vmem [shape: bf16[2,18,32], index: 0, kind: input, shape index: {}]   ;;  %s246_s1 = inlined_call_operand.vmem [shape: bf16[32,10], index: 1, kind: input, shape index: {}]   ;;  %s247_s2 = inlined_call_operand.vmem [shape: f32[1,10], index: 2, kind: input, shape index: {}]   ;;  %s248_s3 = inlined_call_operand.hbm [shape: f32[2,10], index: 3, kind: output, shape index: {}]  }
   0x1   :  { %v167_v0 = vld [vmem:[%s246_s1 + $0x8] sm:$0xff]   ;;  %156 = vmatprep.subr.bf16.mxu0 %v191_v1  ;;  %v168_v2 = vld [vmem:[%s246_s1] sm:$0xff]   ;;  %160 = vmatprep.mubr.msk.bf16.mxu0 %vm192_vm0, %v191_v1  ;;  %v21_v8 = vld [vmem:[%s245_s0 + $0x14] sm:$0x1] }
   0x2   :  { %157 = vmatpush3.bf16.msra.mxu0 %v167_v0  ;;  %v150_v3 = vld [vmem:[%s245_s0] sm:$0xff]   ;;  %v18_v4 = vld [vmem:[%s245_s0 + $0x8] sm:$0x1]  ;;  %v19_v5 = vld [vmem:[%s245_s0 + $0xc] sm:$0xff]  }
   0x3   :  { %158 = vmatprep.subr.bf16.mxu0 %v191_v1  ;;  %v151_v6 = vunpack.c.l.bf16 %v150_v3  ;;  %v152_v7 = vunpack.c.h.bf16 %v150_v3  ;;  %v24_v9 = vunpack.c.l.bf16 %v18_v4  ;;  %v25_v10 = vunpack.c.l.bf16 %v19_v5 }
   0x4   :  { %8 = vsyncpa [#allocation3], 0  ;;  %v26_v11 = vunpack.c.h.bf16 %v19_v5  ;;  %v27_v12 = vunpack.c.l.bf16 %v21_v8  ;;  %vm71_vm3 = vcmask 1041409   ;;  %v145_v43 = vld [vmem:[%s247_s2] ss:$0 sm:$0xff]  ;;  %s193_s24 = smov [#allocation2]  }
   0x5   :  { %v29_v13 = vsel %vm28_vm1, %v151_v6, 0.0  ;;  %v30_v14 = vsel %vm28_vm1, %v152_v7, 0.0  ;;  %v33_v15 = vsel %vm32_vm2, %v24_v9, 0.0  ;;  %v41_v16 = vsel %vm28_vm1, %v25_v10, 0.0  ;;  %s137_s25 = sshll.u32 %s193_s24, 4  ;;  %s138_s25 = int_to_ptr.vmem [resolvable:$true] %s137_s25 }
   0x6   :  { %159 = vmatpush3.bf16.msra.mxu0 %v168_v2  ;;  %v31_v17 = vadd.f32 %v30_v14, %v29_v13  ;;  %v42_v18 = vsel %vm28_vm1, %v26_v11, 0.0  ;;  %v44_v19 = vsel %vm32_vm2, %v27_v12, 0.0  ;;  %vm129_vm4 = vcmask 74752   ;;  %s169_s26 = scalar_lea.vmem %s138_s25, 32  ;;  %p174_p1 = scmp.lt.s32.totalorder %s138_s25, %s138_s25 }
   0x7   :  { %v43_v20 = vadd.f32 %v42_v18, %v41_v16  ;;  %p170_p0 = scmp.ne.s32.totalorder %s138_s25, %s169_s26  ;;  %p175_p2 = scmp.lt.s32.totalorder %s169_s26, %s169_s26 }
   0x8   :  { %v34_v21 = vadd.f32 %v33_v15, %v31_v17 }
   0x9   :  { %v45_v22 = vadd.f32 %v44_v19, %v43_v20  ;;  %p176_p3 = por %p175_p2, %p174_p1 }
   0xa   :  { %v35_v23 = vrot.slane %v34_v21, 4 }
   0xb   :  { %v46_v24 = vrot.slane %v45_v22, 4  ;;  %p177_p4 = pnand %p176_p3, %p170_p0 }
   0xc   :  { %v36_v25 = vadd.f32 %v35_v23, %v34_v21 }
   0xd   :  { %v47_v26 = vadd.f32 %v46_v24, %v45_v22 }
   0xe   :  { %v37_v27 = vrot.slane %v36_v25, 2 }
   0xf   :  { %v48_v28 = vrot.slane %v47_v26, 2 }
  0x10   :  { %v38_v29 = vadd.f32 %v37_v27, %v36_v25 }
  0x11   :  { %v49_v30 = vadd.f32 %v48_v28, %v47_v26 }
  0x12   :  { %v39_v31 = vrot.slane %v38_v29, 1 }
  0x13   :  { %v50_v32 = vrot.slane %v49_v30, 1 }
  0x14   :  { %v40_v33 = vadd.f32 %v39_v31, %v38_v29 }
  0x15   :  { %v51_v34 = vadd.f32 %v50_v32, %v49_v30 }
  0x16   :  { %v52_v35 = vmul.f32 0.25, %v40_v33 }
  0x17   :  { %v53_v36 = vmul.f32 0.25, %v51_v34 }
  0x18   :  { %v54_v37 = vpack.c.bf16 %v52_v35, %v52_v35 }
  0x19   :  { %v55_v38 = vpack.c.bf16 %v53_v36, %v53_v36 }
  0x1a   :  { %v69_v39 = vunpack.c.l.b16 %v54_v37 }
  0x1b   :  { %v70_v40 = vunpack.c.l.b16 %v55_v38 }
  0x1d   :  { %v72_v41 = vsel %vm71_vm3, %v70_v40, %v69_v39 }
  0x1e   :  { %v73_v42 = vpack.c.b16 %v72_v41, %v72_v41 }
  0x20   :  { %161 = vmatmul.mubr.msk.bf16.vlgmr.msra.gmra.mxu0 %vm28_vm1, %v73_v42 }
  0xe0   :  { %v123_v44 = vpop.f32.mrf.mxu0 }
  0xe1   :  { %v124_v45 = vadd.f32 %v145_v43, %v123_v44 }
  0xe2   :  { %v162_v46 = vpop.f32.mrf.mxu0 }
  0xe3   :  { %130 = vst.msk [vmem:[#allocation2] sm:$0x3] %vm129_vm4, %v124_v45 }
  0xe4   :  { %v126_v47 = vpop.f32.mrf.mxu0 }
  0xe5   :  { %180 = shalt.err (!%p177_p4)
}
  0xe6   :  { %140 = dma.vmem_to_hbm [thread:$0]  %s138_s25, 32, %s248_s3, [#allocation3]   ;;  %v163_v48 = vpop.f32.mrf.mxu0 }
  0xe7   :  { %189 = dma.done.wait [#allocation3], 32  }
  0xe8   :  { %190 = vsyncadd [#allocation3], 4294967264 }
  0xe9   :  { %144 = vsyncpa [#allocation3], 1 }

// kernel: vgg_forward.5
= control target key start
LH: loop header
LB: loop body
LE: loop exit
PB: predicated region body
PF: predicated region fallthrough
CT: control target
= control target key end

     0   :  { %s5598_s15 = smov 0   ;;  %s7511_s0 = inlined_call_operand.vmem [shape: bf16[2,326,3], index: 0, kind: input, shape index: {}]   ;;  %s7512_s1 = inlined_call_operand.vmem [shape: bf16[9,3,8], index: 1, kind: input, shape index: {}]   ;;  %s7513_s2 = inlined_call_operand.vmem [shape: f32[1,8], index: 2, kind: input, shape index: {}]   ;;  %s7514_s3 = inlined_call_operand.vmem [shape: f32[8,16], index: 3, kind: input, shape index: {}]   ;;  %s7515_s4 = inlined_call_operand.vmem [shape: bf16[2,102,8], index: 4, kind: output, shape index: {}]  }
   0x1 LB: > { %s4628_s16 = sadd.s32 4294967295, %s5567_s15   ;;  %p4632_p0 = scmp.ge.s32.totalorder %s5567_s15, 1  ;;  %s5567_s15 = sphi %s5598_s15, %s14_s15  }
   0x2   : > { %p162_p1 = scmp.lt.s32.totalorder %s5567_s15, 3 }
   0x4   : > { %p163_p2 = pnand %p4632_p0, %p162_p1 }
   0x6   : > { %166 = sbr.rel (%p163_p2) target bundleno = 778 (0x30a), region = 36 }
   0xb   : > { %v4635_v0 = vld [vmem:[%s7512_s1 + $0x2] sm:$0x3]  ;;  %vm536_vm0 = vcmask 1040384   ;;  %vm537_vm1 = vcmask 1041408   ;;  %p188_p3 = scmp.lt.s32.totalorder %s4628_s16, 1  ;;  %v5569_v1 = vmov 65535  }
   0xc   : > { %v538_v2 = vsel %vm536_vm0, 4294967295, %v5569_v1  ;;  %v235_v3 = vld [vmem:[%s7512_s1] sm:$0x3]  ;;  %v4691_v5 = vld [vmem:[%s7512_s1 + $0x4] sm:$0x3]  ;;  %vm481_vm3 = vcmask 23552  }
   0xd   : > { %v5612_v4 = vsel %vm537_vm1, %v538_v2, 0  ;;  %s7574_s16 = smov (!%p188_p3, %s4628_s16), 1  ;;  %vm332_vm2 = vsmask.f32 7424  ;;  %v4711_v13 = vld [vmem:[%s7512_s1 + $0x6] sm:$0x3] }
   0xe   : > { %v541_v6 = vand.u32 %v4635_v0, %v5612_v4  ;;  %v5621_v7 = vand.u32 %v5612_v4, %v235_v3  ;;  %v5624_v8 = vand.u32 %v4691_v5, %v5612_v4  ;;  %s5485_s23 = smul.u32 164, %s7574_s16  ;;  %v4749_v14 = vld [vmem:[%s7512_s1 + $0x8] sm:$0x3]  ;;  %v5672_v30 = vand.u32 %v4711_v13, %v5612_v4 }
   0xf   : > { %v5680_v35 = vand.u32 %v4749_v14, %v5612_v4  ;;  %vm942_vm4 = vcmask 1046528   ;;  %vm2142_vm5 = vcmask 1045504   ;;  %vm1695_vm6 = vsmask.f32 6400  ;;  %s5486_s13 = smul.u32 52, %s7574_s16 }
  0x10   : > { %5085 = vmatprep.subr.bf16.mxu0 %v541_v6  ;;  %5483 = vmatprep.subr.bf16.mxu1 %v541_v6  ;;  %s5630_s26 = scalar_lea.vmem %s7511_s0, %s5485_s23  ;;  %vm2895_vm7 = vsmask.f32 5376  ;;  %vm3342_vm8 = vcmask 1044480   ;;  %vm5571_vm9 = vmmov 0   ;;  %vm3730_vm10 = vcmask 60416  }
  0x11   : > { %5086 = vmatpush3.bf16.msra.mxu0 %v541_v6  ;;  %5484 = vmatpush3.bf16.msra.mxu1 %v541_v6  ;;  %v199_v9 = vld [vmem:[%s5630_s26] sm:$0xf]  ;;  %v5634_v10 = vld [vmem:[%s5630_s26 + $0x4] sm:$0xf]  ;;  %v5642_v12 = vld [vmem:[%s5630_s26 + $0x8] sm:$0xff]   ;;  %s7107_s18 = scalar_lea.vmem %s7515_s4, %s5486_s13  ;;  %vm3771_vm11 = vcmask 130048  }
  0x12   : > { %5123 = vmatprep.subr.bf16.mxu1 %v5621_v7  ;;  %5161 = vmatprep.subr.bf16.mxu0 %v5624_v8  ;;  %v5639_v11 = vcombine.low %v199_v9, %v5634_v10  ;;  %v341_v17 = vshll.u32 %v5642_v12, 16  ;;  %v345_v18 = vshrl.u32 %v5642_v12, 16  ;;  %v5655_v19 = vld [vmem:[%s5630_s26 + $0x70] sm:$0xff]   ;;  %v5658_v20 = vld [vmem:[%s5630_s26 + $0x78] sm:$0xff]   ;;  %v5669_v29 = vld [vmem:[%s5630_s26 + $0x80] sm:$0xff]   ;;  %vm3874_vm12 = vcmask 1042432  }
  0x13   : > { %v5661_v21 = vld [vmem:[%s5630_s26 + $0x10] sm:$0xff]   ;;  %v445_v24 = vshll.u32 %v5655_v19, 16  ;;  %v449_v25 = vshrl.u32 %v5655_v19, 16  ;;  %v453_v26 = vshll.u32 %v5658_v20, 16  ;;  %v457_v27 = vshrl.u32 %v5658_v20, 16  ;;  %v5677_v34 = vld [vmem:[%s5630_s26 + $0x18] sm:$0xff]  }
  0x14   : > { %v334_v15 = vshrl.u32 %v5639_v11, 16  ;;  %v336_v16 = vshll.u32 %v5639_v11, 16  ;;  %v343_v23 = vrot.slane %v341_v17, 1  ;;  %v349_v28 = vshll.u32 %v5661_v21, 16  ;;  %v5688_v43 = vld [vmem:[%s5630_s26 + $0x88] sm:$0xff]   ;;  %v5692_v45 = vld [vmem:[%s5630_s26 + $0x20] sm:$0xff]  }
  0x15   : > { %v5674_v33 = vrot.slane %v445_v24, 1  ;;  %v455_v36 = vrot.slane %v453_v26, 1  ;;  %v461_v38 = vshll.u32 %v5669_v29, 16  ;;  %v353_v39 = vshrl.u32 %v5661_v21, 16  ;;  %v5697_v50 = vld [vmem:[%s5630_s26 + $0x28] sm:$0xff]   ;;  %v5704_v55 = vld [vmem:[%s5630_s26 + $0x30] sm:$0xff]  }
  0x16   : > { %v338_v22 = vrot.slane %v336_v16, 1  ;;  %v347_v32 = vor.u32 %v345_v18, %v343_v23  ;;  %v351_v37 = vrot.slane %v349_v28, 1  ;;  %v357_v42 = vshll.u32 %v5677_v34, 16  ;;  %v5710_v59 = vld [vmem:[%s5630_s26 + $0x90] ss:$0 sps:$4 sm:$0x11]  }
  0x17   : > { %v451_v41 = vor.u32 %v449_v25, %v5674_v33  ;;  %v465_v44 = vshrl.u32 %v5669_v29, 16  ;;  %v459_v46 = vor.u32 %v457_v27, %v455_v36  ;;  %v463_v48 = vrot.slane %v461_v38, 1  ;;  %v5714_v61 = vld [vmem:[%s5630_s26 + $0x38] sm:$0xff]   ;;  %v5737_v25 = vld [vmem:[%s5630_s26 + $0x40] sm:$0xff]  }
  0x18   : > { %v339_v31 = vor.u32 %v338_v22, %v334_v15  ;;  %v352_v47 = vsel %vm332_vm2, %v347_v32, %v351_v37  ;;  %v355_v49 = vor.u32 %v353_v39, %v351_v37  ;;  %v359_v52 = vrot.slane %v357_v42, 1  ;;  %v5754_v42 = vld [vmem:[%s5630_s26 + $0x50] sm:$0xff]  }
  0x19   : > { %v456_v51 = vsel %vm332_vm2, %v451_v41, %v455_v36  ;;  %v469_v53 = vshll.u32 %v5688_v43, 16  ;;  %v361_v54 = vshrl.u32 %v5677_v34, 16  ;;  %v464_v56 = vsel %vm332_vm2, %v459_v46, %v463_v48 }
  0x1a   : > { %v344_v40 = vsel %vm332_vm2, %v339_v31, %v343_v23  ;;  %5115 = vmatprep.mubr.msk.bf16.mxu1 %vm481_vm3, %v456_v51  ;;  %v467_v57 = vor.u32 %v465_v44, %v463_v48  ;;  %v365_v58 = vshll.u32 %v5692_v45, 16  ;;  %v473_v60 = vshrl.u32 %v5688_v43, 16  ;;  %v5742_v31 = vld [vmem:[%s5630_s26 + $0x48] sm:$0xff]  }
  0x1b   : > { %5087 = vmatprep.mubr.msk.bf16.mxu0 %vm481_vm3, %v344_v40  ;;  %5116 = vmatmul.mubr.msk.bf16.vlgmr.msra.gmra.mxu1 %vm481_vm3, %v464_v56  ;;  %v360_v62 = vsel %vm332_vm2, %v355_v49, %v359_v52  ;;  %v471_v63 = vrot.slane %v469_v53, 1  ;;  %v363_v0 = vor.u32 %v361_v54, %v359_v52  ;;  %v369_v1 = vshrl.u32 %v5692_v45, 16 }
  0x1c   : > { %5088 = vmatmul.mubr.msk.bf16.vlgmr.msra.gmra.mxu0 %vm481_vm3, %v352_v47  ;;  %v367_v2 = vrot.slane %v365_v58, 1  ;;  %v477_v3 = vshll.u32 %v5710_v59, 16  ;;  %5124 = vmatpush3.bf16.msra.mxu1 %v5621_v7  ;;  %v373_v5 = vshll.u32 %v5697_v50, 16  ;;  %v377_v9 = vshrl.u32 %v5697_v50, 16  ;;  %v5760_v47 = vld [vmem:[%s5630_s26 + $0x58] sm:$0xff]  }
  0x1d   : > { %5162 = vmatpush3.bf16.msra.mxu0 %v5624_v8  ;;  %5091 = vmatprep.mubr.msk.bf16.mxu0 %vm481_vm3, %v360_v62  ;;  %v472_v6 = vsel %vm332_vm2, %v467_v57, %v471_v63  ;;  %v475_v8 = vor.u32 %v473_v60, %v471_v63  ;;  %v381_v13 = vshll.u32 %v5704_v55, 16  ;;  %v385_v17 = vshrl.u32 %v5704_v55, 16  ;;  %v5773_v57 = vld [vmem:[%s5630_s26 + $0x60] sm:$0xff]   ;;  %v5779_v62 = vld [vmem:[%s5630_s26 + $0x68] sm:$0xff]  }
  0x1e   : > { %5237 = vmatprep.subr.bf16.mxu0 %v5680_v35  ;;  %5199 = vmatprep.subr.bf16.mxu1 %v5672_v30  ;;  %v368_v14 = vsel %vm332_vm2, %v363_v0, %v367_v2  ;;  %v479_v15 = vrot.slane %v477_v3, 1  ;;  %v371_v16 = vor.u32 %v369_v1, %v367_v2  ;;  %v375_v7 = vrot.slane %v373_v5, 1 }
  0x1f   : > { %5119 = vmatprep.mubr.msk.bf16.mxu1 %vm481_vm3, %v472_v6  ;;  %v389_v18 = vshll.u32 %v5714_v61, 16  ;;  %v383_v24 = vrot.slane %v381_v13, 1  ;;  %v397_v32 = vshll.u32 %v5737_v25, 16  ;;  %v393_v37 = vshrl.u32 %v5714_v61, 16 }
  0x20   : > { %v480_v22 = vsel %vm332_vm2, %v475_v8, %v479_v15  ;;  %v376_v23 = vsel %vm332_vm2, %v371_v16, %v375_v7  ;;  %v379_v26 = vor.u32 %v377_v9, %v375_v7  ;;  %v401_v39 = vshrl.u32 %v5737_v25, 16 }
  0x21   : > { %v387_v27 = vor.u32 %v385_v17, %v383_v24  ;;  %v391_v28 = vrot.slane %v389_v18, 1  ;;  %v405_v40 = vshll.u32 %v5742_v31, 16  ;;  %v399_v41 = vrot.slane %v397_v32, 1  ;;  %v5820_v32 = vld [vmem:[%s5630_s26 + $0xc] sm:$0xf] }
  0x22   : > { %v384_v36 = vsel %vm332_vm2, %v379_v26, %v383_v24  ;;  %v413_v48 = vshll.u32 %v5754_v42, 16  ;;  %v409_v51 = vshrl.u32 %v5742_v31, 16  ;;  %v417_v53 = vshrl.u32 %v5754_v42, 16 }
  0x23   : > { %5120 = vmatmul.mubr.msk.bf16.gmra.mxu1 %vm481_vm3, %v480_v22  ;;  %v392_v38 = vsel %vm332_vm2, %v387_v27, %v391_v28  ;;  %v403_v44 = vor.u32 %v401_v39, %v399_v41  ;;  %v407_v46 = vrot.slane %v405_v40, 1  ;;  %v421_v54 = vshll.u32 %v5760_v47, 16  ;;  %v2136_v27 = vld [vmem:[%s5630_s26 + $0x8] sm:$0xc]  ;;  %v5841_v40 = vld [vmem:[%s5630_s26 + $0x20] sm:$0xff]  }
  0x24   : > { %5092 = vmatmul.mubr.msk.bf16.gmra.mxu0 %vm481_vm3, %v368_v14  ;;  %5125 = vmatprep.mubr.msk.bf16.mxu1 %vm481_vm3, %v5639_v11  ;;  %v395_v11 = vor.u32 %v393_v37, %v391_v28  ;;  %v415_v56 = vrot.slane %v413_v48, 1  ;;  %v429_v63 = vshll.u32 %v5773_v57, 16  ;;  %v425_v1 = vshrl.u32 %v5760_v47, 16  ;;  %v936_v14 = vld [vmem:[%s5630_s26] sm:$0xe]  ;;  %v5828_v37 = vld [vmem:[%s5630_s26 + $0x18] sm:$0xff]  }
  0x25   : > { %5095 = vmatprep.mubr.msk.bf16.mxu0 %vm481_vm3, %v376_v23  ;;  %v408_v52 = vsel %vm332_vm2, %v403_v44, %v407_v46  ;;  %v411_v58 = vor.u32 %v409_v51, %v407_v46  ;;  %v423_v60 = vrot.slane %v421_v54, 1  ;;  %v433_v3 = vshrl.u32 %v5773_v57, 16  ;;  %v5850_v48 = vld [vmem:[%s5630_s26 + $0x28] sm:$0xff]  }
  0x26   : > { %v400_v49 = vsel %vm332_vm2, %v395_v11, %v399_v41  ;;  %v437_v5 = vshll.u32 %v5779_v62, 16  ;;  %v431_v6 = vrot.slane %v429_v63, 1  ;;  %v441_v16 = vshrl.u32 %v5779_v62, 16 }
  0x27   : > { %v416_v0 = vsel %vm332_vm2, %v411_v58, %v415_v56  ;;  %v427_v8 = vor.u32 %v425_v1, %v423_v60  ;;  %v4692_v17 = vcombine.low %v936_v14, %v5634_v10  ;;  %v944_v23 = vrot.slane %v5642_v12, 1  ;;  %v4769_v10 = vld [vmem:[%s7512_s1 + $0xa] sm:$0x3] }
  0x28   : > { %v435_v9 = vor.u32 %v433_v3, %v431_v6  ;;  %v439_v13 = vrot.slane %v437_v5, 1  ;;  %v5815_v28 = vand.u32 %v4769_v10, %v5612_v4  ;;  %v2146_v41 = vrot.slane %v5828_v37, 2  ;;  %v5893_v3 = vld [vmem:[%s5630_s26 + $0x48] sm:$0xff]  }
  0x29   : > { %v432_v15 = vsel %vm332_vm2, %v427_v8, %v431_v6  ;;  %v943_v22 = vrot.slane %v4692_v17, 1  ;;  %v950_v58 = vrot.slane %v5692_v45, 1  ;;  %v5901_v8 = vld [vmem:[%s5630_s26 + $0x50] sm:$0xff]   ;;  %v954_v14 = vrot.slane %v5704_v55, 1  ;;  %v5931_v10 = vld [vmem:[%s5630_s26 + $0x68] sm:$0xff]  }
  0x2a   : > { %v440_v7 = vsel %vm332_vm2, %v435_v9, %v439_v13  ;;  %v443_v18 = vor.u32 %v441_v16, %v439_v13  ;;  %v2158_v13 = vrot.slane %v5893_v3, 2  ;;  %v5913_v16 = vld [vmem:[%s5630_s26 + $0x58] sm:$0xff]   ;;  %v2160_v17 = vrot.slane %v5901_v8, 2 }
  0x2b   : > { %5126 = vmatmul.mubr.msk.bf16.vlgmr.msra.gmra.mxu1 %vm481_vm3, %v5642_v12  ;;  %v945_v26 = vsel %vm942_vm4, %v943_v22, %v944_v23  ;;  %v946_v12 = vrot.slane %v5661_v21, 1  ;;  %vm3743_vm13 = vcmask 59392   ;;  %vm3853_vm14 = vcmask 60418  }
  0x2c   : > { %5096 = vmatmul.mubr.msk.bf16.gmra.mxu0 %vm481_vm3, %v384_v36  ;;  %5129 = vmatprep.mubr.msk.bf16.mxu1 %vm481_vm3, %v5661_v21  ;;  %v448_v24 = vsel %vm332_vm2, %v443_v18, %v5674_v33  ;;  %v5823_v36 = vld [vmem:[%s5630_s26 + $0x10] sm:$0xff]   ;;  %v948_v33 = vrot.slane %v5677_v34, 1  ;;  %v5922_v18 = vld [vmem:[%s5630_s26 + $0x60] sm:$0xff]   ;;  %v5925_v22 = vsel %vm2142_vm5, %v2158_v13, %v2160_v17  ;;  %vm3855_vm15 = vcmask 58368  }
  0x2d   : > { %5099 = vmatprep.mubr.msk.bf16.mxu0 %vm481_vm3, %v392_v38  ;;  %5200 = vmatpush3.bf16.msra.mxu1 %v5672_v30  ;;  %v419_v30 = vor.u32 %v417_v53, %v415_v56  ;;  %v4770_v38 = vcombine.low %v2136_v27, %v5820_v32  ;;  %v2144_v21 = vrot.slane %v5823_v36, 2  ;;  %v947_v11 = vsel %vm942_vm4, %v944_v23, %v946_v12  ;;  %v5861_v53 = vld [vmem:[%s5630_s26 + $0x30] sm:$0xff]  }
  0x2e   : > { %5275 = vmatprep.subr.bf16.mxu1 %v5815_v28  ;;  %v949_v46 = vsel %vm942_vm4, %v946_v12, %v948_v33  ;;  %v2150_v56 = vrot.slane %v5850_v48, 2  ;;  %v951_v1 = vsel %vm942_vm4, %v948_v33, %v950_v58  ;;  %v2164_v27 = vrot.slane %v5922_v18, 2 }
  0x2f   : > { %v424_v2 = vsel %vm332_vm2, %v419_v30, %v423_v60  ;;  %v2143_v39 = vrot.slane %v4770_v38, 2  ;;  %v952_v30 = vrot.slane %v5697_v50, 1  ;;  %v5874_v60 = vld [vmem:[%s5630_s26 + $0x38] sm:$0xff]   ;;  %v2166_v12 = vrot.slane %v5931_v10, 2 }
  0x30   : > { %vm3960_vm0 = vcmask 60419   ;;  %vm4161_vm1 = vcmask 60417   ;;  %vm4163_vm2 = vcmask 57344  }
  0x31   : > { %v5846_v44 = vsel %vm2142_vm5, %v2143_v39, %v2144_v21  ;;  %v955_v23 = vsel %vm942_vm4, %v952_v30, %v954_v14  ;;  %v5949_v39 = vsel %vm2142_vm5, %v2164_v27, %v2166_v12 }
  0x33   : > { %5130 = vmatmul.mubr.msk.bf16.gmra.mxu1 %vm481_vm3, %v5677_v34  ;;  %v4789_v34 = vld [vmem:[%s7512_s1 + $0xc] sm:$0x3] }
  0x34   : > { %5100 = vmatmul.mubr.msk.bf16.gmra.mxu0 %vm481_vm3, %v400_v49  ;;  %5133 = vmatprep.mubr.msk.bf16.mxu1 %vm481_vm3, %v5692_v45  ;;  %v5853_v49 = vsel %vm2142_vm5, %v2144_v21, %v2146_v41  ;;  %v5856_v51 = vand.u32 %v4789_v34, %v5612_v4  ;;  %v5884_v45 = vld [vmem:[%s5630_s26 + $0x40] sm:$0xff]   ;;  %v958_v21 = vrot.slane %v5737_v25, 1  ;;  %v960_v34 = vrot.slane %v5742_v31, 1 }
  0x35   : > { %5103 = vmatprep.mubr.msk.bf16.mxu0 %vm481_vm3, %v408_v52  ;;  %v2148_v52 = vrot.slane %v5841_v40, 2  ;;  %v2156_v6 = vrot.slane %v5884_v45, 2 }
  0x37   : > { %v5864_v54 = vsel %vm2142_vm5, %v2146_v41, %v2148_v52  ;;  %v5878_v63 = vsel %vm2142_vm5, %v2148_v52, %v2150_v56  ;;  %v1383_v41 = vrot.slane %v5823_v36, 1  ;;  %v961_v52 = vsel %vm942_vm4, %v958_v21, %v960_v34 }
  0x3b   : > { %5134 = vmatmul.mubr.msk.bf16.gmra.mxu1 %vm481_vm3, %v5697_v50  ;;  %v2154_v50 = vrot.slane %v5874_v60, 2 }
  0x3c   : > { %5104 = vmatmul.mubr.msk.bf16.gmra.mxu0 %vm481_vm3, %v416_v0  ;;  %5137 = vmatprep.mubr.msk.bf16.mxu1 %vm481_vm3, %v5704_v55  ;;  %v2152_v0 = vrot.slane %v5861_v53, 2  ;;  %v2162_v55 = vrot.slane %v5913_v16, 2 }
  0x3d   : > { %5107 = vmatprep.mubr.msk.bf16.mxu0 %vm481_vm3, %v424_v2  ;;  %v953_v2 = vsel %vm942_vm4, %v950_v58, %v952_v30  ;;  %v5904_v9 = vsel %vm2142_vm5, %v2154_v50, %v2156_v6 }
  0x3e   : > { %v5896_v5 = vsel %vm2142_vm5, %v2152_v0, %v2154_v50  ;;  %v5944_v38 = vsel %vm2142_vm5, %v2162_v55, %v2164_v27 }
  0x43   : > { %5138 = vmatmul.mubr.msk.bf16.gmra.mxu1 %vm481_vm3, %v5714_v61 }
  0x44   : > { %5108 = vmatmul.mubr.msk.bf16.gmra.mxu0 %vm481_vm3, %v432_v15  ;;  %5141 = vmatprep.mubr.msk.bf16.mxu1 %vm481_vm3, %v5737_v25  ;;  %v956_v15 = vrot.slane %v5714_v61, 1  ;;  %v1250_v61 = vld [vmem:[%s5630_s26 + $0x8] sm:$0xe]  ;;  %v5963_v25 = vld [vmem:[%s5630_s26 + $0x78] sm:$0xff]  }
  0x45   : > { %5111 = vmatprep.mubr.msk.bf16.mxu0 %vm481_vm3, %v440_v7  ;;  %v5916_v7 = vsel %vm2142_vm5, %v2156_v6, %v2158_v13  ;;  %v5941_v33 = vcombine.low %v1250_v61, %v5820_v32  ;;  %v1387_v6 = vrot.slane %v5841_v40, 1  ;;  %v5985_v13 = vld [vmem:[%s5630_s26 + $0x80] sm:$0xff]  }
  0x47   : > { %v1382_v32 = vrot.slane %v5941_v33, 1 }
  0x49   : > { %v1384_v58 = vsel %vm942_vm4, %v1382_v32, %v1383_v41  ;;  %v6012_v32 = vld [vmem:[%s5630_s26 + $0x90] sm:$0xff]  }
  0x4b   : > { %5142 = vmatmul.mubr.msk.bf16.gmra.mxu1 %vm481_vm3, %v5742_v31  ;;  %v2170_v31 = vrot.slane %v5963_v25, 2 }
  0x4c   : > { %5112 = vmatmul.mubr.msk.bf16.gmra.mxu0 %vm481_vm3, %v448_v24  ;;  %5145 = vmatprep.mubr.msk.bf16.mxu1 %vm481_vm3, %v5754_v42  ;;  %v957_v24 = vsel %vm942_vm4, %v954_v14, %v956_v15 }
  0x4d   : > { %5163 = vmatprep.mubr.msk.bf16.mxu0 %vm481_vm3, %v945_v26  ;;  %v5935_v26 = vsel %vm2142_vm5, %v2160_v17, %v2162_v55  ;;  %v2172_v17 = vrot.slane %v5985_v13, 2 }
  0x4f   : > { %v5998_v61 = vsel %vm2142_vm5, %v2170_v31, %v2172_v17 }
  0x53   : > { %5146 = vmatmul.mubr.msk.bf16.gmra.mxu1 %vm481_vm3, %v5760_v47 }
  0x54   : > { %5164 = vmatmul.mubr.msk.bf16.vlgmr.msra.gmra.mxu0 %vm481_vm3, %v947_v11  ;;  %5149 = vmatprep.mubr.msk.bf16.mxu1 %vm481_vm3, %v5773_v57  ;;  %v5959_v11 = vld [vmem:[%s5630_s26 + $0x70] sm:$0xff]  }
  0x55   : > { %5167 = vmatprep.mubr.msk.bf16.mxu0 %vm481_vm3, %v949_v46  ;;  %5238 = vmatpush3.bf16.msra.mxu0 %v5680_v35  ;;  %v5887_v35 = vsel %vm2142_vm5, %v2150_v56, %v2152_v0  ;;  %v959_v46 = vsel %vm942_vm4, %v956_v15, %v958_v21  ;;  %v2168_v56 = vrot.slane %v5959_v11, 2  ;;  %v962_v0 = vrot.slane %v5754_v42, 1  ;;  %v5989_v15 = vld [vmem:[%s5630_s26 + $0x88] sm:$0xff]  }
  0x56   : > { %5313 = vmatprep.subr.bf16.mxu0 %v5856_v51  ;;  %v1389_v21 = vrot.slane %v5850_v48, 1 }
  0x57   : > { %v5971_v30 = vsel %vm2142_vm5, %v2166_v12, %v2168_v56  ;;  %v5976_v50 = vsel %vm2142_vm5, %v2168_v56, %v2170_v31  ;;  %v963_v14 = vsel %vm942_vm4, %v960_v34, %v962_v0  ;;  %v968_v12 = vrot.slane %v5779_v62, 1 }
  0x58   : > { %v1391_v34 = vrot.slane %v5861_v53, 1  ;;  %v970_v56 = vrot.slane %v5655_v19, 1  ;;  %v972_v31 = vrot.slane %v5658_v20, 1 }
  0x5b   : > { %5150 = vmatmul.mubr.msk.bf16.gmra.mxu1 %vm481_vm3, %v5779_v62  ;;  %v1392_v62 = vsel %vm942_vm4, %v1389_v21, %v1391_v34 }
  0x5c   : > { %5168 = vmatmul.mubr.msk.bf16.gmra.mxu0 %vm481_vm3, %v951_v1  ;;  %5153 = vmatprep.mubr.msk.bf16.mxu1 %vm481_vm3, %v5655_v19  ;;  %v964_v1 = vrot.slane %v5760_v47, 1  ;;  %v2174_v47 = vrot.slane %v5989_v15, 2  ;;  %v973_v19 = vsel %vm942_vm4, %v970_v56, %v972_v31 }
  0x5d   : > { %5171 = vmatprep.mubr.msk.bf16.mxu0 %vm481_vm3, %v953_v2  ;;  %v1385_v2 = vrot.slane %v5828_v37, 1 }
  0x5e   : > { %v965_v42 = vsel %vm942_vm4, %v962_v0, %v964_v1  ;;  %v6003_v27 = vsel %vm2142_vm5, %v2172_v17, %v2174_v47  ;;  %v4827_v0 = vld [vmem:[%s7512_s1 + $0xe] sm:$0x3]  ;;  %v976_v17 = vrot.slane %v5688_v43, 1 }
  0x5f   : > { %v1386_v55 = vsel %vm942_vm4, %v1383_v41, %v1385_v2 }
  0x63   : > { %5154 = vmatmul.mubr.msk.bf16.gmra.mxu1 %vm481_vm3, %v5658_v20 }
  0x64   : > { %5172 = vmatmul.mubr.msk.bf16.gmra.mxu0 %vm481_vm3, %v955_v23  ;;  %5157 = vmatprep.mubr.msk.bf16.mxu1 %vm481_vm3, %v5669_v29  ;;  %v1388_v23 = vsel %vm942_vm4, %v1385_v2, %v1387_v6  ;;  %v6036_v2 = vand.u32 %v4827_v0, %v5612_v4 }
  0x65   : > { %5175 = vmatprep.mubr.msk.bf16.mxu0 %vm481_vm3, %v957_v24  ;;  %v966_v24 = vrot.slane %v5773_v57, 1 }
  0x67   : > { %v967_v41 = vsel %vm942_vm4, %v964_v1, %v966_v24  ;;  %v969_v57 = vsel %vm942_vm4, %v966_v24, %v968_v12  ;;  %v1395_v1 = vrot.slane %v5884_v45, 1  ;;  %v1708_v24 = vshll.u32 %v5823_v36, 16 }
  0x6b   : > { %5158 = vmatmul.mubr.msk.bf16.gmra.mxu1 %vm481_vm3, %v5688_v43 }
  0x6c   : > { %5176 = vmatmul.mubr.msk.bf16.gmra.mxu0 %vm481_vm3, %v959_v46  ;;  %5201 = vmatprep.mubr.msk.bf16.mxu1 %vm481_vm3, %v1384_v58  ;;  %v2176_v46 = vrot.slane %v6012_v32, 2  ;;  %v1393_v58 = vrot.slane %v5874_v60, 1 }
  0x6d   : > { %5179 = vmatprep.mubr.msk.bf16.mxu0 %vm481_vm3, %v961_v52  ;;  %v1390_v52 = vsel %vm942_vm4, %v1387_v6, %v1389_v21  ;;  %v971_v6 = vsel %vm942_vm4, %v968_v12, %v970_v56  ;;  %v1397_v12 = vrot.slane %v5893_v3, 1  ;;  %v1399_v21 = vrot.slane %v5901_v8, 1 }
  0x6e   : > { %v1394_v20 = vsel %vm942_vm4, %v1391_v34, %v1393_v58  ;;  %v1714_v56 = vshrl.u32 %v5828_v37, 16 }
  0x73   : > { %5202 = vmatmul.mubr.msk.bf16.vlgmr.msra.gmra.mxu1 %vm481_vm3, %v1386_v55  ;;  %v1697_v55 = vshrl.u32 %v5941_v33, 16 }
  0x74   : > { %5180 = vmatmul.mubr.msk.bf16.gmra.mxu0 %vm481_vm3, %v963_v14  ;;  %5205 = vmatprep.mubr.msk.bf16.mxu1 %vm481_vm3, %v1388_v23  ;;  %v1396_v14 = vsel %vm942_vm4, %v1393_v58, %v1395_v1  ;;  %v1705_v23 = vshrl.u32 %v5823_v36, 16  ;;  %v1400_v36 = vsel %vm942_vm4, %v1397_v12, %v1399_v21 }
  0x75   : > { %5183 = vmatprep.mubr.msk.bf16.mxu0 %vm481_vm3, %v965_v42  ;;  %5276 = vmatpush3.bf16.msra.mxu1 %v5815_v28  ;;  %v6023_v28 = vsel %vm2142_vm5, %v2174_v47, %v2176_v46  ;;  %v974_v42 = vrot.slane %v5669_v29, 1  ;;  %v1700_v47 = vshll.u32 %v5941_v33, 16  ;;  %v1699_v34 = vrot.slane %v1697_v55, 1 }
  0x76   : > { %5351 = vmatprep.subr.bf16.mxu1 %v6036_v2  ;;  %v1398_v33 = vsel %vm942_vm4, %v1395_v1, %v1397_v12  ;;  %v1726_v1 = vshll.u32 %v5841_v40, 16  ;;  %v1732_v12 = vshrl.u32 %v5850_v48, 16 }
  0x77   : > { %v975_v29 = vsel %vm942_vm4, %v972_v31, %v974_v42  ;;  %v977_v43 = vsel %vm942_vm4, %v974_v42, %v976_v17  ;;  %v1717_v31 = vshll.u32 %v5828_v37, 16 }
  0x79   : > { %v1719_v42 = vrot.slane %v1717_v31, 2 }
  0x7b   : > { %5206 = vmatmul.mubr.msk.bf16.gmra.mxu1 %vm481_vm3, %v1390_v52  ;;  %v1710_v52 = vrot.slane %v1708_v24, 2 }
  0x7c   : > { %5184 = vmatmul.mubr.msk.bf16.gmra.mxu0 %vm481_vm3, %v967_v41  ;;  %5209 = vmatprep.mubr.msk.bf16.mxu1 %vm481_vm3, %v1392_v62  ;;  %v1702_v41 = vrot.slane %v1700_v47, 2  ;;  %v978_v62 = vrot.slane %v5710_v59, 1  ;;  %v1728_v47 = vrot.slane %v1726_v1, 2  ;;  %v1753_v1 = vshll.u32 %v5874_v60, 16 }
  0x7d   : > { %5187 = vmatprep.mubr.msk.bf16.mxu0 %vm481_vm3, %v969_v57  ;;  %v1707_v57 = vrot.slane %v1705_v23, 1 }
  0x7e   : > { %v1703_v58 = vor.u32 %v1702_v41, %v1699_v34  ;;  %v979_v59 = vsel %vm942_vm4, %v976_v17, %v978_v62  ;;  %v1744_v34 = vshll.u32 %v5861_v53, 16  ;;  %v4847_v41 = vld [vmem:[%s7512_s1 + $0x10] sm:$0x3] }
  0x7f   : > { %v1711_v0 = vor.u32 %v1710_v52, %v1707_v57  ;;  %v1407_v57 = vrot.slane %v5959_v11, 1 }
  0x81   : > { %v1712_v37 = vsel %vm1695_vm6, %v1703_v58, %v1711_v0 }
  0x83   : > { %5210 = vmatmul.mubr.msk.bf16.gmra.mxu1 %vm481_vm3, %v1394_v20  ;;  %v1403_v20 = vrot.slane %v5922_v18, 1 }
  0x84   : > { %5188 = vmatmul.mubr.msk.bf16.gmra.mxu0 %vm481_vm3, %v971_v6  ;;  %5213 = vmatprep.mubr.msk.bf16.mxu1 %vm481_vm3, %v1396_v14  ;;  %v1723_v6 = vshrl.u32 %v5841_v40, 16  ;;  %v1716_v14 = vrot.slane %v1714_v56, 1  ;;  %v1746_v56 = vrot.slane %v1744_v34, 2  ;;  %v1413_v34 = vrot.slane %v5989_v15, 1 }
  0x85   : > { %5191 = vmatprep.mubr.msk.bf16.mxu0 %vm481_vm3, %v973_v19  ;;  %v1401_v19 = vrot.slane %v5913_v16, 1 }
  0x86   : > { %v1725_v55 = vrot.slane %v1723_v6, 1  ;;  %v1720_v24 = vor.u32 %v1719_v42, %v1716_v14  ;;  %v1411_v14 = vrot.slane %v5985_v13, 1 }
  0x87   : > { %v1402_v23 = vsel %vm942_vm4, %v1399_v21, %v1401_v19  ;;  %v1404_v40 = vsel %vm942_vm4, %v1401_v19, %v1403_v20  ;;  %v1405_v21 = vrot.slane %v5931_v10, 1 }
  0x88   : > { %v1729_v17 = vor.u32 %v1728_v47, %v1725_v55  ;;  %v1721_v52 = vsel %vm1695_vm6, %v1711_v0, %v1720_v24  ;;  %v1750_v0 = vshrl.u32 %v5874_v60, 16 }
  0x89   : > { %v1406_v31 = vsel %vm942_vm4, %v1403_v20, %v1405_v21  ;;  %v1408_v58 = vsel %vm942_vm4, %v1405_v21, %v1407_v57  ;;  %v1762_v20 = vshll.u32 %v5884_v45, 16  ;;  %v1415_v21 = vrot.slane %v6012_v32, 1 }
  0x8a   : > { %v1752_v60 = vrot.slane %v1750_v0, 1  ;;  %v1795_v0 = vshrl.u32 %v5922_v18, 16 }
  0x8b   : > { %5214 = vmatmul.mubr.msk.bf16.gmra.mxu1 %vm481_vm3, %v1398_v33  ;;  %v1764_v47 = vrot.slane %v1762_v20, 2 }
  0x8c   : > { %5192 = vmatmul.mubr.msk.bf16.gmra.mxu0 %vm481_vm3, %v975_v29  ;;  %5217 = vmatprep.mubr.msk.bf16.mxu1 %vm481_vm3, %v1400_v36  ;;  %v1735_v29 = vshll.u32 %v5850_v48, 16  ;;  %v1734_v48 = vrot.slane %v1732_v12, 1  ;;  %v1730_v36 = vsel %vm1695_vm6, %v1720_v24, %v1729_v17  ;;  %v1768_v24 = vshrl.u32 %v5893_v3, 16 }
  0x8d   : > { %5195 = vmatprep.mubr.msk.bf16.mxu0 %vm481_vm3, %v977_v43  ;;  %v1741_v43 = vshrl.u32 %v5861_v53, 16  ;;  %v6090_v53 = vand.u32 %v4847_v41, %v5612_v4  ;;  %v1759_v4 = vshrl.u32 %v5884_v45, 16  ;;  %v1771_v12 = vshll.u32 %v5893_v3, 16 }
  0x8e   : > { %v1737_v33 = vrot.slane %v1735_v29, 2 }
  0x8f   : > { %v1743_v62 = vrot.slane %v1741_v43, 1  ;;  %v1761_v55 = vrot.slane %v1759_v4, 1  ;;  %v1780_v43 = vshll.u32 %v5901_v8, 16 }
  0x90   : > { %v1738_v6 = vor.u32 %v1737_v33, %v1734_v48 }
  0x91   : > { %v1747_v19 = vor.u32 %v1746_v56, %v1743_v62  ;;  %v1765_v29 = vor.u32 %v1764_v47, %v1761_v55  ;;  %v1782_v33 = vrot.slane %v1780_v43, 2  ;;  %v5537_v62 = vld [vmem:[%s5630_s26 + $0x98] ss:$0 sps:$4 sm:$0x11]   ;;  %v1813_v47 = vshrl.u32 %v5959_v11, 16 }
  0x92   : > { %v1739_v42 = vsel %vm1695_vm6, %v1729_v17, %v1738_v6  ;;  %v1777_v17 = vshrl.u32 %v5901_v8, 16  ;;  %v1416_v8 = vsel %vm942_vm4, %v1413_v34, %v1415_v21  ;;  %v1822_v43 = vshrl.u32 %v5963_v25, 16 }
  0x93   : > { %5218 = vmatmul.mubr.msk.bf16.gmra.mxu1 %vm481_vm3, %v1402_v23 }
  0x94   : > { %5196 = vmatmul.mubr.msk.bf16.gmra.mxu0 %vm481_vm3, %v979_v59  ;;  %5221 = vmatprep.mubr.msk.bf16.mxu1 %vm481_vm3, %v1404_v40  ;;  %v1409_v59 = vrot.slane %v5963_v25, 1  ;;  %v1779_v3 = vrot.slane %v1777_v17, 1 }
  0x95   : > { %5239 = vmatprep.mubr.msk.bf16.mxu0 %vm481_vm3, %v1712_v37  ;;  %v1755_v37 = vrot.slane %v1753_v1, 2  ;;  %v1798_v1 = vshll.u32 %v5922_v18, 16  ;;  %v1804_v18 = vshrl.u32 %v5931_v10, 16 }
  0x96   : > { %v1410_v23 = vsel %vm942_vm4, %v1407_v57, %v1409_v59  ;;  %v1412_v45 = vsel %vm942_vm4, %v1409_v59, %v1411_v14  ;;  %v1770_v57 = vrot.slane %v1768_v24, 1 }
  0x97   : > { %v1756_v40 = vor.u32 %v1755_v37, %v1752_v60  ;;  %v1800_v60 = vrot.slane %v1798_v1, 2 }
  0x99   : > { %v1757_v41 = vsel %vm1695_vm6, %v1747_v19, %v1756_v40  ;;  %v1766_v48 = vsel %vm1695_vm6, %v1756_v40, %v1765_v29  ;;  %v1806_v40 = vrot.slane %v1804_v18, 1 }
  0x9b   : > { %5222 = vmatmul.mubr.msk.bf16.gmra.mxu1 %vm481_vm3, %v1406_v31  ;;  %v1786_v31 = vshrl.u32 %v5913_v16, 16 }
  0x9c   : > { %5240 = vmatmul.mubr.msk.bf16.vlgmr.msra.gmra.mxu0 %vm481_vm3, %v1721_v52  ;;  %5225 = vmatprep.mubr.msk.bf16.mxu1 %vm481_vm3, %v1408_v58  ;;  %v1773_v52 = vrot.slane %v1771_v12, 2  ;;  %v1789_v58 = vshll.u32 %v5913_v16, 16 }
  0x9d   : > { %5243 = vmatprep.mubr.msk.bf16.mxu0 %vm481_vm3, %v1730_v36  ;;  %5314 = vmatpush3.bf16.msra.mxu0 %v5856_v51  ;;  %v1748_v51 = vsel %vm1695_vm6, %v1738_v6, %v1747_v19  ;;  %v1414_v36 = vsel %vm942_vm4, %v1411_v14, %v1413_v34  ;;  %v1783_v6 = vor.u32 %v1782_v33, %v1779_v3  ;;  %v1417_v19 = vrot.slane %v5537_v62, 1 }
  0x9e   : > { %5389 = vmatprep.subr.bf16.mxu0 %v6090_v53  ;;  %v1774_v56 = vor.u32 %v1773_v52, %v1770_v57  ;;  %v1788_v20 = vrot.slane %v1786_v31, 1  ;;  %v1791_v59 = vrot.slane %v1789_v58, 2  ;;  %v1831_v34 = vshrl.u32 %v5985_v13, 16  ;;  %v6172_v31 = vld [vmem:[%s5630_s26 + $0x98] ss:$0 sps:$4 sm:$0x33]  }
  0x9f   : > { %v1418_v16 = vsel %vm942_vm4, %v1415_v21, %v1417_v19  ;;  %v1834_v21 = vshll.u32 %v5985_v13, 16  ;;  %v1824_v57 = vrot.slane %v1822_v43, 1  ;;  %v1840_v13 = vshrl.u32 %v5989_v15, 16  ;;  %v2450_v19 = vld [vmem:[%s5630_s26 + $0x10] sm:$0xc] }
  0xa0   : > { %v1775_v4 = vsel %vm1695_vm6, %v1765_v29, %v1774_v56  ;;  %v1784_v14 = vsel %vm1695_vm6, %v1774_v56, %v1783_v6  ;;  %v1792_v37 = vor.u32 %v1791_v59, %v1788_v20  ;;  %v1815_v29 = vrot.slane %v1813_v47, 1  ;;  %v6209_v47 = vld [vmem:[%s5630_s26 + $0x28] sm:$0xff]  }
  0xa1   : > { %v1836_v3 = vrot.slane %v1834_v21, 2  ;;  %v1849_v33 = vshrl.u32 %v6012_v32, 16 }
  0xa3   : > { %5226 = vmatmul.mubr.msk.bf16.gmra.mxu1 %vm481_vm3, %v1410_v23  ;;  %v1816_v23 = vshll.u32 %v5959_v11, 16  ;;  %v1825_v11 = vshll.u32 %v5963_v25, 16  ;;  %v1833_v25 = vrot.slane %v1831_v34, 1  ;;  %v1851_v58 = vrot.slane %v1849_v33, 1 }
  0xa4   : > { %5244 = vmatmul.mubr.msk.bf16.gmra.mxu0 %vm481_vm3, %v1739_v42  ;;  %5229 = vmatprep.mubr.msk.bf16.mxu1 %vm481_vm3, %v1412_v45  ;;  %v1797_v42 = vrot.slane %v1795_v0, 1  ;;  %v1793_v45 = vsel %vm1695_vm6, %v1783_v6, %v1792_v37  ;;  %v1861_v0 = vshll.u32 %v6172_v31, 16 }
  0xa5   : > { %5247 = vmatprep.mubr.msk.bf16.mxu0 %vm481_vm3, %v1748_v51  ;;  %v1807_v51 = vshll.u32 %v5931_v10, 16  ;;  %v1818_v17 = vrot.slane %v1816_v23, 2  ;;  %v1827_v52 = vrot.slane %v1825_v11, 2 }
  0xa6   : > { %v1801_v55 = vor.u32 %v1800_v60, %v1797_v42 }
  0xa7   : > { %v1809_v24 = vrot.slane %v1807_v51, 2  ;;  %v6205_v51 = vld [vmem:[%s5630_s26 + $0x20] sm:$0xff]  }
  0xa8   : > { %v1802_v12 = vsel %vm1695_vm6, %v1792_v37, %v1801_v55 }
  0xa9   : > { %v1810_v10 = vor.u32 %v1809_v24, %v1806_v40  ;;  %v2587_v40 = vrot.slane %v6209_v47, 2 }
  0xab   : > { %5230 = vmatmul.mubr.msk.bf16.gmra.mxu1 %vm481_vm3, %v1414_v36  ;;  %v1852_v36 = vshll.u32 %v6012_v32, 16 }
  0xac   : > { %5248 = vmatmul.mubr.msk.bf16.gmra.mxu0 %vm481_vm3, %v1757_v41  ;;  %5233 = vmatprep.mubr.msk.bf16.mxu1 %vm481_vm3, %v1416_v8  ;;  %v1811_v41 = vsel %vm1695_vm6, %v1801_v55, %v1810_v10  ;;  %v1842_v8 = vrot.slane %v1840_v13, 1  ;;  %v6260_v13 = vld [vmem:[%s5630_s26 + $0x48] sm:$0xff]  }
  0xad   : > { %5251 = vmatprep.mubr.msk.bf16.mxu0 %vm481_vm3, %v1766_v48  ;;  %7530 = vst [vmem:[#allocation9_spill] sm:$0xff] %v6260_v13 }
  0xb3   : > { %5234 = vmatmul.mubr.msk.bf16.gmra.mxu1 %vm481_vm3, %v1418_v16  ;;  %v6193_v16 = vld [vmem:[%s5630_s26 + $0x18] sm:$0xff]  }
  0xb4   : > { %5252 = vmatmul.mubr.msk.bf16.gmra.mxu0 %vm481_vm3, %v1775_v4  ;;  %5277 = vmatprep.mubr.msk.bf16.mxu1 %vm481_vm3, %v5846_v44  ;;  %v1819_v44 = vor.u32 %v1818_v17, %v1815_v29  ;;  %v6185_v4 = vld [vmem:[%s5630_s26 + $0x14] sm:$0xf]  ;;  %v2583_v37 = vrot.slane %v6193_v16, 2 }
  0xb5   : > { %5255 = vmatprep.mubr.msk.bf16.mxu0 %vm481_vm3, %v1784_v14  ;;  %v1863_v14 = vrot.slane %v1861_v0, 2  ;;  %v6190_v60 = vcombine.low %v2450_v19, %v6185_v4  ;;  %v6225_v17 = vld [vmem:[%s5630_s26 + $0x30] sm:$0xff]  }
  0xb6   : > { %v1820_v48 = vsel %vm1695_vm6, %v1810_v10, %v1819_v44 }
  0xbb   : > { %5278 = vmatmul.mubr.msk.bf16.vlgmr.msra.gmra.mxu1 %vm481_vm3, %v5853_v49  ;;  %v1828_v49 = vor.u32 %v1827_v52, %v1824_v57 }
  0xbc   : > { %5256 = vmatmul.mubr.msk.bf16.gmra.mxu0 %vm481_vm3, %v1793_v45  ;;  %5281 = vmatprep.mubr.msk.bf16.mxu1 %vm481_vm3, %v5864_v54  ;;  %v1843_v54 = vshll.u32 %v5989_v15, 16 }
  0xbd   : > { %5259 = vmatprep.mubr.msk.bf16.mxu0 %vm481_vm3, %v1802_v12  ;;  %5352 = vmatpush3.bf16.msra.mxu1 %v6036_v2  ;;  %v1837_v2 = vor.u32 %v1836_v3, %v1833_v25  ;;  %v1829_v62 = vsel %vm1695_vm6, %v1819_v44, %v1828_v49  ;;  %v6252_v3 = vld [vmem:[%s5630_s26 + $0x40] sm:$0xff]  }
  0xbe   : > { %v1845_v56 = vrot.slane %v1843_v54, 2 }
  0xbf   : > { %v1838_v15 = vsel %vm1695_vm6, %v1828_v49, %v1837_v2 }
  0xc0   : > { %v1846_v6 = vor.u32 %v1845_v56, %v1842_v8 }
  0xc2   : > { %v1847_v20 = vsel %vm1695_vm6, %v1837_v2, %v1846_v6 }
  0xc3   : > { %5282 = vmatmul.mubr.msk.bf16.gmra.mxu1 %vm481_vm3, %v5878_v63  ;;  %v1854_v63 = vrot.slane %v1852_v36, 2 }
  0xc4   : > { %5260 = vmatmul.mubr.msk.bf16.gmra.mxu0 %vm481_vm3, %v1811_v41  ;;  %5285 = vmatprep.mubr.msk.bf16.mxu1 %vm481_vm3, %v5887_v35  ;;  %v1858_v35 = vshrl.u32 %v6172_v31, 16 }
  0xc5   : > { %5263 = vmatprep.mubr.msk.bf16.mxu0 %vm481_vm3, %v1820_v48  ;;  %v1855_v1 = vor.u32 %v1854_v63, %v1851_v58  ;;  %v2897_v58 = vshrl.u32 %v6190_v60, 16  ;;  %v2900_v63 = vshll.u32 %v6190_v60, 16 }
  0xc6   : > { %v1860_v59 = vrot.slane %v1858_v35, 1 }
  0xc7   : > { %v1856_v42 = vsel %vm1695_vm6, %v1846_v6, %v1855_v1  ;;  %v2905_v6 = vshrl.u32 %v6193_v16, 16 }
  0xcb   : > { %5286 = vmatmul.mubr.msk.bf16.gmra.mxu1 %vm481_vm3, %v5896_v5  ;;  %v1864_v5 = vor.u32 %v1863_v14, %v1860_v59  ;;  %v6294_v59 = vld [vmem:[%s5630_s26 + $0x58] sm:$0xff]  }
  0xcc   : > { %5264 = vmatmul.mubr.msk.bf16.gmra.mxu0 %vm481_vm3, %v1829_v62  ;;  %5289 = vmatprep.mubr.msk.bf16.mxu1 %vm481_vm3, %v5904_v9  ;;  %v2582_v9 = vrot.slane %v6190_v60, 2  ;;  %v2595_v62 = vrot.slane %v6260_v13, 2  ;;  %7533 = vst [vmem:[#allocation12_spill] sm:$0xff] %v6294_v59 }
  0xcd   : > { %5267 = vmatprep.mubr.msk.bf16.mxu0 %vm481_vm3, %v1838_v15  ;;  %v1865_v18 = vsel %vm1695_vm6, %v1855_v1, %v1864_v5  ;;  %v6288_v1 = vld [vmem:[%s5630_s26 + $0x50] sm:$0xff]   ;;  %v2899_v5 = vrot.slane %v2897_v58, 2 }
  0xce   : > { %v2584_v55 = vsel %vm2142_vm5, %v2582_v9, %v2583_v37  ;;  %7532 = vst [vmem:[#allocation11_spill] sm:$0xff] %v6288_v1  ;;  %v2902_v9 = vrot.slane %v2900_v63, 3  ;;  %v6331_v63 = vld [vmem:[%s5630_s26 + $0x68] sm:$0xff]  }
  0xcf   : > { %7534 = vst [vmem:[#allocation13_spill] sm:$0xff] %v6331_v63 }
  0xd3   : > { %5290 = vmatmul.mubr.msk.bf16.gmra.mxu1 %vm481_vm3, %v5916_v7  ;;  %v2585_v7 = vrot.slane %v6205_v51, 2 }
  0xd4   : > { %5268 = vmatmul.mubr.msk.bf16.gmra.mxu0 %vm481_vm3, %v1847_v20  ;;  %5293 = vmatprep.mubr.msk.bf16.mxu1 %vm481_vm3, %v5925_v22 }
  0xd5   : > { %5271 = vmatprep.mubr.msk.bf16.mxu0 %vm481_vm3, %v1856_v42  ;;  %v2586_v29 = vsel %vm2142_vm5, %v2583_v37, %v2585_v7  ;;  %v2588_v11 = vsel %vm2142_vm5, %v2585_v7, %v2587_v40  ;;  %v2907_v37 = vrot.slane %v2905_v6, 2 }
  0xdb   : > { %v6214_v45 = vpop.f32.mrf.mxu1  ;;  %5294 = vmatmul.mubr.msk.bf16.gmra.mxu1 %vm481_vm3, %v5935_v26  ;;  %v6231_v26 = vld [vmem:[%s5630_s26 + $0x38] sm:$0xff]  }
  0xdc   : > { %v5089_v23 = vpop.f32.mrf.mxu0  ;;  %5272 = vmatmul.mubr.msk.bf16.gmra.mxu0 %vm481_vm3, %v1865_v18  ;;  %7523 = vst [vmem:[#allocation2_spill] sm:$0xff] %v6214_v45  ;;  %5297 = vmatprep.mubr.msk.bf16.mxu1 %vm481_vm3, %v5944_v38  ;;  %v2589_v38 = vrot.slane %v6225_v17, 2  ;;  %v2591_v57 = vrot.slane %v6231_v26, 2 }
  0xdd   : > { %5315 = vmatprep.mubr.msk.bf16.mxu0 %vm481_vm3, %v2584_v55  ;;  %v6221_v24 = vpop.f32.mrf.mxu1 }
  0xde   : > { %v577_v22 = vpop.f32.mrf.mxu0  ;;  %7524 = vst [vmem:[#allocation3_spill] sm:$0xff] %v6221_v24  ;;  %v2590_v25 = vsel %vm2142_vm5, %v2587_v40, %v2589_v38  ;;  %v2599_v40 = vrot.slane %v6294_v59, 2  ;;  %v6453_v24 = vld [vmem:[%s5630_s26 + $0x98] sm:$0xff]  }
  0xdf   : > { %v6227_v10 = vpop.f32.mrf.mxu1 }
  0xe0   : > { %v5090_v12 = vpop.f32.mrf.mxu0  ;;  %7525 = vst [vmem:[#allocation4_spill] sm:$0xff] %v6227_v10 }
  0xe1   : > { %v6233_v44 = vpop.f32.mrf.mxu1 }
  0xe2   : > { %v580_v43 = vpop.f32.mrf.mxu0  ;;  %7526 = vst [vmem:[#allocation5_spill] sm:$0xff] %v6233_v44 }
  0xe3   : > { %v6239_v21 = vpop.f32.mrf.mxu1  ;;  %5298 = vmatmul.mubr.msk.bf16.gmra.mxu1 %vm481_vm3, %v5949_v39  ;;  %v2592_v39 = vsel %vm2142_vm5, %v2589_v38, %v2591_v57 }
  0xe4   : > { %v5093_v34 = vpop.f32.mrf.mxu0  ;;  %5316 = vmatmul.mubr.msk.bf16.vlgmr.msra.gmra.mxu0 %vm481_vm3, %v2586_v29  ;;  %7527 = vst [vmem:[#allocation6_spill] sm:$0xff] %v6239_v21  ;;  %5301 = vmatprep.mubr.msk.bf16.mxu1 %vm481_vm3, %v5971_v30  ;;  %v2593_v30 = vrot.slane %v6252_v3, 2  ;;  %v2178_v29 = vrot.slane %v6172_v31, 2  ;;  %v6325_v31 = vld [vmem:[%s5630_s26 + $0x60] sm:$0xff]  }
  0xe5   : > { %5319 = vmatprep.mubr.msk.bf16.mxu0 %vm481_vm3, %v2588_v11  ;;  %5390 = vmatpush3.bf16.msra.mxu0 %v6090_v53  ;;  %v6246_v52 = vpop.f32.mrf.mxu1  ;;  %v2917_v11 = vshll.u32 %v6205_v51, 16  ;;  %v2601_v32 = vrot.slane %v6325_v31, 2 }
  0xe6   : > { %v593_v41 = vpop.f32.mrf.mxu0  ;;  %7528 = vst [vmem:[#allocation7_spill] sm:$0xff] %v6246_v52  ;;  %v2594_v0 = vsel %vm2142_vm5, %v2591_v57, %v2593_v30 }
  0xe7   : > { %v6254_v53 = vpop.f32.mrf.mxu1 }
  0xe8   : > { %v6248_v48 = vpop.f32.mrf.mxu0  ;;  %7529 = vst [vmem:[#allocation8_spill] sm:$0xff] %v6254_v53 }
  0xe9   : > { %v6262_v54 = vpop.f32.mrf.mxu1 }
  0xea   : > { %v6256_v49 = vpop.f32.mrf.mxu0  ;;  %7531 = vst [vmem:[#allocation10_spill] sm:$0xff] %v6262_v54  ;;  %v6413_v54 = vld [vmem:[%s5630_s26 + $0x88] sm:$0xff]  }
  0xeb   : > { %v5127_v33 = vpop.f32.mrf.mxu1  ;;  %5302 = vmatmul.mubr.msk.bf16.gmra.mxu1 %vm481_vm3, %v5976_v50  ;;  %v2908_v50 = vshll.u32 %v6193_v16, 16 }
  0xec   : > { %v6264_v2 = vpop.f32.mrf.mxu0  ;;  %5320 = vmatmul.mubr.msk.bf16.gmra.mxu0 %vm481_vm3, %v2590_v25  ;;  %v6274_v8 = vadd.f32 %v5127_v33, %v5089_v23  ;;  %5305 = vmatprep.mubr.msk.bf16.mxu1 %vm481_vm3, %v5998_v61  ;;  %v2596_v61 = vsel %vm2142_vm5, %v2593_v30, %v2595_v62  ;;  %v2597_v23 = vrot.slane %v6288_v1, 2 }
  0xed   : > { %5323 = vmatprep.mubr.msk.bf16.mxu0 %vm481_vm3, %v2592_v39  ;;  %v793_v56 = vpop.f32.mrf.mxu1  ;;  %v2910_v18 = vrot.slane %v2908_v50, 3  ;;  %v2923_v39 = vshrl.u32 %v6209_v47, 16 }
  0xee   : > { %v6271_v36 = vpop.f32.mrf.mxu0  ;;  %v6284_v35 = vadd.f32 %v793_v56, %v577_v22  ;;  %v2600_v58 = vsel %vm2142_vm5, %v2597_v23, %v2599_v40 }
  0xef   : > { %v5128_v19 = vpop.f32.mrf.mxu1  ;;  %v2911_v25 = vor.u32 %v2910_v18, %v2907_v37  ;;  %v2603_v37 = vrot.slane %v6331_v63, 2 }
  0xf0   : > { %v6278_v15 = vpop.f32.mrf.mxu0  ;;  %v6296_v14 = vadd.f32 %v5128_v19, %v5090_v12 }
  0xf1   : > { %v796_v42 = vpop.f32.mrf.mxu1 }
  0xf2   : > { %v6290_v20 = vpop.f32.mrf.mxu0  ;;  %v6301_v55 = vadd.f32 %v796_v42, %v580_v43  ;;  %v2914_v43 = vshrl.u32 %v6205_v51, 16  ;;  %v2925_v42 = vrot.slane %v2923_v39, 2 }
  0xf3   : > { %v5131_v7 = vpop.f32.mrf.mxu1  ;;  %5306 = vmatmul.mubr.msk.bf16.gmra.mxu1 %vm481_vm3, %v6003_v27  ;;  %v2903_v27 = vor.u32 %v2902_v9, %v2899_v5 }
  0xf4   : > { %v6298_v60 = vpop.f32.mrf.mxu0  ;;  %5324 = vmatmul.mubr.msk.bf16.gmra.mxu0 %vm481_vm3, %v2594_v0  ;;  %v6310_v12 = vadd.f32 %v5131_v7, %v5093_v34  ;;  %5309 = vmatprep.mubr.msk.bf16.mxu1 %vm481_vm3, %v6023_v28  ;;  %v2926_v34 = vshll.u32 %v6209_v47, 16  ;;  %v2598_v28 = vsel %vm2142_vm5, %v2595_v62, %v2597_v23  ;;  %v2916_v50 = vrot.slane %v2914_v43, 2 }
  0xf5   : > { %5327 = vmatprep.mubr.msk.bf16.mxu0 %vm481_vm3, %v2596_v61  ;;  %v809_v38 = vpop.f32.mrf.mxu1  ;;  %v2919_v0 = vrot.slane %v2917_v11, 3  ;;  %v2912_v61 = vsel %vm2895_vm7, %v2903_v27, %v2911_v25  ;;  %v2932_v23 = vshrl.u32 %v6225_v17, 16  ;;  %v2935_v7 = vshll.u32 %v6225_v17, 16 }
  0xf6   : > { %v6307_v22 = vpop.f32.mrf.mxu0  ;;  %v6321_v30 = vadd.f32 %v809_v38, %v593_v41  ;;  %v2179_v41 = vsel %vm2142_vm5, %v2176_v46, %v2178_v29  ;;  %v2928_v5 = vrot.slane %v2926_v34, 3  ;;  %v2941_v38 = vshrl.u32 %v6231_v26, 16  ;;  %v6367_v34 = vld [vmem:[%s5630_s26 + $0x70] sm:$0xff]  }
  0xf7   : > { %v5132_v33 = vpop.f32.mrf.mxu1  ;;  %v2944_v27 = vshll.u32 %v6231_v26, 16 }
  0xf8   : > { %v6317_v57 = vpop.f32.mrf.mxu0  ;;  %v6334_v6 = vadd.f32 %v5132_v33, %v6248_v48  ;;  %v2929_v11 = vor.u32 %v2928_v5, %v2925_v42  ;;  %v2943_v5 = vrot.slane %v2941_v38, 2  ;;  %v2953_v38 = vshll.u32 %v6252_v3, 16 }
  0xf9   : > { %v812_v62 = vpop.f32.mrf.mxu1 }
  0xfa   : > { %v6327_v56 = vpop.f32.mrf.mxu0  ;;  %v6344_v9 = vadd.f32 %v812_v62, %v6256_v49  ;;  %v2920_v49 = vor.u32 %v2919_v0, %v2916_v50  ;;  %v2934_v62 = vrot.slane %v2932_v23, 2  ;;  %v2955_v53 = vrot.slane %v2953_v38, 3 }
  0xfb   : > { %v5135_v48 = vpop.f32.mrf.mxu1  ;;  %5310 = vmatmul.mubr.msk.bf16.gmra.mxu1 %vm481_vm3, %v2179_v41  ;;  %v6373_v41 = vld [vmem:[%s5630_s26 + $0x78] sm:$0xff]  }
  0xfc   : > { %v6339_v19 = vpop.f32.mrf.mxu0  ;;  %5328 = vmatmul.mubr.msk.bf16.gmra.mxu0 %vm481_vm3, %v2598_v28  ;;  %v6353_v18 = vadd.f32 %v5135_v48, %v6264_v2  ;;  %5353 = vmatprep.mubr.msk.bf16.mxu1 %vm481_vm3, %v2912_v61  ;;  %v2602_v2 = vsel %vm2142_vm5, %v2599_v40, %v2601_v32  ;;  %v2921_v0 = vsel %vm2895_vm7, %v2911_v25, %v2920_v49  ;;  %v2937_v61 = vrot.slane %v2935_v7, 3 }
  0xfd   : > { %5331 = vmatprep.mubr.msk.bf16.mxu0 %vm481_vm3, %v2600_v58  ;;  %v825_v29 = vpop.f32.mrf.mxu1  ;;  %v2604_v58 = vsel %vm2142_vm5, %v2601_v32, %v2603_v37  ;;  %v2930_v40 = vsel %vm2895_vm7, %v2920_v49, %v2929_v11  ;;  %v2946_v48 = vrot.slane %v2944_v27, 3  ;;  %v2607_v23 = vrot.slane %v6373_v41, 2 }
  0xfe   : > { %v6349_v46 = vpop.f32.mrf.mxu0  ;;  %v6363_v39 = vadd.f32 %v825_v29, %v6271_v36  ;;  %v2950_v49 = vshrl.u32 %v6252_v3, 16 }
  0xff   : > { %v5136_v28 = vpop.f32.mrf.mxu1 }
 0x100   : > { %v6358_v43 = vpop.f32.mrf.mxu0  ;;  %v6376_v50 = vadd.f32 %v5136_v28, %v6278_v15  ;;  %v2605_v15 = vrot.slane %v6367_v34, 2  ;;  %v2947_v28 = vor.u32 %v2946_v48, %v2943_v5  ;;  %v2952_v52 = vrot.slane %v2950_v49, 2 }
 0x101   : > { %v828_v36 = vpop.f32.mrf.mxu1  ;;  %v2611_v49 = vrot.slane %v6413_v54, 2 }
 0x102   : > { %v6369_v33 = vpop.f32.mrf.mxu0  ;;  %v6384_v32 = vadd.f32 %v828_v36, %v6290_v20  ;;  %v2938_v20 = vor.u32 %v2937_v61, %v2934_v62 }
 0x103   : > { %v5139_v29 = vpop.f32.mrf.mxu1  ;;  %5354 = vmatmul.mubr.msk.bf16.vlgmr.msra.gmra.mxu1 %vm481_vm3, %v2921_v0  ;;  %v2962_v0 = vshll.u32 %v6260_v13, 16 }
 0x104   : > { %v6379_v42 = vpop.f32.mrf.mxu0  ;;  %5332 = vmatmul.mubr.msk.bf16.gmra.mxu0 %vm481_vm3, %v2602_v2  ;;  %v6393_v7 = vadd.f32 %v5139_v29, %v6298_v60  ;;  %5357 = vmatprep.mubr.msk.bf16.mxu1 %vm481_vm3, %v2930_v40  ;;  %v2606_v60 = vsel %vm2142_vm5, %v2603_v37, %v2605_v15  ;;  %v6407_v29 = vld [vmem:[%s5630_s26 + $0x80] sm:$0xff]   ;;  %v2608_v40 = vsel %vm2142_vm5, %v2605_v15, %v2607_v23 }
 0x105   : > { %5335 = vmatprep.mubr.msk.bf16.mxu0 %vm481_vm3, %v2604_v58  ;;  %v841_v27 = vpop.f32.mrf.mxu1  ;;  %v2959_v58 = vshrl.u32 %v6260_v13, 16  ;;  %v2939_v48 = vsel %vm2895_vm7, %v2929_v11, %v2938_v20  ;;  %v2948_v37 = vsel %vm2895_vm7, %v2938_v20, %v2947_v28  ;;  %v2964_v44 = vrot.slane %v2962_v0, 3 }
 0x106   : > { %v6389_v25 = vpop.f32.mrf.mxu0  ;;  %v6403_v36 = vadd.f32 %v841_v27, %v6307_v22  ;;  %v2968_v20 = vshrl.u32 %v6288_v1, 16 }
 0x107   : > { %v5140_v62 = vpop.f32.mrf.mxu1  ;;  %v2961_v21 = vrot.slane %v2959_v58, 2  ;;  %v2971_v58 = vshll.u32 %v6288_v1, 16 }
 0x108   : > { %v6398_v2 = vpop.f32.mrf.mxu0  ;;  %v6416_v5 = vadd.f32 %v5140_v62, %v6317_v57  ;;  %v2609_v57 = vrot.slane %v6407_v29, 2  ;;  %v2970_v45 = vrot.slane %v2968_v20, 2 }
 0x109   : > { %v844_v22 = vpop.f32.mrf.mxu1 }
 0x10a   : > { %v6409_v61 = vpop.f32.mrf.mxu0  ;;  %v6424_v15 = vadd.f32 %v844_v22, %v6327_v56  ;;  %v2956_v56 = vor.u32 %v2955_v53, %v2952_v52  ;;  %v2980_v22 = vshll.u32 %v6294_v59, 16 }
 0x10b   : > { %v5143_v62 = vpop.f32.mrf.mxu1  ;;  %5358 = vmatmul.mubr.msk.bf16.gmra.mxu1 %vm481_vm3, %v2939_v48  ;;  %v2977_v48 = vshrl.u32 %v6294_v59, 16  ;;  %v2973_v59 = vrot.slane %v2971_v58, 3  ;;  %v2615_v58 = vrot.slane %v6453_v24, 2 }
 0x10c   : > { %v6419_v27 = vpop.f32.mrf.mxu0  ;;  %5336 = vmatmul.mubr.msk.bf16.gmra.mxu0 %vm481_vm3, %v2606_v60  ;;  %v6433_v38 = vadd.f32 %v5143_v62, %v6339_v19  ;;  %5361 = vmatprep.mubr.msk.bf16.mxu1 %vm481_vm3, %v2948_v37  ;;  %v2610_v19 = vsel %vm2142_vm5, %v2607_v23, %v2609_v57  ;;  %v6447_v62 = vld [vmem:[%s5630_s26 + $0x90] sm:$0xff]   ;;  %v2612_v37 = vsel %vm2142_vm5, %v2609_v57, %v2611_v49 }
 0x10d   : > { %5339 = vmatprep.mubr.msk.bf16.mxu0 %vm481_vm3, %v2608_v40  ;;  %v857_v0 = vpop.f32.mrf.mxu1  ;;  %v2965_v40 = vor.u32 %v2964_v44, %v2961_v21  ;;  %v2957_v21 = vsel %vm2895_vm7, %v2947_v28, %v2956_v56  ;;  %v2979_v1 = vrot.slane %v2977_v48, 2  ;;  %v2989_v48 = vshll.u32 %v6325_v31, 16 }
 0x10e   : > { %v6429_v11 = vpop.f32.mrf.mxu0  ;;  %v6443_v10 = vadd.f32 %v857_v0, %v6349_v46 }
 0x10f   : > { %v5144_v52 = vpop.f32.mrf.mxu1  ;;  %v2966_v23 = vsel %vm2895_vm7, %v2956_v56, %v2965_v40  ;;  %v2986_v56 = vshrl.u32 %v6325_v31, 16 }
 0x110   : > { %v6438_v60 = vpop.f32.mrf.mxu0  ;;  %7535 = vst [vmem:[#allocation14_spill] sm:$0xff] %v6443_v10  ;;  %v6456_v44 = vadd.f32 %v5144_v52, %v6358_v43  ;;  %v2982_v10 = vrot.slane %v2980_v22, 3  ;;  %v2613_v43 = vrot.slane %v6447_v62, 2  ;;  %v2974_v22 = vor.u32 %v2973_v59, %v2970_v45 }
 0x111   : > { %v860_v46 = vpop.f32.mrf.mxu1  ;;  %v2988_v59 = vrot.slane %v2986_v56, 2 }
 0x112   : > { %v6449_v53 = vpop.f32.mrf.mxu0  ;;  %v6462_v57 = vadd.f32 %v860_v46, %v6369_v33  ;;  %v2995_v46 = vshrl.u32 %v6331_v63, 16  ;;  %v2616_v45 = vsel %vm2142_vm5, %v2613_v43, %v2615_v58 }
 0x113   : > { %v5147_v28 = vpop.f32.mrf.mxu1  ;;  %5362 = vmatmul.mubr.msk.bf16.gmra.mxu1 %vm481_vm3, %v2957_v21  ;;  %v2983_v21 = vor.u32 %v2982_v10, %v2979_v1 }
 0x114   : > { %v5165_v0 = vpop.f32.mrf.mxu0  ;;  %5340 = vmatmul.mubr.msk.bf16.gmra.mxu0 %vm481_vm3, %v2610_v19  ;;  %7536 = vst [vmem:[#allocation15_spill] sm:$0xff] %v6462_v57  ;;  %v6474_v33 = vadd.f32 %v5147_v28, %v6379_v42  ;;  %5365 = vmatprep.mubr.msk.bf16.mxu1 %vm481_vm3, %v2966_v23  ;;  %v3336_v19 = vld [vmem:[%s5630_s26 + $0x10] sm:$0x8]  ;;  %v5558_v28 = vld [vmem:[%s5630_s26 + $0xa0] ss:$0 sps:$4 sm:$0x33]  }
 0x115   : > { %v6465_v13 = vadd.f32 %v5165_v0, %v6274_v8  ;;  %5343 = vmatprep.mubr.msk.bf16.mxu0 %vm481_vm3, %v2612_v37  ;;  %v873_v52 = vpop.f32.mrf.mxu1  ;;  %v2998_v0 = vshll.u32 %v6331_v63, 16  ;;  %v4848_v10 = vcombine.low %v3336_v19, %v6185_v4  ;;  %v2997_v63 = vrot.slane %v2995_v46, 2 }
 0x116   : > { %v1071_v20 = vpop.f32.mrf.mxu0  ;;  %v6484_v57 = vadd.f32 %v873_v52, %v6389_v25 }
 0x117   : > { %v6477_v8 = vadd.f32 %v1071_v20, %v6284_v35  ;;  %v2614_v35 = vsel %vm2142_vm5, %v2611_v49, %v2613_v43  ;;  %v5148_v20 = vpop.f32.mrf.mxu1  ;;  %v2984_v49 = vsel %vm2895_vm7, %v2974_v22, %v2983_v21  ;;  %v3000_v43 = vrot.slane %v2998_v0, 3 }
 0x118   : > { %v5166_v37 = vpop.f32.mrf.mxu0  ;;  %v6494_v1 = vadd.f32 %v5148_v20, %v6398_v2  ;;  %v3343_v19 = vrot.slane %v4848_v10, 3 }
 0x119   : > { %7537 = vst [vmem:[#allocation16_spill] sm:$0xff] %v6477_v8  ;;  %v6487_v42 = vadd.f32 %v5166_v37, %v6296_v14  ;;  %v2991_v8 = vrot.slane %v2989_v48, 3  ;;  %v2975_v14 = vsel %vm2895_vm7, %v2965_v40, %v2974_v22  ;;  %v876_v52 = vpop.f32.mrf.mxu1  ;;  %v3004_v22 = vshrl.u32 %v6367_v34, 16 }
 0x11a   : > { %v1074_v23 = vpop.f32.mrf.mxu0  ;;  %v6503_v56 = vadd.f32 %v876_v52, %v6409_v61  ;;  %v3001_v20 = vor.u32 %v3000_v43, %v2997_v63 }
 0x11b   : > { %v6497_v25 = vadd.f32 %v1074_v23, %v6301_v55  ;;  %v2617_v55 = vrot.slane %v5558_v28, 2  ;;  %v5151_v2 = vpop.f32.mrf.mxu1  ;;  %5366 = vmatmul.mubr.msk.bf16.gmra.mxu1 %vm481_vm3, %v2975_v14  ;;  %v2992_v48 = vor.u32 %v2991_v8, %v2988_v59  ;;  %v3013_v8 = vshrl.u32 %v6373_v41, 16 }
 0x11c   : > { %v5169_v37 = vpop.f32.mrf.mxu0  ;;  %5344 = vmatmul.mubr.msk.bf16.gmra.mxu0 %vm481_vm3, %v2614_v35  ;;  %v3344_v35 = vrot.slane %v6193_v16, 3  ;;  %v6513_v46 = vadd.f32 %v5151_v2, %v6419_v27  ;;  %5369 = vmatprep.mubr.msk.bf16.mxu1 %vm481_vm3, %v2984_v49  ;;  %v3016_v16 = vshll.u32 %v6373_v41, 16 }
 0x11d   : > { %v6506_v4 = vadd.f32 %v5169_v37, %v6310_v12  ;;  %5347 = vmatprep.mubr.msk.bf16.mxu0 %vm481_vm3, %v2616_v45  ;;  %v3007_v12 = vshll.u32 %v6367_v34, 16  ;;  %v889_v0 = vpop.f32.mrf.mxu1  ;;  %v2993_v10 = vsel %vm2895_vm7, %v2983_v21, %v2992_v48  ;;  %v3006_v37 = vrot.slane %v3004_v22, 2 }
 0x11e   : > { %v1087_v40 = vpop.f32.mrf.mxu0  ;;  %v6523_v23 = vadd.f32 %v889_v0, %v6429_v11  ;;  %v3345_v14 = vsel %vm3342_vm8, %v3343_v19, %v3344_v35  ;;  %v3348_v19 = vrot.slane %v6209_v47, 3  ;;  %v3025_v22 = vshll.u32 %v6407_v29, 16 }
 0x11f   : > { %v6516_v61 = vadd.f32 %v1087_v40, %v6321_v30  ;;  %v2618_v30 = vsel %vm2142_vm5, %v2615_v58, %v2617_v55  ;;  %v5152_v45 = vpop.f32.mrf.mxu1  ;;  %v3009_v11 = vrot.slane %v3007_v12, 3  ;;  %v3015_v58 = vrot.slane %v3013_v8, 2 }
 0x120   : > { %v5170_v28 = vpop.f32.mrf.mxu0  ;;  %v6532_v63 = vadd.f32 %v5152_v45, %v6438_v60  ;;  %v3018_v55 = vrot.slane %v3016_v16, 3  ;;  %v3034_v8 = vshll.u32 %v6413_v54, 16 }
 0x121   : > { %v6526_v27 = vadd.f32 %v5170_v28, %v6334_v6  ;;  %v892_v49 = vpop.f32.mrf.mxu1  ;;  %v3002_v6 = vsel %vm2895_vm7, %v2992_v48, %v3001_v20  ;;  %v3031_v28 = vshrl.u32 %v6413_v54, 16 }
 0x122   : > { %v1090_v59 = vpop.f32.mrf.mxu0  ;;  %v6540_v21 = vadd.f32 %v892_v49, %v6449_v53  ;;  %v3010_v53 = vor.u32 %v3009_v11, %v3006_v37  ;;  %v3019_v0 = vor.u32 %v3018_v55, %v3015_v58  ;;  %v3027_v37 = vrot.slane %v3025_v22, 3 }
 0x123   : > { %v6535_v52 = vadd.f32 %v1090_v59, %v6344_v9  ;;  %v3346_v9 = vrot.slane %v6205_v51, 3  ;;  %v6547_v60 = vpop.f32.mrf.mxu1  ;;  %5370 = vmatmul.mubr.msk.bf16.gmra.mxu1 %vm481_vm3, %v2993_v10  ;;  %v3352_v55 = vrot.slane %v6231_v26, 3 }
 0x124   : > { %v5173_v43 = vpop.f32.mrf.mxu0  ;;  %5348 = vmatmul.mubr.msk.bf16.gmra.mxu0 %vm481_vm3, %v2618_v30  ;;  %5373 = vmatprep.mubr.msk.bf16.mxu1 %vm481_vm3, %v3002_v6  ;;  %v3011_v10 = vsel %vm2895_vm7, %v3001_v20, %v3010_v53 }
 0x125   : > { %v6543_v2 = vadd.f32 %v5173_v43, %v6353_v18  ;;  %5391 = vmatprep.mubr.msk.bf16.mxu0 %vm481_vm3, %v3345_v14  ;;  %v3022_v18 = vshrl.u32 %v6407_v29, 16  ;;  %v6557_v12 = vpop.f32.mrf.mxu1  ;;  %v3349_v45 = vsel %vm3342_vm8, %v3346_v9, %v3348_v19  ;;  %v3036_v43 = vrot.slane %v3034_v8, 3 }
 0x126   : > { %v1103_v40 = vpop.f32.mrf.mxu0 }
 0x127   : > { %v6552_v48 = vadd.f32 %v1103_v40, %v6363_v39  ;;  %v3347_v39 = vsel %vm3342_vm8, %v3344_v35, %v3346_v9  ;;  %v6565_v16 = vpop.f32.mrf.mxu1  ;;  %v3024_v14 = vrot.slane %v3022_v18, 2  ;;  %v3033_v35 = vrot.slane %v3031_v28, 2 }
 0x128   : > { %v5174_v51 = vpop.f32.mrf.mxu0  ;;  %v3040_v9 = vshrl.u32 %v6447_v62, 16  ;;  %v3043_v40 = vshll.u32 %v6447_v62, 16  ;;  %v3052_v28 = vshll.u32 %v6453_v24, 16 }
 0x129   : > { %v6562_v47 = vadd.f32 %v5174_v51, %v6376_v50  ;;  %v6572_v11 = vpop.f32.mrf.mxu1  ;;  %v3020_v50 = vsel %vm2895_vm7, %v3010_v53, %v3019_v0  ;;  %v3037_v22 = vor.u32 %v3036_v43, %v3033_v35  ;;  %v3049_v51 = vshrl.u32 %v6453_v24, 16 }
 0x12a   : > { %v1106_v30 = vpop.f32.mrf.mxu0  ;;  %v3054_v43 = vrot.slane %v3052_v28, 3 }
 0x12b   : > { %v6569_v59 = vadd.f32 %v1106_v30, %v6384_v32  ;;  %v3350_v32 = vrot.slane %v6225_v17, 3  ;;  %v6581_v58 = vpop.f32.mrf.mxu1  ;;  %5374 = vmatmul.mubr.msk.bf16.gmra.mxu1 %vm481_vm3, %v3011_v10  ;;  %v3045_v10 = vrot.slane %v3043_v40, 3  ;;  %v3051_v35 = vrot.slane %v3049_v51, 2  ;;  %v7539_v40 = vld [vmem:[#allocation9_spill] sm:$0xff] }
 0x12c   : > { %v5177_v49 = vpop.f32.mrf.mxu0  ;;  %5392 = vmatmul.mubr.msk.bf16.vlgmr.msra.gmra.mxu0 %vm481_vm3, %v3347_v39  ;;  %5377 = vmatprep.mubr.msk.bf16.mxu1 %vm481_vm3, %v3020_v50 }
 0x12d   : > { %v6577_v6 = vadd.f32 %v5177_v49, %v6393_v7  ;;  %5395 = vmatprep.mubr.msk.bf16.mxu0 %vm481_vm3, %v3349_v45  ;;  %v3028_v7 = vor.u32 %v3027_v37, %v3024_v14  ;;  %v6591_v18 = vpop.f32.mrf.mxu1  ;;  %v3351_v8 = vsel %vm3342_vm8, %v3348_v19, %v3350_v32  ;;  %v3353_v30 = vsel %vm3342_vm8, %v3350_v32, %v3352_v55  ;;  %v6607_v49 = vld [vmem:[%s5630_s26 + $0xa0] ss:$0 sps:$4 sm:$0x77]  }
 0x12e   : > { %v1119_v20 = vpop.f32.mrf.mxu0  ;;  %v3042_v45 = vrot.slane %v3040_v9, 2  ;;  %v3061_v28 = vshll.u32 %v6607_v49, 16 }
 0x12f   : > { %v6588_v53 = vadd.f32 %v1119_v20, %v6403_v36  ;;  %v6599_v39 = vpop.f32.mrf.mxu1  ;;  %v3029_v37 = vsel %vm2895_vm7, %v3019_v0, %v3028_v7  ;;  %v3038_v19 = vsel %vm2895_vm7, %v3028_v7, %v3037_v22  ;;  %v7540_v7 = vld [vmem:[#allocation14_spill] sm:$0xff] }
 0x130   : > { %v5178_v17 = vpop.f32.mrf.mxu0  ;;  %v3046_v9 = vor.u32 %v3045_v10, %v3042_v45 }
 0x131   : > { %v6596_v26 = vadd.f32 %v5178_v17, %v6416_v5  ;;  %v6609_v50 = vpop.f32.mrf.mxu1  ;;  %v3356_v17 = vrot.slane %v7539_v40, 3 }
 0x132   : > { %v1122_v36 = vpop.f32.mrf.mxu0  ;;  %7538 = vst [vmem:[#allocation17_spill] sm:$0xff] %v6609_v50  ;;  %v3063_v50 = vrot.slane %v3061_v28, 3 }
 0x133   : > { %v6603_v14 = vadd.f32 %v1122_v36, %v6424_v15  ;;  %v3354_v15 = vrot.slane %v6252_v3, 3  ;;  %v5203_v20 = vpop.f32.mrf.mxu1  ;;  %5378 = vmatmul.mubr.msk.bf16.gmra.mxu1 %vm481_vm3, %v3029_v37 }
 0x134   : > { %v5181_v5 = vpop.f32.mrf.mxu0  ;;  %5396 = vmatmul.mubr.msk.bf16.gmra.mxu0 %vm481_vm3, %v3351_v8  ;;  %v6621_v8 = vadd.f32 %v5203_v20, %v6465_v13  ;;  %5381 = vmatprep.mubr.msk.bf16.mxu1 %vm481_vm3, %v3038_v19 }
 0x135   : > { %v6614_v32 = vadd.f32 %v5181_v5, %v6433_v38  ;;  %5399 = vmatprep.mubr.msk.bf16.mxu0 %vm481_vm3, %v3353_v30  ;;  %v3058_v38 = vshrl.u32 %v6607_v49, 16  ;;  %v6629_v3 = vpop.f32.mrf.mxu1  ;;  %v3055_v30 = vor.u32 %v3054_v43, %v3051_v35  ;;  %v3355_v10 = vsel %vm3342_vm8, %v3352_v55, %v3354_v15 }
 0x136   : > { %v1135_v0 = vpop.f32.mrf.mxu0  ;;  %v3047_v5 = vsel %vm2895_vm7, %v3037_v22, %v3046_v9  ;;  %v3357_v20 = vsel %vm3342_vm8, %v3354_v15, %v3356_v17  ;;  %v7542_v22 = vld [vmem:[#allocation11_spill] sm:$0xff] }
 0x137   : > { %v6624_v51 = vadd.f32 %v1135_v0, %v7540_v7  ;;  %v5204_v13 = vpop.f32.mrf.mxu1  ;;  %v7541_v0 = vld [vmem:[#allocation15_spill] sm:$0xff]  ;;  %v3060_v7 = vrot.slane %v3058_v38, 2  ;;  %v3056_v55 = vsel %vm2895_vm7, %v3046_v9, %v3055_v30  ;;  %v7543_v38 = vld [vmem:[#allocation12_spill] sm:$0xff] }
 0x138   : > { %v5182_v36 = vpop.f32.mrf.mxu0  ;;  %v6638_v19 = vadd.f32 %v5204_v13, %v6487_v42  ;;  %v3358_v42 = vrot.slane %v7542_v22, 3  ;;  %v3360_v28 = vrot.slane %v7543_v38, 3 }
 0x139   : > { %v6632_v45 = vadd.f32 %v5182_v36, %v6456_v44  ;;  %v6643_v35 = vpop.f32.mrf.mxu1 }
 0x13a   : > { %v1138_v37 = vpop.f32.mrf.mxu0  ;;  %v3361_v22 = vsel %vm3342_vm8, %v3358_v42, %v3360_v28 }
 0x13b   : > { %v6641_v40 = vadd.f32 %v1138_v37, %v7541_v0  ;;  %v5207_v15 = vpop.f32.mrf.mxu1  ;;  %5382 = vmatmul.mubr.msk.bf16.gmra.mxu1 %vm481_vm3, %v3047_v5  ;;  %v3359_v5 = vsel %vm3342_vm8, %v3356_v17, %v3358_v42  ;;  %v3362_v17 = vrot.slane %v6325_v31, 3 }
 0x13c   : > { %v5185_v44 = vpop.f32.mrf.mxu0  ;;  %5400 = vmatmul.mubr.msk.bf16.gmra.mxu0 %vm481_vm3, %v3355_v10  ;;  %v6655_v13 = vadd.f32 %v5207_v15, %v6506_v4  ;;  %5385 = vmatprep.mubr.msk.bf16.mxu1 %vm481_vm3, %v3056_v55 }
 0x13d   : > { %v6648_v43 = vadd.f32 %v5185_v44, %v6474_v33  ;;  %5403 = vmatprep.mubr.msk.bf16.mxu0 %vm481_vm3, %v3357_v20  ;;  %v3064_v33 = vor.u32 %v3063_v50, %v3060_v7  ;;  %v6661_v9 = vpop.f32.mrf.mxu1  ;;  %v3363_v31 = vsel %vm3342_vm8, %v3360_v28, %v3362_v17 }
 0x13e   : > { %v1151_v36 = vpop.f32.mrf.mxu0 }
 0x13f   : > { %v6658_v10 = vadd.f32 %v1151_v36, %v6484_v57  ;;  %v5208_v0 = vpop.f32.mrf.mxu1  ;;  %v3065_v50 = vsel %vm2895_vm7, %v3055_v30, %v3064_v33 }
 0x140   : > { %v5186_v37 = vpop.f32.mrf.mxu0  ;;  %v6669_v4 = vadd.f32 %v5208_v0, %v6526_v27 }
 0x141   : > { %v6664_v20 = vadd.f32 %v5186_v37, %v6494_v1  ;;  %v6675_v7 = vpop.f32.mrf.mxu1 }
 0x142   : > { %v1154_v44 = vpop.f32.mrf.mxu0 }
 0x143   : > { %v6672_v57 = vadd.f32 %v1154_v44, %v6503_v56  ;;  %v5211_v42 = vpop.f32.mrf.mxu1  ;;  %5386 = vmatmul.mubr.msk.bf16.gmra.mxu1 %vm481_vm3, %v3065_v50  ;;  %v7544_v56 = vld [vmem:[#allocation13_spill] sm:$0xff]  ;;  %v7545_v44 = vld [vmem:[#allocation2_spill] sm:$0xff] }
 0x144   : > { %v5189_v55 = vpop.f32.mrf.mxu0  ;;  %5404 = vmatmul.mubr.msk.bf16.gmra.mxu0 %vm481_vm3, %v3359_v5  ;;  %v3364_v15 = vrot.slane %v7544_v56, 3  ;;  %v6686_v30 = vadd.f32 %v5211_v42, %v6543_v2 }
 0x145   : > { %v6679_v1 = vadd.f32 %v5189_v55, %v6513_v46  ;;  %5407 = vmatprep.mubr.msk.bf16.mxu0 %vm481_vm3, %v3361_v22  ;;  %v6691_v38 = vpop.f32.mrf.mxu1  ;;  %v914_v22 = vadd.f32 %v6547_v60, %v7545_v44  ;;  %v3366_v60 = vrot.slane %v6367_v34, 3 }
 0x146   : > { %v1167_v27 = vpop.f32.mrf.mxu0  ;;  %v3365_v0 = vsel %vm3342_vm8, %v3362_v17, %v3364_v15 }
 0x147   : > { %v6689_v36 = vadd.f32 %v1167_v27, %v6523_v23  ;;  %v5212_v37 = vpop.f32.mrf.mxu1  ;;  %v3368_v27 = vrot.slane %v6373_v41, 3  ;;  %v3367_v41 = vsel %vm3342_vm8, %v3364_v15, %v3366_v60 }
 0x148   : > { %v5190_v46 = vpop.f32.mrf.mxu0  ;;  %v6701_v2 = vadd.f32 %v5212_v37, %v6562_v47 }
 0x149   : > { %v6694_v33 = vadd.f32 %v5190_v46, %v6532_v63  ;;  %v6706_v50 = vpop.f32.mrf.mxu1  ;;  %v7546_v63 = vld [vmem:[#allocation3_spill] sm:$0xff] }
 0x14a   : > { %v1170_v5 = vpop.f32.mrf.mxu0  ;;  %v906_v28 = vadd.f32 %v6557_v12, %v7546_v63 }
 0x14b   : > { %v6704_v23 = vadd.f32 %v1170_v5, %v6540_v21  ;;  %v5215_v17 = vpop.f32.mrf.mxu1  ;;  %v7547_v21 = vld [vmem:[#allocation4_spill] sm:$0xff]  ;;  %v7548_v5 = vld [vmem:[#allocation5_spill] sm:$0xff] }
 0x14c   : > { %v5193_v55 = vpop.f32.mrf.mxu0  ;;  %5408 = vmatmul.mubr.msk.bf16.gmra.mxu0 %vm481_vm3, %v3363_v31  ;;  %v917_v56 = vadd.f32 %v6565_v16, %v7547_v21  ;;  %v6719_v46 = vadd.f32 %v5215_v17, %v6577_v6  ;;  %v909_v44 = vadd.f32 %v6572_v11, %v7548_v5  ;;  %v3369_v16 = vsel %vm3342_vm8, %v3366_v60, %v3368_v27  ;;  %v7549_v6 = vld [vmem:[#allocation6_spill] sm:$0xff] }
 0x14d   : > { %v6711_v42 = vadd.f32 %v5193_v55, %v914_v22  ;;  %5411 = vmatprep.mubr.msk.bf16.mxu0 %vm481_vm3, %v3365_v0  ;;  %v1558_v37 = vpop.f32.mrf.mxu1  ;;  %v930_v63 = vadd.f32 %v6581_v58, %v7549_v6  ;;  %v3370_v60 = vrot.slane %v6407_v29, 3  ;;  %v7551_v6 = vld [vmem:[#allocation16_spill] sm:$0xff] }
 0x14e   : > { %v1183_v47 = vpop.f32.mrf.mxu0  ;;  %v6726_v0 = vadd.f32 %v1558_v37, %v6588_v53 }
 0x14f   : > { %v6721_v31 = vadd.f32 %v1183_v47, %v906_v28  ;;  %v5216_v22 = vpop.f32.mrf.mxu1  ;;  %v3371_v29 = vsel %vm3342_vm8, %v3368_v27, %v3370_v60 }
 0x150   : > { %v5194_v12 = vpop.f32.mrf.mxu0  ;;  %v6735_v28 = vadd.f32 %v5216_v22, %v6596_v26  ;;  %v3372_v26 = vrot.slane %v6413_v54, 3 }
 0x151   : > { %v6728_v34 = vadd.f32 %v5194_v12, %v917_v56  ;;  %v1561_v11 = vpop.f32.mrf.mxu1  ;;  %v7550_v56 = vld [vmem:[#allocation8_spill] sm:$0xff] }
 0x152   : > { %v1186_v55 = vpop.f32.mrf.mxu0  ;;  %v6741_v53 = vadd.f32 %v1561_v11, %v6603_v14  ;;  %v933_v37 = vadd.f32 %v6599_v39, %v7550_v56  ;;  %v3373_v54 = vsel %vm3342_vm8, %v3370_v60, %v3372_v26  ;;  %v3374_v11 = vrot.slane %v6447_v62, 3 }
 0x153   : > { %v6737_v17 = vadd.f32 %v1186_v55, %v909_v44  ;;  %v5219_v21 = vpop.f32.mrf.mxu1  ;;  %v3376_v60 = vrot.slane %v6453_v24, 3 }
 0x154   : > { %v5197_v47 = vpop.f32.mrf.mxu0  ;;  %5412 = vmatmul.mubr.msk.bf16.gmra.mxu0 %vm481_vm3, %v3367_v41  ;;  %v6753_v12 = vadd.f32 %v5219_v21, %v6614_v32  ;;  %v3375_v62 = vsel %vm3342_vm8, %v3372_v26, %v3374_v11 }
 0x155   : > { %v6743_v15 = vadd.f32 %v5197_v47, %v930_v63  ;;  %5415 = vmatprep.mubr.msk.bf16.mxu0 %vm481_vm3, %v3369_v16  ;;  %v1574_v5 = vpop.f32.mrf.mxu1 }
 0x156   : > { %v6747_v58 = vpop.f32.mrf.mxu0  ;;  %v6756_v44 = vadd.f32 %v1574_v5, %v6624_v51  ;;  %v1653_v51 = vadd.f32 %v6629_v3, %v7551_v6 }
 0x157   : > { %v5220_v22 = vpop.f32.mrf.mxu1 }
 0x158   : > { %v5198_v14 = vpop.f32.mrf.mxu0  ;;  %v6765_v16 = vadd.f32 %v5220_v22, %v6632_v45 }
 0x159   : > { %v6758_v41 = vadd.f32 %v5198_v14, %v933_v37  ;;  %v1577_v39 = vpop.f32.mrf.mxu1 }
 0x15a   : > { %v6761_v55 = vpop.f32.mrf.mxu0  ;;  %v6771_v63 = vadd.f32 %v1577_v39, %v6641_v40  ;;  %v1654_v40 = vadd.f32 %v6643_v35, %v6497_v25  ;;  %v1657_v25 = vadd.f32 %v6661_v9, %v6516_v61  ;;  %v1658_v61 = vadd.f32 %v6675_v7, %v6535_v52 }
 0x15b   : > { %v5223_v47 = vpop.f32.mrf.mxu1  ;;  %v1661_v52 = vadd.f32 %v6691_v38, %v6552_v48 }
 0x15c   : > { %v5241_v32 = vpop.f32.mrf.mxu0  ;;  %5416 = vmatmul.mubr.msk.bf16.gmra.mxu0 %vm481_vm3, %v3371_v29  ;;  %v6780_v21 = vadd.f32 %v5223_v47, %v6648_v43  ;;  %v3377_v43 = vsel %vm3342_vm8, %v3374_v11, %v3376_v60 }
 0x15d   : > { %v6774_v27 = vadd.f32 %v5241_v32, %v6621_v8  ;;  %5419 = vmatprep.mubr.msk.bf16.mxu0 %vm481_vm3, %v3373_v54  ;;  %v1590_v3 = vpop.f32.mrf.mxu1 }
 0x15e   : > { %v1957_v45 = vpop.f32.mrf.mxu0  ;;  %v6787_v8 = vadd.f32 %v1590_v3, %v6658_v10  ;;  %v3378_v10 = vrot.slane %v6607_v49, 3 }
 0x15f   : > { %v6782_v56 = vadd.f32 %v1957_v45, %v1653_v51  ;;  %v5224_v14 = vpop.f32.mrf.mxu1 }
 0x160   : > { %v5242_v37 = vpop.f32.mrf.mxu0  ;;  %v6795_v29 = vadd.f32 %v5224_v14, %v6664_v20  ;;  %v3379_v49 = vsel %vm3342_vm8, %v3376_v60, %v3378_v10 }
 0x161   : > { %v6790_v5 = vadd.f32 %v5242_v37, %v6638_v19  ;;  %v1593_v54 = vpop.f32.mrf.mxu1 }
 0x162   : > { %v1960_v24 = vpop.f32.mrf.mxu0  ;;  %v6803_v19 = vadd.f32 %v1593_v54, %v6672_v57 }
 0x163   : > { %v6797_v22 = vadd.f32 %v1960_v24, %v1654_v40  ;;  %v5227_v20 = vpop.f32.mrf.mxu1  ;;  %v1662_v24 = vadd.f32 %v6706_v50, %v6569_v59 }
 0x164   : > { %v5245_v39 = vpop.f32.mrf.mxu0  ;;  %5420 = vmatmul.mubr.msk.bf16.gmra.mxu0 %vm481_vm3, %v3375_v62  ;;  %v6811_v32 = vadd.f32 %v5227_v20, %v6679_v1 }
 0x165   : > { %v6806_v35 = vadd.f32 %v5245_v39, %v6655_v13  ;;  %5423 = vmatprep.mubr.msk.bf16.mxu0 %vm481_vm3, %v3377_v43  ;;  %v1606_v51 = vpop.f32.mrf.mxu1 }
 0x166   : > { %v1973_v26 = vpop.f32.mrf.mxu0  ;;  %v6818_v9 = vadd.f32 %v1606_v51, %v6689_v36 }
 0x167   : > { %v6813_v6 = vadd.f32 %v1973_v26, %v1657_v25  ;;  %v5228_v57 = vpop.f32.mrf.mxu1  ;;  %v7552_v25 = vld [vmem:[#allocation7_spill] sm:$0xff] }
 0x168   : > { %v5246_v11 = vpop.f32.mrf.mxu0  ;;  %v6825_v1 = vadd.f32 %v5228_v57, %v6694_v33  ;;  %v922_v10 = vadd.f32 %v6591_v18, %v7552_v25  ;;  %v7554_v18 = vld [vmem:[#allocation17_spill] sm:$0xff] }
 0x169   : > { %v6821_v13 = vadd.f32 %v5246_v11, %v6669_v4  ;;  %v1609_v3 = vpop.f32.mrf.mxu1 }
 0x16a   : > { %v1976_v47 = vpop.f32.mrf.mxu0  ;;  %v6833_v7 = vadd.f32 %v1609_v3, %v6704_v23  ;;  %v1246_v20 = vadd.f32 %v6747_v58, %v922_v10 }
 0x16b   : > { %v6827_v45 = vadd.f32 %v1976_v47, %v1658_v61  ;;  %v5231_v36 = vpop.f32.mrf.mxu1  ;;  %v7553_v61 = vld [vmem:[#allocation10_spill] sm:$0xff] }
 0x16c   : > { %v5249_v37 = vpop.f32.mrf.mxu0  ;;  %5424 = vmatmul.mubr.msk.bf16.gmra.mxu0 %vm481_vm3, %v3379_v49  ;;  %v6839_v33 = vadd.f32 %v5231_v36, %v6711_v42  ;;  %v925_v49 = vadd.f32 %v7554_v18, %v7553_v61 }
 0x16d   : > { %v6836_v4 = vadd.f32 %v5249_v37, %v6686_v30  ;;  %v1622_v62 = vpop.f32.mrf.mxu1 }
 0x16e   : > { %v1989_v60 = vpop.f32.mrf.mxu0  ;;  %v6846_v48 = vadd.f32 %v1622_v62, %v6721_v31  ;;  %v1247_v58 = vadd.f32 %v6761_v55, %v925_v49 }
 0x16f   : > { %v6841_v40 = vadd.f32 %v1989_v60, %v1661_v52  ;;  %v5232_v30 = vpop.f32.mrf.mxu1 }
 0x170   : > { %v5250_v14 = vpop.f32.mrf.mxu0  ;;  %v6852_v43 = vadd.f32 %v5232_v30, %v6728_v34 }
 0x171   : > { %v6849_v38 = vadd.f32 %v5250_v14, %v6701_v2  ;;  %v1625_v54 = vpop.f32.mrf.mxu1 }
 0x172   : > { %v1992_v23 = vpop.f32.mrf.mxu0  ;;  %v6859_v59 = vadd.f32 %v1625_v54, %v6737_v17 }
 0x173   : > { %v6854_v42 = vadd.f32 %v1992_v23, %v1662_v24  ;;  %v5235_v2 = vpop.f32.mrf.mxu1 }
 0x174   : > { %v5253_v39 = vpop.f32.mrf.mxu0  ;;  %v6866_v34 = vadd.f32 %v5235_v2, %v6743_v15 }
 0x175   : > { %v6862_v50 = vadd.f32 %v5253_v39, %v6719_v46  ;;  %v1638_v51 = vpop.f32.mrf.mxu1 }
 0x176   : > { %v2005_v31 = vpop.f32.mrf.mxu0  ;;  %v6873_v17 = vadd.f32 %v1638_v51, %v1246_v20 }
 0x177   : > { %v6869_v26 = vadd.f32 %v2005_v31, %v6726_v0  ;;  %v5236_v57 = vpop.f32.mrf.mxu1 }
 0x178   : > { %v5254_v11 = vpop.f32.mrf.mxu0  ;;  %v6880_v15 = vadd.f32 %v5236_v57, %v6758_v41 }
 0x179   : > { %v6876_v46 = vadd.f32 %v5254_v11, %v6735_v28  ;;  %v1641_v3 = vpop.f32.mrf.mxu1 }
 0x17a   : > { %v2008_v47 = vpop.f32.mrf.mxu0  ;;  %v6885_v52 = vadd.f32 %v1641_v3, %v1247_v58 }
 0x17b   : > { %v6883_v0 = vadd.f32 %v2008_v47, %v6741_v53  ;;  %v5279_v60 = vpop.f32.mrf.mxu1 }
 0x17c   : > { %v5257_v37 = vpop.f32.mrf.mxu0  ;;  %v6891_v62 = vadd.f32 %v5279_v60, %v6774_v27 }
 0x17d   : > { %v6888_v36 = vadd.f32 %v5257_v37, %v6753_v12  ;;  %v2271_v41 = vpop.f32.mrf.mxu1 }
 0x17e   : > { %v2021_v28 = vpop.f32.mrf.mxu0  ;;  %v6897_v53 = vadd.f32 %v2271_v41, %v6782_v56 }
 0x17f   : > { %v6894_v55 = vadd.f32 %v2021_v28, %v6756_v44  ;;  %v5280_v30 = vpop.f32.mrf.mxu1 }
 0x180   : > { %v5258_v14 = vpop.f32.mrf.mxu0  ;;  %v6903_v12 = vadd.f32 %v5280_v30, %v6790_v5  ;;  %v7521_v5 = vmov 0.0  }
 0x181   : > { %v6900_v24 = vadd.f32 %v5258_v14, %v6765_v16  ;;  %v2274_v27 = vpop.f32.mrf.mxu1  ;;  %5427 = vmatprep.subr.mxu1 %v7521_v5  ;;  %5431 = vmatprep.mubr.msk.f32.mxu1 %vm5571_vm9, %v7521_v5 }
 0x182   : > { %v2024_v23 = vpop.f32.mrf.mxu0  ;;  %v6909_v44 = vadd.f32 %v2274_v27, %v6797_v22 }
 0x183   : > { %v6906_v54 = vadd.f32 %v2024_v23, %v6771_v63  ;;  %v5283_v56 = vpop.f32.mrf.mxu1 }
 0x184   : > { %v5261_v39 = vpop.f32.mrf.mxu0  ;;  %v6915_v16 = vadd.f32 %v5283_v56, %v6806_v35 }
 0x185   : > { %v6912_v25 = vadd.f32 %v5261_v39, %v6780_v21  ;;  %v2287_v63 = vpop.f32.mrf.mxu1 }
 0x186   : > { %v2037_v10 = vpop.f32.mrf.mxu0  ;;  %v6922_v20 = vadd.f32 %v2287_v63, %v6813_v6 }
 0x187   : > { %v6918_v2 = vadd.f32 %v2037_v10, %v6787_v8  ;;  %v5284_v21 = vpop.f32.mrf.mxu1 }
 0x188   : > { %v5262_v31 = vpop.f32.mrf.mxu0  ;;  %v6928_v11 = vadd.f32 %v5284_v21, %v6821_v13 }
 0x189   : > { %v6925_v22 = vadd.f32 %v5262_v31, %v6795_v29  ;;  %v2290_v8 = vpop.f32.mrf.mxu1 }
 0x18a   : > { %v2040_v51 = vpop.f32.mrf.mxu0  ;;  %v6934_v18 = vadd.f32 %v2290_v8, %v6827_v45 }
 0x18b   : > { %v6931_v35 = vadd.f32 %v2040_v51, %v6803_v19  ;;  %v5287_v6 = vpop.f32.mrf.mxu1 }
 0x18c   : > { %v5265_v61 = vpop.f32.mrf.mxu0  ;;  %v6940_v29 = vadd.f32 %v5287_v6, %v6836_v4 }
 0x18d   : > { %v6937_v49 = vadd.f32 %v5265_v61, %v6811_v32  ;;  %v2303_v19 = vpop.f32.mrf.mxu1 }
 0x18e   : > { %v2053_v57 = vpop.f32.mrf.mxu0  ;;  %v6948_v45 = vadd.f32 %v2303_v19, %v6841_v40 }
 0x18f   : > { %v6943_v47 = vadd.f32 %v2053_v57, %v6818_v9  ;;  %v5288_v58 = vpop.f32.mrf.mxu1 }
 0x190   : > { %v5266_v13 = vpop.f32.mrf.mxu0  ;;  %v6954_v4 = vadd.f32 %v5288_v58, %v6849_v38 }
 0x191   : > { %v6951_v32 = vadd.f32 %v5266_v13, %v6825_v1  ;;  %v2306_v37 = vpop.f32.mrf.mxu1 }
 0x192   : > { %v2056_v3 = vpop.f32.mrf.mxu0  ;;  %v6960_v28 = vadd.f32 %v2306_v37, %v6854_v42 }
 0x193   : > { %v6957_v9 = vadd.f32 %v2056_v3, %v6833_v7  ;;  %v5291_v40 = vpop.f32.mrf.mxu1 }
 0x194   : > { %v5269_v60 = vpop.f32.mrf.mxu0  ;;  %v6966_v1 = vadd.f32 %v5291_v40, %v6862_v50 }
 0x195   : > { %v6963_v41 = vadd.f32 %v5269_v60, %v6839_v33  ;;  %v2319_v38 = vpop.f32.mrf.mxu1 }
 0x196   : > { %v2069_v14 = vpop.f32.mrf.mxu0  ;;  %v6972_v7 = vadd.f32 %v2319_v38, %v6869_v26 }
 0x197   : > { %v6969_v30 = vadd.f32 %v2069_v14, %v6846_v48  ;;  %v5292_v42 = vpop.f32.mrf.mxu1 }
 0x198   : > { %v5270_v23 = vpop.f32.mrf.mxu0  ;;  %v6978_v33 = vadd.f32 %v5292_v42, %v6876_v46 }
 0x199   : > { %v6975_v27 = vadd.f32 %v5270_v23, %v6852_v43  ;;  %v2322_v50 = vpop.f32.mrf.mxu1 }
 0x19a   : > { %v2072_v39 = vpop.f32.mrf.mxu0  ;;  %v6984_v48 = vadd.f32 %v2322_v50, %v6883_v0 }
 0x19b   : > { %v6981_v56 = vadd.f32 %v2072_v39, %v6859_v59  ;;  %v5295_v26 = vpop.f32.mrf.mxu1 }
 0x19c   : > { %v5273_v10 = vpop.f32.mrf.mxu0  ;;  %v6990_v43 = vadd.f32 %v5295_v26, %v6888_v36 }
 0x19d   : > { %v6987_v63 = vadd.f32 %v5273_v10, %v6866_v34  ;;  %v2335_v46 = vpop.f32.mrf.mxu1 }
 0x19e   : > { %v2085_v31 = vpop.f32.mrf.mxu0  ;;  %v6996_v59 = vadd.f32 %v2335_v46, %v6894_v55 }
 0x19f   : > { %v6993_v21 = vadd.f32 %v2085_v31, %v6873_v17  ;;  %v5296_v0 = vpop.f32.mrf.mxu1 }
 0x1a0   : > { %v5274_v51 = vpop.f32.mrf.mxu0  ;;  %v7002_v34 = vadd.f32 %v5296_v0, %v6900_v24 }
 0x1a1   : > { %v6999_v8 = vadd.f32 %v5274_v51, %v6880_v15  ;;  %v2338_v36 = vpop.f32.mrf.mxu1 }
 0x1a2   : > { %v2088_v61 = vpop.f32.mrf.mxu0  ;;  %v7008_v17 = vadd.f32 %v2338_v36, %v6906_v54 }
 0x1a3   : > { %v7005_v6 = vadd.f32 %v2088_v61, %v6885_v52  ;;  %v5299_v55 = vpop.f32.mrf.mxu1 }
 0x1a4   : > { %v5317_v57 = vpop.f32.mrf.mxu0  ;;  %v7014_v15 = vadd.f32 %v5299_v55, %v6912_v25 }
 0x1a5   : > { %v7011_v19 = vadd.f32 %v5317_v57, %v6891_v62  ;;  %v2351_v24 = vpop.f32.mrf.mxu1 }
 0x1a6   : > { %v2710_v13 = vpop.f32.mrf.mxu0  ;;  %v7020_v52 = vadd.f32 %v2351_v24, %v6918_v2 }
 0x1a7   : > { %v7017_v58 = vadd.f32 %v2710_v13, %v6897_v53  ;;  %v5300_v54 = vpop.f32.mrf.mxu1 }
 0x1a8   : > { %v5318_v3 = vpop.f32.mrf.mxu0  ;;  %v7026_v62 = vadd.f32 %v5300_v54, %v6925_v22 }
 0x1a9   : > { %v7023_v37 = vadd.f32 %v5318_v3, %v6903_v12  ;;  %v2354_v25 = vpop.f32.mrf.mxu1 }
 0x1aa   : > { %v2713_v60 = vpop.f32.mrf.mxu0  ;;  %v7032_v53 = vadd.f32 %v2354_v25, %v6931_v35 }
 0x1ab   : > { %v7029_v40 = vadd.f32 %v2713_v60, %v6909_v44  ;;  %v5303_v2 = vpop.f32.mrf.mxu1 }
 0x1ac   : > { %v5321_v14 = vpop.f32.mrf.mxu0  ;;  %v7038_v12 = vadd.f32 %v5303_v2, %v6937_v49 }
 0x1ad   : > { %v7035_v38 = vadd.f32 %v5321_v14, %v6915_v16  ;;  %v2367_v22 = vpop.f32.mrf.mxu1 }
 0x1ae   : > { %v2726_v23 = vpop.f32.mrf.mxu0  ;;  %v7044_v44 = vadd.f32 %v2367_v22, %v6943_v47 }
 0x1af   : > { %v7041_v42 = vadd.f32 %v2726_v23, %v6922_v20  ;;  %v5304_v35 = vpop.f32.mrf.mxu1 }
 0x1b0   : > { %v5322_v39 = vpop.f32.mrf.mxu0  ;;  %v7050_v16 = vadd.f32 %v5304_v35, %v6951_v32 }
 0x1b1   : > { %v7047_v50 = vadd.f32 %v5322_v39, %v6928_v11  ;;  %v2370_v49 = vpop.f32.mrf.mxu1 }
 0x1b2   : > { %v2729_v10 = vpop.f32.mrf.mxu0  ;;  %v7056_v20 = vadd.f32 %v2370_v49, %v6957_v9 }
 0x1b3   : > { %v7053_v26 = vadd.f32 %v2729_v10, %v6934_v18  ;;  %v5307_v47 = vpop.f32.mrf.mxu1 }
 0x1b4   : > { %v5325_v31 = vpop.f32.mrf.mxu0  ;;  %v7062_v11 = vadd.f32 %v5307_v47, %v6963_v41 }
 0x1b5   : > { %v7059_v46 = vadd.f32 %v5325_v31, %v6940_v29  ;;  %v2383_v32 = vpop.f32.mrf.mxu1 }
 0x1b6   : > { %v2742_v51 = vpop.f32.mrf.mxu0  ;;  %v7068_v18 = vadd.f32 %v2383_v32, %v6969_v30 }
 0x1b7   : > { %v7065_v0 = vadd.f32 %v2742_v51, %v6948_v45  ;;  %v5308_v9 = vpop.f32.mrf.mxu1 }
 0x1b8   : > { %v5326_v61 = vpop.f32.mrf.mxu0  ;;  %v7074_v29 = vadd.f32 %v5308_v9, %v6975_v27 }
 0x1b9   : > { %v7071_v36 = vadd.f32 %v5326_v61, %v6954_v4  ;;  %v2386_v55 = vpop.f32.mrf.mxu1 }
 0x1ba   : > { %v2745_v57 = vpop.f32.mrf.mxu0  ;;  %v7080_v13 = vadd.f32 %v2386_v55, %v6981_v56 }
 0x1bb   : > { %v7077_v41 = vadd.f32 %v2745_v57, %v6960_v28  ;;  %v5311_v24 = vpop.f32.mrf.mxu1 }
 0x1bc   : > { %v5329_v45 = vpop.f32.mrf.mxu0  ;;  %v7086_v3 = vadd.f32 %v5311_v24, %v6987_v63 }
 0x1bd   : > { %v7083_v30 = vadd.f32 %v5329_v45, %v6966_v1  ;;  %v2399_v54 = vpop.f32.mrf.mxu1 }
 0x1be   : > { %v2758_v4 = vpop.f32.mrf.mxu0  ;;  %v7092_v28 = vadd.f32 %v2399_v54, %v6993_v21  ;;  %v7520_v21 = vmov 0  }
 0x1bf   : > { %v7089_v27 = vadd.f32 %v2758_v4, %v6972_v7  ;;  %v5312_v56 = vpop.f32.mrf.mxu1  ;;  %3731 = vst.msk [vmem:[%s7107_s18] sm:$0xf] %vm3730_vm10, %v7520_v21  ;;  %3732 = vst.msk [vmem:[%s7107_s18 + $0x4] sm:$0xf] %vm3730_vm10, %v7520_v21 }
 0x1c0   : > { %v5330_v60 = vpop.f32.mrf.mxu0  ;;  %v7099_v1 = vadd.f32 %v5312_v56, %v6999_v8  ;;  %3733 = vst.msk [vmem:[%s7107_s18 + $0x8] sm:$0xf] %vm3730_vm10, %v7520_v21  ;;  %3734 = vst.msk [vmem:[%s7107_s18 + $0xc] sm:$0xf] %vm3730_vm10, %v7520_v21 }
 0x1c1   : > { %v7095_v25 = vadd.f32 %v5330_v60, %v6978_v33  ;;  %v2402_v7 = vpop.f32.mrf.mxu1  ;;  %3735 = vst.msk [vmem:[%s7107_s18 + $0x10] sm:$0xf] %vm3730_vm10, %v7520_v21  ;;  %3736 = vst.msk [vmem:[%s7107_s18 + $0x14] sm:$0xf] %vm3730_vm10, %v7520_v21 }
 0x1c2   : > { %v2761_v14 = vpop.f32.mrf.mxu0  ;;  %v7110_v33 = vadd.f32 %v2402_v7, %v7005_v6  ;;  %3737 = vst.msk [vmem:[%s7107_s18 + $0x18] sm:$0xf] %vm3730_vm10, %v7520_v21  ;;  %3738 = vst.msk [vmem:[%s7107_s18 + $0x1c] sm:$0xf] %vm3730_vm10, %v7520_v21 }
 0x1c3   : > { %v7102_v63 = vadd.f32 %v2761_v14, %v6984_v48  ;;  %3739 = vst.msk [vmem:[%s7107_s18 + $0x20] sm:$0xf] %vm3730_vm10, %v7520_v21  ;;  %3740 = vst.msk [vmem:[%s7107_s18 + $0x24] sm:$0xf] %vm3730_vm10, %v7520_v21 }
 0x1c4   : > { %v5333_v2 = vpop.f32.mrf.mxu0  ;;  %3741 = vst.msk [vmem:[%s7107_s18 + $0x28] sm:$0xf] %vm3730_vm10, %v7520_v21  ;;  %3742 = vst.msk [vmem:[%s7107_s18 + $0x2c] sm:$0xf] %vm3730_vm10, %v7520_v21 }
 0x1c5   : > { %v7113_v48 = vadd.f32 %v5333_v2, %v6990_v43  ;;  %v5355_v43 = vpop.f32.mrf.mxu1 }
 0x1c6   : > { %v2774_v8 = vpop.f32.mrf.mxu0  ;;  %v3302_v21 = vadd.f32 %v5355_v43, %v7011_v19 }
 0x1c7   : > { %v7152_v6 = vadd.f32 %v2774_v8, %v6996_v59  ;;  %v3157_v23 = vpop.f32.mrf.mxu1 }
 0x1c8   : > { %v5334_v22 = vpop.f32.mrf.mxu0  ;;  %v3300_v5 = vadd.f32 %v3157_v23, %v7017_v58 }
 0x1c9   : > { %v7155_v39 = vadd.f32 %v5334_v22, %v7002_v34  ;;  %v5356_v35 = vpop.f32.mrf.mxu1 }
 0x1ca   : > { %v2777_v10 = vpop.f32.mrf.mxu0 }
 0x1cb   : > { %v7158_v49 = vadd.f32 %v2777_v10, %v7008_v17  ;;  %v7160_v31 = vpop.f32.mrf.mxu1 }
 0x1cc   : > { %v5337_v47 = vpop.f32.mrf.mxu0 }
 0x1cd   : > { %v7163_v51 = vadd.f32 %v5337_v47, %v7014_v15  ;;  %v5359_v32 = vpop.f32.mrf.mxu1 }
 0x1ce   : > { %v2790_v61 = vpop.f32.mrf.mxu0 }
 0x1cf   : > { %v7166_v59 = vadd.f32 %v2790_v61, %v7020_v52  ;;  %v3173_v9 = vpop.f32.mrf.mxu1 }
 0x1d0   : > { %v5338_v57 = vpop.f32.mrf.mxu0 }
 0x1d1   : > { %v7169_v34 = vadd.f32 %v5338_v57, %v7026_v62  ;;  %v7171_v55 = vpop.f32.mrf.mxu1 }
 0x1d2   : > { %v2793_v17 = vpop.f32.mrf.mxu0 }
 0x1d3   : > { %v7174_v45 = vadd.f32 %v2793_v17, %v7032_v53  ;;  %v7176_v24 = vpop.f32.mrf.mxu1 }
 0x1d4   : > { %v5341_v15 = vpop.f32.mrf.mxu0 }
 0x1d5   : > { %v7179_v4 = vadd.f32 %v5341_v15, %v7038_v12  ;;  %v7181_v54 = vpop.f32.mrf.mxu1 }
 0x1d6   : > { %v2806_v52 = vpop.f32.mrf.mxu0 }
 0x1d7   : > { %v7184_v60 = vadd.f32 %v2806_v52, %v7044_v44  ;;  %v7186_v62 = vpop.f32.mrf.mxu1 }
 0x1d8   : > { %v5342_v56 = vpop.f32.mrf.mxu0 }
 0x1d9   : > { %v7189_v14 = vadd.f32 %v5342_v56, %v7050_v16  ;;  %v7191_v53 = vpop.f32.mrf.mxu1 }
 0x1da   : > { %v2809_v7 = vpop.f32.mrf.mxu0 }
 0x1db   : > { %v7194_v2 = vadd.f32 %v2809_v7, %v7056_v20  ;;  %v7196_v12 = vpop.f32.mrf.mxu1 }
 0x1dc   : > { %v5345_v8 = vpop.f32.mrf.mxu0 }
 0x1dd   : > { %v7199_v22 = vadd.f32 %v5345_v8, %v7062_v11  ;;  %v7201_v44 = vpop.f32.mrf.mxu1 }
 0x1de   : > { %v2822_v10 = vpop.f32.mrf.mxu0 }
 0x1df   : > { %7555 = vst [vmem:[#allocation9_spill] sm:$0xff] %v7199_v22  ;;  %v7204_v47 = vadd.f32 %v2822_v10, %v7068_v18  ;;  %v7206_v16 = vpop.f32.mrf.mxu1 }
 0x1e0   : > { %v5346_v61 = vpop.f32.mrf.mxu0 }
 0x1e1   : > { %7556 = vst [vmem:[#allocation14_spill] sm:$0xff] %v7204_v47  ;;  %v7209_v57 = vadd.f32 %v5346_v61, %v7074_v29  ;;  %v7211_v20 = vpop.f32.mrf.mxu1 }
 0x1e2   : > { %v2825_v17 = vpop.f32.mrf.mxu0 }
 0x1e3   : > { %7557 = vst [vmem:[#allocation15_spill] sm:$0xff] %v7209_v57  ;;  %v7214_v15 = vadd.f32 %v2825_v17, %v7080_v13  ;;  %v7216_v11 = vpop.f32.mrf.mxu1 }
 0x1e4   : > { %v5349_v52 = vpop.f32.mrf.mxu0 }
 0x1e5   : > { %7558 = vst [vmem:[#allocation11_spill] sm:$0xff] %v7214_v15  ;;  %v7219_v56 = vadd.f32 %v5349_v52, %v7086_v3  ;;  %v7221_v18 = vpop.f32.mrf.mxu1 }
 0x1e6   : > { %v2838_v7 = vpop.f32.mrf.mxu0 }
 0x1e7   : > { %7559 = vst [vmem:[#allocation12_spill] sm:$0xff] %v7219_v56  ;;  %v7224_v8 = vadd.f32 %v2838_v7, %v7092_v28  ;;  %v7226_v29 = vpop.f32.mrf.mxu1  ;;  %v7240_v28 = vld [vmem:[%s7513_s2] ss:$0 sm:$0xff]  ;;  %v3306_v56 = vadd.f32 %v5359_v32, %v7035_v38  ;;  %v3307_v32 = vadd.f32 %v7171_v55, %v7047_v50  ;;  %v3305_v55 = vadd.f32 %v7176_v24, %v7053_v26 }
 0x1e8   : > { %v5350_v10 = vpop.f32.mrf.mxu0 }
 0x1e9   : > { %7560 = vst [vmem:[#allocation13_spill] sm:$0xff] %v7224_v8  ;;  %v7229_v61 = vadd.f32 %v5350_v10, %v7099_v1  ;;  %v7231_v13 = vpop.f32.mrf.mxu1  ;;  %v3303_v10 = vadd.f32 %v5356_v35, %v7023_v37  ;;  %v3304_v37 = vadd.f32 %v3173_v9, %v7041_v42 }
 0x1ea   : > { %v2841_v17 = vpop.f32.mrf.mxu0 }
 0x1eb   : > { %7561 = vst [vmem:[#allocation2_spill] sm:$0xff] %v7229_v61  ;;  %v7235_v3 = vadd.f32 %v2841_v17, %v7110_v33  ;;  %v7243_v8 = vpop.f32.mrf.mxu1 }
 0x1ec   : > { %v5393_v52 = vpop.f32.mrf.mxu0 }
 0x1ed   : > { %7562 = vst [vmem:[#allocation3_spill] sm:$0xff] %v7235_v3  ;;  %v3616_v7 = vadd.f32 %v5393_v52, %v3302_v21  ;;  %v7247_v17 = vpop.f32.mrf.mxu1  ;;  %v3301_v52 = vadd.f32 %v7160_v31, %v7029_v40 }
 0x1ee   : > { %v3471_v1 = vpop.f32.mrf.mxu0 }
 0x1ef   : > { %v3659_v61 = vadd.f32 %v7240_v28, %v3616_v7  ;;  %v3614_v19 = vadd.f32 %v3471_v1, %v3300_v5  ;;  %v7255_v7 = vpop.f32.mrf.mxu1 }
 0x1f0   : > { %v5394_v43 = vpop.f32.mrf.mxu0 }
 0x1f1   : > { %v3617_v33 = vadd.f32 %v5394_v43, %v3303_v10  ;;  %v3695_v15 = vmax.f32 %v3659_v61, 0.0  ;;  %v3657_v58 = vadd.f32 %v7240_v28, %v3614_v19  ;;  %v7262_v31 = vpop.f32.mrf.mxu1 }
 0x1f2   : > { %v3474_v3 = vpop.f32.mrf.mxu0 }
 0x1f3   : > { %v3660_v21 = vadd.f32 %v7240_v28, %v3617_v33  ;;  %v3749_v10 = vrot.slane %v3695_v15, 2  ;;  %v3615_v57 = vadd.f32 %v3474_v3, %v3301_v52  ;;  %v3693_v61 = vmax.f32 %v3657_v58, 0.0 }
 0x1f4   : > { %v5397_v23 = vpop.f32.mrf.mxu0 }
 0x1f5   : > { %v3696_v35 = vmax.f32 %v3660_v21, 0.0  ;;  %v3620_v5 = vadd.f32 %v5397_v23, %v3306_v56  ;;  %v3658_v23 = vadd.f32 %v7240_v28, %v3615_v57  ;;  %v3311_v57 = vadd.f32 %v7191_v53, %v7071_v36 }
 0x1f6   : > { %v3487_v1 = vpop.f32.mrf.mxu0 }
 0x1f7   : > { %v3750_v43 = vrot.slane %v3696_v35, 2  ;;  %v3618_v38 = vadd.f32 %v3487_v1, %v3304_v37  ;;  %v3663_v19 = vadd.f32 %v7240_v28, %v3620_v5  ;;  %v3308_v35 = vadd.f32 %v7186_v62, %v7065_v0  ;;  %v7272_v5 = vpop.f32.mrf.mxu1 }
 0x1f8   : > { %v5398_v33 = vpop.f32.mrf.mxu0 }
 0x1f9   : > { %v3751_v40 = vsel %vm2142_vm5, %v3749_v10, %v3750_v43  ;;  %v3661_v42 = vadd.f32 %v7240_v28, %v3618_v38  ;;  %v3621_v9 = vadd.f32 %v5398_v33, %v3307_v32  ;;  %v3699_v52 = vmax.f32 %v3663_v19, 0.0 }
 0x1fa   : > { %v3490_v56 = vpop.f32.mrf.mxu0  ;;  %v3757_v21 = vadd.f32 %v3751_v40, %v3693_v61  ;;  %v3694_v38 = vmax.f32 %v3658_v23, 0.0 }
 0x1fb   : > { %v3697_v3 = vmax.f32 %v3661_v42, 0.0  ;;  %v3664_v37 = vadd.f32 %v7240_v28, %v3621_v9  ;;  %v3619_v61 = vadd.f32 %v3490_v56, %v3305_v55  ;;  %v3860_v19 = vrot.slane %v3699_v52, 2  ;;  %v7277_v9 = vpop.f32.mrf.mxu1 }
 0x1fc   : > { %v7266_v50 = vpop.f32.mrf.mxu0  ;;  %v3764_v55 = vrot.slane %v3757_v21, 1 }
 0x1fd   : > { %v3752_v58 = vrot.slane %v3697_v3, 2  ;;  %v3700_v1 = vmax.f32 %v3664_v37, 0.0  ;;  %v3662_v36 = vadd.f32 %v7240_v28, %v3619_v61  ;;  %v7563_v61 = vmov 0.0  }
 0x1fe   : > { %v3503_v10 = vpop.f32.mrf.mxu0 }
 0x1ff   : > { %v3759_v32 = vadd.f32 %v3752_v58, %v3695_v15  ;;  %v3861_v33 = vrot.slane %v3700_v1, 2  ;;  %v3622_v40 = vadd.f32 %v3503_v10, %v3308_v35  ;;  %v3753_v26 = vsel %vm2142_vm5, %v3750_v43, %v3752_v58  ;;  %v7288_v35 = vpop.f32.mrf.mxu1 }
 0x200   : > { %v5402_v42 = vpop.f32.mrf.mxu0  ;;  %v3758_v22 = vadd.f32 %v3753_v26, %v3694_v38  ;;  %v3309_v43 = vadd.f32 %v7196_v12, %v7077_v41  ;;  %v3312_v58 = vadd.f32 %v7206_v16, %v7089_v27  ;;  %v3698_v21 = vmax.f32 %v3662_v36, 0.0  ;;  %v7300_v41 = vld [vmem:[%s7514_s3] sm:$0xff] }
 0x201   : > { %v3767_v24 = vrot.slane %v3759_v32, 1  ;;  %v3862_v0 = vsel %vm2142_vm5, %v3860_v19, %v3861_v33  ;;  %v3665_v62 = vadd.f32 %v7240_v28, %v3622_v40  ;;  %v3625_v37 = vadd.f32 %v5402_v42, %v3311_v57  ;;  %v7308_v26 = vpop.f32.mrf.mxu1 }
 0x202   : > { %v3506_v47 = vpop.f32.mrf.mxu0  ;;  %v3868_v53 = vadd.f32 %v3862_v0, %v3697_v3  ;;  %v3765_v23 = vrot.slane %v3758_v22, 1  ;;  %v3315_v22 = vadd.f32 %v7211_v20, %v7095_v25  ;;  %v3313_v40 = vadd.f32 %v7216_v11, %v7102_v63 }
 0x203   : > { %v3701_v15 = vmax.f32 %v3665_v62, 0.0  ;;  %v7291_v10 = vadd.f32 %v7240_v28, %v3625_v37  ;;  %v3623_v16 = vadd.f32 %v3506_v47, %v3309_v43  ;;  %v3310_v42 = vadd.f32 %v7181_v54, %v7059_v46 }
 0x204   : > { %v7282_v56 = vpop.f32.mrf.mxu0  ;;  %v3768_v57 = vsel %vm942_vm4, %v3765_v23, %v3767_v24  ;;  %v3766_v38 = vsel %vm942_vm4, %v3764_v55, %v3765_v23  ;;  %v3875_v37 = vrot.slane %v3868_v53, 5  ;;  %v3316_v36 = vadd.f32 %v7226_v29, %v7152_v6  ;;  %v7327_v55 = vpop.f32.mrf.mxu1 }
 0x205   : > { %v3863_v1 = vrot.slane %v3701_v15, 2  ;;  %5428 = vmatpush3.msra.mxu1 %v3768_v57  ;;  %v3624_v46 = vadd.f32 %v7266_v50, %v3310_v42  ;;  %v3666_v54 = vadd.f32 %v7240_v28, %v3623_v16  ;;  %v3314_v6 = vadd.f32 %v7201_v44, %v7083_v30 }
 0x206   : > { %v3519_v3 = vpop.f32.mrf.mxu0  ;;  %5429 = vmatprep.subr.mxu1 %v7563_v61 }
 0x207   : > { %v3864_v27 = vsel %vm2142_vm5, %v3861_v33, %v3863_v1  ;;  %v3870_v12 = vadd.f32 %v3863_v1, %v3699_v52  ;;  %v3626_v32 = vadd.f32 %v3519_v3, %v3312_v58  ;;  %5430 = vmatpush3.msra.mxu1 %v3766_v38  ;;  %v3704_v33 = vmax.f32 %v7291_v10, 0.0 }
 0x208   : > { %v5406_v19 = vpop.f32.mrf.mxu0  ;;  %v3869_v20 = vadd.f32 %v3864_v27, %v3698_v21  ;;  %5434 = vmatprep.subr.mxu1 %v7563_v61  ;;  %5432 = vmatmul.mubr.msk.f32.vlgmr.msra.gmra.mxu1 %vm3771_vm11, %v7300_v41  ;;  %v3667_v29 = vadd.f32 %v7240_v28, %v3624_v46  ;;  %v3702_v3 = vmax.f32 %v3666_v54, 0.0  ;;  %v3317_v21 = vadd.f32 %v7243_v8, %v7158_v49 }
 0x209   : > { %v3629_v25 = vadd.f32 %v5406_v19, %v3315_v22  ;;  %v3878_v24 = vrot.slane %v3870_v12, 5  ;;  %v3669_v47 = vadd.f32 %v7240_v28, %v3626_v32  ;;  %5438 = vmatprep.mubr.msk.f32.mxu1 %vm5571_vm9, %v7563_v61  ;;  %v3966_v43 = vrot.slane %v3704_v33, 2  ;;  %v7340_v32 = vpop.f32.mrf.mxu1 }
 0x20a   : > { %v3522_v52 = vpop.f32.mrf.mxu0  ;;  %v3876_v11 = vrot.slane %v3869_v20, 5  ;;  %v3628_v30 = vadd.f32 %v7282_v56, %v3314_v6  ;;  %v3318_v8 = vadd.f32 %v7221_v18, %v7113_v48  ;;  %v3322_v20 = vadd.f32 %v7247_v17, %v7163_v51 }
 0x20b   : > { %v3627_v63 = vadd.f32 %v3522_v52, %v3313_v40  ;;  %v3705_v0 = vmax.f32 %v3669_v47, 0.0  ;;  %v7324_v15 = vadd.f32 %v7240_v28, %v3629_v25  ;;  %v3703_v56 = vmax.f32 %v3667_v29, 0.0 }
 0x20c   : > { %v7319_v62 = vpop.f32.mrf.mxu0  ;;  %v3879_v50 = vsel %vm3874_vm12, %v3876_v11, %v3878_v24  ;;  %v3877_v10 = vsel %vm3874_vm12, %v3875_v37, %v3876_v11  ;;  %v3320_v47 = vadd.f32 %v7255_v7, %v7166_v59  ;;  %v7356_v11 = vpop.f32.mrf.mxu1  ;;  %v3671_v46 = vadd.f32 %v7240_v28, %v3628_v30 }
 0x20d   : > { %v3670_v23 = vadd.f32 %v7240_v28, %v3627_v63  ;;  %v3967_v58 = vrot.slane %v3705_v0, 2  ;;  %5435 = vmatpush3.msra.mxu1 %v3879_v50  ;;  %v3708_v27 = vmax.f32 %v7324_v15, 0.0  ;;  %v3319_v51 = vadd.f32 %v7231_v13, %v7155_v39 }
 0x20e   : > { %v3535_v1 = vpop.f32.mrf.mxu0  ;;  %5436 = vmatprep.subr.mxu1 %v7563_v61  ;;  %v3326_v50 = vadd.f32 %v7277_v9, %v7179_v4  ;;  %v7370_v13 = vpop.f32.mrf.mxu1  ;;  %v3324_v30 = vadd.f32 %v7288_v35, %v7184_v60 }
 0x20f   : > { %v3706_v57 = vmax.f32 %v3670_v23, 0.0  ;;  %v3630_v53 = vadd.f32 %v3535_v1, %v3316_v36  ;;  %v3968_v38 = vsel %vm2142_vm5, %v3966_v43, %v3967_v58  ;;  %5437 = vmatpush3.msra.mxu1 %v3877_v10  ;;  %v4062_v52 = vrot.slane %v3708_v27, 2 }
 0x210   : > { %v5410_v22 = vpop.f32.mrf.mxu0  ;;  %5441 = vmatprep.subr.mxu1 %v7563_v61  ;;  %5439 = vmatmul.mubr.msk.f32.vlgmr.msra.gmra.mxu1 %vm3771_vm11, %v7300_v41  ;;  %v3974_v19 = vadd.f32 %v3968_v38, %v3702_v3  ;;  %v3707_v10 = vmax.f32 %v3671_v46, 0.0 }
 0x211   : > { %v3969_v12 = vrot.slane %v3706_v57, 2  ;;  %v3673_v16 = vadd.f32 %v7240_v28, %v3630_v53  ;;  %5445 = vmatprep.mubr.msk.f32.mxu1 %vm5571_vm9, %v7563_v61  ;;  %v3633_v4 = vadd.f32 %v5410_v22, %v3319_v51  ;;  %v7564_v51 = vld [vmem:[#allocation9_spill] sm:$0xff] }
 0x212   : > { %v3538_v44 = vpop.f32.mrf.mxu0  ;;  %v3980_v23 = vrot.slane %v3974_v19, 1  ;;  %v3272_v19 = vpop.f32.mrf.mxu1 }
 0x213   : > { %v3976_v40 = vadd.f32 %v3969_v12, %v3704_v33  ;;  %v3709_v25 = vmax.f32 %v3673_v16, 0.0  ;;  %v3631_v49 = vadd.f32 %v3538_v44, %v3317_v21  ;;  %v3970_v24 = vsel %vm2142_vm5, %v3967_v58, %v3969_v12 }
 0x214   : > { %v5413_v42 = vpop.f32.mrf.mxu0  ;;  %v3975_v0 = vadd.f32 %v3970_v24, %v3703_v56  ;;  %v3321_v58 = vadd.f32 %v7272_v5, %v7174_v45  ;;  %v3676_v56 = vadd.f32 %v7240_v28, %v3633_v4  ;;  %v5387_v46 = vpop.f32.mrf.mxu1 }
 0x215   : > { %v4063_v33 = vrot.slane %v3709_v25, 2  ;;  %v3674_v63 = vadd.f32 %v7240_v28, %v3631_v49  ;;  %v3983_v54 = vrot.slane %v3976_v40, 1  ;;  %v3636_v48 = vadd.f32 %v5413_v42, %v3322_v20 }
 0x216   : > { %v3551_v18 = vpop.f32.mrf.mxu0  ;;  %v3981_v15 = vrot.slane %v3975_v0, 1 }
 0x217   : > { %v4064_v17 = vsel %vm2142_vm5, %v4062_v52, %v4063_v33  ;;  %v3710_v37 = vmax.f32 %v3674_v63, 0.0  ;;  %v3634_v36 = vadd.f32 %v3551_v18, %v3320_v47  ;;  %v7363_v59 = vadd.f32 %v7240_v28, %v3636_v48 }
 0x218   : > { %v5414_v7 = vpop.f32.mrf.mxu0  ;;  %v4070_v43 = vadd.f32 %v4064_v17, %v3706_v57  ;;  %v3984_v6 = vsel %vm942_vm4, %v3981_v15, %v3983_v54  ;;  %v3982_v3 = vsel %vm942_vm4, %v3980_v23, %v3981_v15  ;;  %v3632_v57 = vadd.f32 %v7319_v62, %v3318_v8 }
 0x219   : > { %v4065_v1 = vrot.slane %v3710_v37, 2  ;;  %v3677_v39 = vadd.f32 %v7240_v28, %v3634_v36  ;;  %v3715_v53 = vmax.f32 %v7363_v59, 0.0  ;;  %5442 = vmatpush3.msra.mxu1 %v3984_v6  ;;  %v3323_v8 = vadd.f32 %v7262_v31, %v7169_v34 }
 0x21a   : > { %v3554_v29 = vpop.f32.mrf.mxu0  ;;  %5443 = vmatprep.subr.mxu1 %v7563_v61  ;;  %v4076_v49 = vrot.slane %v4070_v43, 5  ;;  %v3675_v60 = vadd.f32 %v7240_v28, %v3632_v57  ;;  %v3327_v63 = vadd.f32 %v7308_v26, %v7189_v14  ;;  %v3330_v17 = vadd.f32 %v7340_v32, %v7564_v51  ;;  %v7566_v32 = vld [vmem:[#allocation15_spill] sm:$0xff] }
 0x21b   : > { %v4066_v45 = vsel %vm2142_vm5, %v4063_v33, %v4065_v1  ;;  %v4072_v5 = vadd.f32 %v4065_v1, %v3708_v27  ;;  %v3713_v38 = vmax.f32 %v3677_v39, 0.0  ;;  %v4171_v9 = vrot.slane %v3715_v53, 2  ;;  %5444 = vmatpush3.msra.mxu1 %v3982_v3  ;;  %v3285_v39 = vpop.f32.mrf.mxu1 }
 0x21c   : > { %v3635_v21 = vadd.f32 %v3554_v29, %v3321_v58  ;;  %v5417_v12 = vpop.f32.mrf.mxu0  ;;  %v4071_v16 = vadd.f32 %v4066_v45, %v3707_v10  ;;  %5448 = vmatprep.subr.mxu1 %v7563_v61  ;;  %5446 = vmatmul.mubr.msk.f32.vlgmr.msra.gmra.mxu1 %vm3771_vm11, %v7300_v41  ;;  %v3325_v33 = vadd.f32 %v7327_v55, %v7194_v2  ;;  %v3711_v55 = vmax.f32 %v3675_v60, 0.0  ;;  %v7567_v45 = vld [vmem:[#allocation11_spill] sm:$0xff] }
 0x21d   : > { %v4079_v44 = vrot.slane %v4072_v5, 5  ;;  %v3640_v62 = vadd.f32 %v5417_v12, %v3326_v50  ;;  %v7382_v40 = vadd.f32 %v4171_v9, %v3713_v38  ;;  %5452 = vmatprep.mubr.msk.f32.mxu1 %vm5571_vm9, %v7563_v61  ;;  %v4168_v54 = vrot.slane %v3713_v38, 2  ;;  %v7568_v38 = vld [vmem:[#allocation12_spill] sm:$0xff] }
 0x21e   : > { %v3678_v27 = vadd.f32 %v7240_v28, %v3635_v21  ;;  %v3567_v22 = vpop.f32.mrf.mxu0  ;;  %v4077_v25 = vrot.slane %v4071_v16, 5  ;;  %v3637_v48 = vadd.f32 %v5414_v7, %v3323_v8  ;;  %v3712_v15 = vmax.f32 %v3676_v56, 0.0  ;;  %v7565_v7 = vld [vmem:[#allocation14_spill] sm:$0xff] }
 0x21f   : > { %v3683_v35 = vadd.f32 %v7240_v28, %v3640_v62  ;;  %v3638_v20 = vadd.f32 %v3567_v22, %v3324_v30  ;;  %v3328_v43 = vadd.f32 %v7356_v11, %v7565_v7  ;;  %v3331_v58 = vadd.f32 %v7370_v13, %v7566_v32  ;;  %v7571_v32 = vld [vmem:[#allocation3_spill] sm:$0xff] }
 0x220   : > { %v3714_v42 = vmax.f32 %v3678_v27, 0.0  ;;  %v5418_v24 = vpop.f32.mrf.mxu0  ;;  %v4080_v47 = vsel %vm3874_vm12, %v4077_v25, %v4079_v44  ;;  %v4078_v52 = vsel %vm3874_vm12, %v4076_v49, %v4077_v25  ;;  %v3680_v10 = vadd.f32 %v7240_v28, %v3637_v48  ;;  %v5388_v25 = vpop.f32.mrf.mxu1 }
 0x221   : > { %v3719_v34 = vmax.f32 %v3683_v35, 0.0  ;;  %v3681_v31 = vadd.f32 %v7240_v28, %v3638_v20  ;;  %5449 = vmatpush3.msra.mxu1 %v4080_v47  ;;  %v3329_v5 = vadd.f32 %v3272_v19, %v7567_v45  ;;  %v3334_v11 = vadd.f32 %v5387_v46, %v7568_v38 }
 0x222   : > { %v4169_v18 = vrot.slane %v3714_v42, 2  ;;  %v3570_v0 = vpop.f32.mrf.mxu0  ;;  %5450 = vmatprep.subr.mxu1 %v7563_v61  ;;  %v4185_v13 = vrot.slane %v7382_v40, 1  ;;  %v3641_v62 = vadd.f32 %v5418_v24, %v3327_v63  ;;  %v3716_v49 = vmax.f32 %v3680_v10, 0.0  ;;  %v7569_v24 = vld [vmem:[#allocation13_spill] sm:$0xff]  ;;  %v7570_v63 = vld [vmem:[#allocation2_spill] sm:$0xff] }
 0x223   : > { %v4275_v37 = vrot.slane %v3719_v34, 2  ;;  %v3717_v36 = vmax.f32 %v3681_v31, 0.0  ;;  %v3639_v2 = vadd.f32 %v3570_v0, %v3325_v33  ;;  %5451 = vmatpush3.msra.mxu1 %v4078_v52  ;;  %v3332_v47 = vadd.f32 %v3285_v39, %v7569_v24  ;;  %v3288_v0 = vpop.f32.mrf.mxu1 }
 0x224   : > { %v4170_v23 = vsel %vm2142_vm5, %v4168_v54, %v4169_v18  ;;  %v4172_v14 = vsel %vm2142_vm5, %v4169_v18, %v4171_v9  ;;  %v5421_v26 = vpop.f32.mrf.mxu0  ;;  %5455 = vmatprep.subr.mxu1 %v7563_v61  ;;  %5453 = vmatmul.mubr.msk.f32.vlgmr.msra.gmra.mxu1 %vm3771_vm11, %v7300_v41  ;;  %v3335_v46 = vadd.f32 %v5388_v25, %v7570_v63 }
 0x225   : > { %v4282_v50 = vadd.f32 %v4275_v37, %v3717_v36  ;;  %v3682_v1 = vadd.f32 %v7240_v28, %v3639_v2  ;;  %5459 = vmatprep.mubr.msk.f32.mxu1 %vm5571_vm9, %v7563_v61  ;;  %v3644_v6 = vadd.f32 %v5421_v26, %v3330_v17  ;;  %v4177_v3 = vadd.f32 %v4172_v14, %v3712_v15 }
 0x226   : > { %v3583_v29 = vpop.f32.mrf.mxu0  ;;  %v4176_v57 = vadd.f32 %v4170_v23, %v3711_v55  ;;  %v4272_v44 = vrot.slane %v3717_v36, 2  ;;  %v3684_v54 = vadd.f32 %v7240_v28, %v3641_v62 }
 0x227   : > { %v3718_v4 = vmax.f32 %v3682_v1, 0.0  ;;  %v3642_v9 = vadd.f32 %v3583_v29, %v3328_v43  ;;  %v3687_v21 = vadd.f32 %v7240_v28, %v3644_v6  ;;  %v4183_v16 = vrot.slane %v4177_v3, 1 }
 0x228   : > { %v5422_v12 = vpop.f32.mrf.mxu0  ;;  %v4182_v30 = vrot.slane %v4176_v57, 1  ;;  %v4289_v51 = vrot.slane %v4282_v50, 5  ;;  %v3720_v3 = vmax.f32 %v3684_v54, 0.0 }
 0x229   : > { %v4273_v27 = vrot.slane %v3718_v4, 2  ;;  %v3645_v22 = vadd.f32 %v5422_v12, %v3331_v58  ;;  %v3685_v8 = vadd.f32 %v7240_v28, %v3642_v9  ;;  %v4186_v19 = vsel %vm942_vm4, %v4183_v16, %v4185_v13 }
 0x22a   : > { %v3586_v60 = vpop.f32.mrf.mxu0  ;;  %v4184_v35 = vsel %vm942_vm4, %v4182_v30, %v4183_v16  ;;  %v3723_v56 = vmax.f32 %v3687_v21, 0.0  ;;  %5456 = vmatpush3.msra.mxu1 %v4186_v19  ;;  %v3333_v58 = vadd.f32 %v3288_v0, %v7571_v32 }
 0x22b   : > { %v4274_v40 = vsel %vm2142_vm5, %v4272_v44, %v4273_v27  ;;  %v4276_v20 = vsel %vm2142_vm5, %v4273_v27, %v4275_v37  ;;  %v7428_v42 = vadd.f32 %v7240_v28, %v3645_v22  ;;  %v3643_v52 = vadd.f32 %v3586_v60, %v3329_v5  ;;  %5457 = vmatprep.subr.mxu1 %v7563_v61 }
 0x22c   : > { %v5425_v33 = vpop.f32.mrf.mxu0  ;;  %v4281_v34 = vadd.f32 %v4276_v20, %v3716_v49  ;;  %v4280_v31 = vadd.f32 %v4274_v40, %v3715_v53  ;;  %5458 = vmatpush3.msra.mxu1 %v4184_v35  ;;  %v4377_v36 = vrot.slane %v3723_v56, 2  ;;  %v3721_v2 = vmax.f32 %v3685_v8, 0.0 }
 0x22d   : > { %v3724_v48 = vmax.f32 %v7428_v42, 0.0  ;;  %v3648_v18 = vadd.f32 %v5425_v33, %v3334_v11  ;;  %v3686_v17 = vadd.f32 %v7240_v28, %v3643_v52  ;;  %5462 = vmatprep.subr.mxu1 %v7563_v61  ;;  %5460 = vmatmul.mubr.msk.f32.vlgmr.msra.gmra.mxu1 %vm3771_vm11, %v7300_v41  ;;  %v7572_v42 = vmov 0  }
 0x22e   : > { %v3599_v37 = vpop.f32.mrf.mxu0  ;;  %v4287_v59 = vrot.slane %v4281_v34, 5  ;;  %v4286_v53 = vrot.slane %v4280_v31, 5  ;;  %5466 = vmatprep.mubr.msk.f32.mxu1 %vm5571_vm9, %v7563_v61  ;;  %3744 = vst.msk [vmem:[%s7107_s18 + $0x30] sm:$0x7] %vm3743_vm13, %v7572_v42 }
 0x22f   : > { %v4379_v55 = vrot.slane %v3724_v48, 2  ;;  %v3691_v15 = vadd.f32 %v7240_v28, %v3648_v18  ;;  %v3722_v23 = vmax.f32 %v3686_v17, 0.0  ;;  %v3646_v14 = vadd.f32 %v3599_v37, %v3332_v47 }
 0x230   : > { %v5426_v26 = vpop.f32.mrf.mxu0  ;;  %v4290_v7 = vsel %vm3874_vm12, %v4287_v59, %v4289_v51  ;;  %v4288_v43 = vsel %vm3874_vm12, %v4286_v53, %v4287_v59 }
 0x231   : > { %v3649_v50 = vadd.f32 %v5426_v26, %v3335_v46  ;;  %5463 = vmatpush3.msra.mxu1 %v4290_v7  ;;  %v4380_v1 = vsel %vm2142_vm5, %v4377_v36, %v4379_v55  ;;  %v4376_v39 = vrot.slane %v3722_v23, 2  ;;  %v4386_v10 = vadd.f32 %v4379_v55, %v3722_v23 }
 0x232   : > { %v3602_v6 = vpop.f32.mrf.mxu0  ;;  %5464 = vmatprep.subr.mxu1 %v7563_v61  ;;  %v4385_v29 = vadd.f32 %v4380_v1, %v3721_v2  ;;  %v3727_v57 = vmax.f32 %v3691_v15, 0.0  ;;  %v3689_v11 = vadd.f32 %v7240_v28, %v3646_v14 }
 0x233   : > { %v3692_v45 = vadd.f32 %v7240_v28, %v3649_v50  ;;  %v3647_v5 = vadd.f32 %v3602_v6, %v3333_v58  ;;  %5465 = vmatpush3.msra.mxu1 %v4288_v43  ;;  %v4393_v38 = vrot.slane %v4386_v10, 1  ;;  %v4378_v9 = vsel %vm2142_vm5, %v4376_v39, %v4377_v36 }
 0x234   : > { %5469 = vmatprep.subr.mxu1 %v7563_v61  ;;  %5467 = vmatmul.mubr.msk.f32.vlgmr.msra.gmra.mxu1 %vm3771_vm11, %v7300_v41  ;;  %v4391_v4 = vrot.slane %v4385_v29, 1  ;;  %v4384_v12 = vadd.f32 %v4378_v9, %v3720_v3  ;;  %v4473_v30 = vrot.slane %v3727_v57, 2  ;;  %v3725_v22 = vmax.f32 %v3689_v11, 0.0 }
 0x235   : > { %v3728_v13 = vmax.f32 %v3692_v45, 0.0  ;;  %v3690_v21 = vadd.f32 %v7240_v28, %v3647_v5  ;;  %5473 = vmatprep.mubr.msk.f32.mxu1 %vm5571_vm9, %v7563_v61 }
 0x236   : > { %v4394_v16 = vsel %vm942_vm4, %v4391_v4, %v4393_v38  ;;  %v4390_v27 = vrot.slane %v4384_v12, 1 }
 0x237   : > { %v4475_v44 = vrot.slane %v3728_v13, 2  ;;  %v3726_v62 = vmax.f32 %v3690_v21, 0.0  ;;  %5470 = vmatpush3.msra.mxu1 %v4394_v16 }
 0x238   : > { %5471 = vmatprep.subr.mxu1 %v7563_v61  ;;  %v4392_v28 = vsel %vm942_vm4, %v4390_v27, %v4391_v4 }
 0x239   : > { %v4476_v25 = vsel %vm2142_vm5, %v4473_v30, %v4475_v44  ;;  %v4472_v49 = vrot.slane %v3726_v62, 2  ;;  %v4482_v8 = vadd.f32 %v4475_v44, %v3726_v62  ;;  %5472 = vmatpush3.msra.mxu1 %v4392_v28 }
 0x23a   : > { %v4481_v19 = vadd.f32 %v4476_v25, %v3725_v22  ;;  %5476 = vmatprep.subr.mxu1 %v7563_v61  ;;  %5474 = vmatmul.mubr.msk.f32.vlgmr.msra.gmra.mxu1 %vm3771_vm11, %v7300_v41 }
 0x23b   : > { %v4489_v60 = vrot.slane %v4482_v8, 5  ;;  %v4474_v35 = vsel %vm2142_vm5, %v4472_v49, %v4473_v30  ;;  %5480 = vmatprep.mubr.msk.f32.mxu1 %vm5571_vm9, %v7563_v61 }
 0x23c   : > { %v4487_v40 = vrot.slane %v4481_v19, 5  ;;  %v4480_v20 = vadd.f32 %v4474_v35, %v3724_v48 }
 0x23e   : > { %v4490_v56 = vsel %vm3874_vm12, %v4487_v40, %v4489_v60  ;;  %v4486_v24 = vrot.slane %v4480_v20, 5 }
 0x23f   : > { %5477 = vmatpush3.msra.mxu1 %v4490_v56 }
 0x240   : > { %5478 = vmatprep.subr.mxu1 %v7563_v61  ;;  %v4488_v47 = vsel %vm3874_vm12, %v4486_v24, %v4487_v40 }
 0x241   : > { %5479 = vmatpush3.msra.mxu1 %v4488_v47 }
 0x242   : > { %5481 = vmatmul.mubr.msk.f32.vlgmr.msra.gmra.mxu1 %vm3771_vm11, %v7300_v41 }
 0x2c8   : > { %v3841_v52 = vpop.f32.mrf.mxu1 }
 0x2c9   : > { %v4884_v33 = vpack.c.bf16 %v3841_v52, %v3841_v52 }
 0x2ca   : > { %v5433_v34 = vpop.f32.mrf.mxu1 }
 0x2cb   : > { %v3849_v31 = vrot.slane %v4884_v33, 6 }
 0x2cd   : > { %v3850_v61 = vrot.slane %v3849_v31, 4  ;;  %3854 = vst.msk [vmem:[%s7107_s18 + $0x4] sm:$0xc] %vm3853_vm14, %v3849_v31 }
 0x2cf   : > { %3856 = vst.msk [vmem:[%s7107_s18 + $0x8] sm:$0x3] %vm3855_vm15, %v3850_v61 }
 0x2d0   : > { %v3948_v63 = vpop.f32.mrf.mxu1 }
 0x2d1   : > { %v4885_v41 = vpack.c.bf16 %v3948_v63, %v3948_v63 }
 0x2d2   : > { %v5440_v46 = vpop.f32.mrf.mxu1 }
 0x2d3   : > { %v3956_v54 = vrot.slane %v4885_v41, 5 }
 0x2d5   : > { %v3957_v48 = vrot.slane %v3956_v54, 4  ;;  %3961 = vst.msk [vmem:[%s7107_s18 + $0x8] sm:$0x8] %vm3960_vm0, %v3956_v54 }
 0x2d7   : > { %3962 = vst.msk [vmem:[%s7107_s18 + $0xc] sm:$0x7] %vm3743_vm13, %v3957_v48 }
 0x2dc   : > { %v4053_v18 = vpop.f32.mrf.mxu1 }
 0x2dd   : > { %v4057_v0 = vpack.c.bf16 %v4053_v18, %v4053_v18 }
 0x2de   : > { %v5447_v51 = vpop.f32.mrf.mxu1 }
 0x2df   : > { %4058 = vst.msk [vmem:[%s7107_s18 + $0x10] sm:$0xf] %vm3730_vm10, %v4057_v0 }
 0x2e4   : > { %v4149_v17 = vpop.f32.mrf.mxu1 }
 0x2e5   : > { %v4886_v37 = vpack.c.bf16 %v4149_v17, %v4149_v17 }
 0x2e6   : > { %v5454_v59 = vpop.f32.mrf.mxu1 }
 0x2e7   : > { %v4157_v53 = vrot.slane %v4886_v37, 7 }
 0x2e9   : > { %v4158_v36 = vrot.slane %v4157_v53, 4  ;;  %4162 = vst.msk [vmem:[%s7107_s18 + $0x14] sm:$0xe] %vm4161_vm1, %v4157_v53 }
 0x2eb   : > { %4164 = vst.msk [vmem:[%s7107_s18 + $0x18] sm:$0x1] %vm4163_vm2, %v4158_v36 }
 0x2ed   : > { %v4255_v2 = vpop.f32.mrf.mxu1 }
 0x2ee   : > { %v4887_v55 = vpack.c.bf16 %v4255_v2, %v4255_v2 }
 0x2ef   : > { %v5461_v15 = vpop.f32.mrf.mxu1 }
 0x2f0   : > { %v4263_v23 = vrot.slane %v4887_v55, 6 }
 0x2f2   : > { %v4264_v14 = vrot.slane %v4263_v23, 4  ;;  %4267 = vst.msk [vmem:[%s7107_s18 + $0x18] sm:$0xc] %vm3853_vm14, %v4263_v23 }
 0x2f4   : > { %v4359_v26 = vpop.f32.mrf.mxu1  ;;  %4268 = vst.msk [vmem:[%s7107_s18 + $0x1c] sm:$0x3] %vm3855_vm15, %v4264_v14 }
 0x2f5   : > { %v4888_v7 = vpack.c.bf16 %v4359_v26, %v4359_v26 }
 0x2f6   : > { %v5468_v43 = vpop.f32.mrf.mxu1 }
 0x2f7   : > { %v4367_v32 = vrot.slane %v4888_v7, 5 }
 0x2f9   : > { %v4368_v58 = vrot.slane %v4367_v32, 4  ;;  %4371 = vst.msk [vmem:[%s7107_s18 + $0x1c] sm:$0x8] %vm3960_vm0, %v4367_v32 }
 0x2fa   : > { %v4463_v50 = vpop.f32.mrf.mxu1 }
 0x2fb   : > { %4372 = vst.msk [vmem:[%s7107_s18 + $0x20] sm:$0x7] %vm3743_vm13, %v4368_v58  ;;  %v4467_v1 = vpack.c.bf16 %v4463_v50, %v4463_v50 }
 0x2fc   : > { %v5475_v39 = vpop.f32.mrf.mxu1 }
 0x2fd   : > { %4468 = vst.msk [vmem:[%s7107_s18 + $0x24] sm:$0xf] %vm3730_vm10, %v4467_v1 }
 0x302   : > { %v4559_v10 = vpop.f32.mrf.mxu1 }
 0x303   : > { %v4889_v6 = vpack.c.bf16 %v4559_v10, %v4559_v10 }
 0x304   : > { %v5482_v29 = vpop.f32.mrf.mxu1 }
 0x305   : > { %v4567_v3 = vrot.slane %v4889_v6, 7 }
 0x307   : > { %v4568_v57 = vrot.slane %v4567_v3, 4  ;;  %4571 = vst.msk [vmem:[%s7107_s18 + $0x28] sm:$0xe] %vm4161_vm1, %v4567_v3 }
 0x309   : > { %4572 = vst.msk [vmem:[%s7107_s18 + $0x2c] sm:$0x1] %vm4163_vm2, %v4568_v57 }
 0x30a PF: > { %s14_s15 = sadd.s32 1, %s5567_s15  }
 0x30b   : > { %p11_p4 = scmp.ge.s32.totalorder %s14_s15, 4  }
 0x30d   :  { %13 = sbr.rel (!%p11_p4) target bundleno = 1 (0x1), region = 74 }

</bundles_post_ra>
